<compile_context>
chip_gen: v5e
topology: v5e:2x2
jax: 0.10.0
libtpu: 0.0.40
codegen_flags: <defaults>
</compile_context>

<pallas_src>
import jax
import jax.numpy as jnp
from jax.experimental import pallas as pl
from jax.experimental.pallas import tpu as pltpu

IN_FEATURES = 2048
OUT_FEATURES = 1000

TN = 512  # tile along padded out_features -> 2 N-blocks (1024 / 512).


def _linear_kernel(x_ref, w_ref, b_ref, o_ref):
    # x_ref: (1, K) resident; w_ref: (K, TN) streamed; b_ref/o_ref: (1, TN).
    o_ref[...] = (
        b_ref[...]
        + jnp.dot(x_ref[...], w_ref[...], preferred_element_type=jnp.float32)
    ).astype(o_ref.dtype)


def prepare_params(weight, bias):
    """One-time parameter prep (outside the hot path).

    Pads out_features up to a multiple of TN and transposes the torch-layout
    (out_features, in_features) weight to (in_features, n_pad) so the kernel's
    dot is a native M-N contraction on the MXU.
    """
    out_f, in_f = weight.shape
    n_pad = pl.cdiv(out_f, TN) * TN
    w_pad = jnp.pad(weight, ((0, n_pad - out_f), (0, 0))).T  # (in_f, n_pad)
    b_pad = jnp.pad(bias, (0, n_pad - out_f)).reshape(1, n_pad)
    return jnp.asarray(w_pad), b_pad


def linear(x, w_pad, b_pad, out_features):
    """y = x @ weight.T + bias  (torch.nn.Linear forward), batch == 1."""
    batch, in_f = x.shape
    assert batch == 1, "this GEMV kernel is specialized for batch == 1"
    k, n_pad = w_pad.shape
    assert k == in_f and n_pad % TN == 0

    bytes_accessed = (
        w_pad.size * w_pad.dtype.itemsize
        + x.size * x.dtype.itemsize
        + b_pad.size * b_pad.dtype.itemsize
        + batch * n_pad * x.dtype.itemsize
    )

    y_pad = pl.pallas_call(
        _linear_kernel,
        out_shape=jax.ShapeDtypeStruct((batch, n_pad), x.dtype),
        grid_spec=pltpu.PrefetchScalarGridSpec(
            num_scalar_prefetch=0,
            grid=(n_pad // TN,),
            in_specs=[
                pl.BlockSpec((batch, in_f), lambda n: (0, 0)),  # x, VMEM-resident
                pl.BlockSpec((in_f, TN), lambda n: (0, n)),     # weight (K, N)
                pl.BlockSpec((1, TN), lambda n: (0, n)),        # bias
            ],
            out_specs=pl.BlockSpec((batch, TN), lambda n: (0, n)),
        ),
        compiler_params=pltpu.CompilerParams(
            dimension_semantics=("parallel",),
        ),
        cost_estimate=pl.CostEstimate(
            flops=2 * batch * in_f * out_features,
            transcendentals=0,
            bytes_accessed=bytes_accessed,
        ),
    )(x, w_pad, b_pad)

    # Drop the zero-padded tail columns.
    return y_pad[:, :out_features]


if __name__ == "__main__":
    key = jax.random.PRNGKey(0)
    kx, kw, kb = jax.random.split(key, 3)

    # Deterministic synthetic parameters (shapes from nn.Linear(2048, 1000)).
    x = jax.random.normal(kx, (1, IN_FEATURES), dtype=jnp.float32)
    weight = jax.random.normal(kw, (OUT_FEATURES, IN_FEATURES), dtype=jnp.float32) * 0.02
    bias = jax.random.normal(kb, (OUT_FEATURES,), dtype=jnp.float32) * 0.02

    w_pad, b_pad = prepare_params(weight, bias)  # one-time, outside hot path
    y = linear(x, w_pad, b_pad, OUT_FEATURES)
    jax.block_until_ready(y)

    # Cross-check against plain JAX reference.
    y_ref = x @ weight.T + bias
    assert y.shape == (1, OUT_FEATURES)
    assert jnp.allclose(y, y_ref, atol=1e-3, rtol=1e-3)

    print("KERNEL_OK")
</pallas_src>

<mosaic_0001>
module attributes {stable_mosaic.version = 11 : i64} {
  func.func @_linear_kernel(%arg0: i32, %arg1: memref<1x2048xf32, #tpu.memory_space<vmem>>, %arg2: memref<2048x512xf32, #tpu.memory_space<vmem>>, %arg3: memref<1x512xf32, #tpu.memory_space<vmem>>, %arg4: memref<1x512xf32, #tpu.memory_space<vmem>>) attributes {dimension_semantics = [#tpu.dimension_semantics<parallel>], iteration_bounds = array<i64: 2>, scalar_prefetch = 0 : i64, scratch_operands = 0 : i64, tpu.core_type = #tpu.core_type<tc>, window_params = [{pipeline_mode = #tpu.pipeline_mode<synchronous>, transform_indices = @transform_0, window_bounds = array<i64: 1, 2048>}, {transform_indices = @transform_1, window_bounds = array<i64: 2048, 512>}, {transform_indices = @transform_2, window_bounds = array<i64: 1, 512>}, {transform_indices = @transform_3, window_bounds = array<i64: 1, 512>}]} {
    %c0 = arith.constant 0 : index
    %c0_0 = arith.constant 0 : index
    %0 = vector.load %arg3[%c0, %c0_0] : memref<1x512xf32, #tpu.memory_space<vmem>>, vector<1x512xf32>
    %c0_1 = arith.constant 0 : index
    %c0_2 = arith.constant 0 : index
    %1 = vector.load %arg1[%c0_1, %c0_2] : memref<1x2048xf32, #tpu.memory_space<vmem>>, vector<1x2048xf32>
    %c0_3 = arith.constant 0 : index
    %c0_4 = arith.constant 0 : index
    %2 = vector.load %arg2[%c0_3, %c0_4] : memref<2048x512xf32, #tpu.memory_space<vmem>>, vector<2048x512xf32>
    %cst = arith.constant dense<0.000000e+00> : vector<1x512xf32>
    %3 = tpu.matmul %1, %2, %cst {dimension_numbers = #tpu.dot_dimension_numbers<[1], [0], [0], [1], [0, 0, 1, 1], [], []>} : vector<1x2048xf32>, vector<2048x512xf32>, vector<1x512xf32> -> vector<1x512xf32>
    %4 = arith.addf %0, %3 : vector<1x512xf32>
    %c0_5 = arith.constant 0 : index
    %c0_6 = arith.constant 0 : index
    %5 = vector.load %arg4[%c0_5, %c0_6] : memref<1x512xf32, #tpu.memory_space<vmem>>, vector<1x512xf32>
    tpu.vector_store %arg4[%c0_5, %c0_6], %4 {strides = array<i32>} : memref<1x512xf32, #tpu.memory_space<vmem>>, vector<1x512xf32>,
    return
  }
  func.func @transform_0(%arg0: i32) -> (i32, i32) {
    %c0_i32 = arith.constant 0 : i32
    %c0_i32_0 = arith.constant 0 : i32
    %c0_i32_1 = arith.constant 0 : i32
    return %c0_i32, %c0_i32_0 : i32, i32
  }
  func.func @transform_1(%arg0: i32) -> (i32, i32) {
    %c0_i32 = arith.constant 0 : i32
    %c0_i32_0 = arith.constant 0 : i32
    return %c0_i32, %arg0 : i32, i32
  }
  func.func @transform_2(%arg0: i32) -> (i32, i32) {
    %c0_i32 = arith.constant 0 : i32
    %c0_i32_0 = arith.constant 0 : i32
    return %c0_i32, %arg0 : i32, i32
  }
  func.func @transform_3(%arg0: i32) -> (i32, i32) {
    %c0_i32 = arith.constant 0 : i32
    %c0_i32_0 = arith.constant 0 : i32
    return %c0_i32, %arg0 : i32, i32
  }
}

</mosaic_0001>

<bundles_post_ra>
// kernel: tpu_custom_call.1
= control target key start
LH: loop header
LB: loop body
LE: loop exit
PB: predicated region body
PF: predicated region fallthrough
CT: control target
= control target key end

     0   :  { %s4326_s0 = inlined_call_operand.hbm [shape: f32[1,2048], index: 0, kind: input, shape index: {}]   ;;  %s4327_s1 = inlined_call_operand.hbm [shape: f32[2048,1024], index: 1, kind: input, shape index: {}]   ;;  %s4328_s2 = inlined_call_operand.hbm [shape: f32[1,1024], index: 2, kind: input, shape index: {}]   ;;  %s4329_s3 = inlined_call_operand.hbm [shape: f32[1,1024], index: 3, kind: output, shape index: {}]  }
   0x1   :  { %4330 = sst [smem:[#allocation12_spill]] %s4326_s0 }
   0x2   :  { %8 = vsyncpa [#allocation3], 0 }
   0x3   :  { %9 = vsyncpa [#allocation6], 0 }
   0x4   :  { %11 = vsyncpa [#allocation6 + $0x1], 0 }
   0x5   :  { %12 = vsyncpa [#allocation4], 0 }
   0x6   :  { %14 = vsyncpa [#allocation4 + $0x1], 0  ;;  %s2994_s12 = smov 0   ;;  %s2996_s13 = smov 0  }
   0x7   :  { %s2998_s14 = smov 0   ;;  %s3000_s15 = smov 0  }
   0x8 LB: > { %s3015_s16 = sadd.s32 1, %s2968_s15   ;;  %s48_s17 = sadd.s32 1, %s2964_s14  ;;  %s2968_s15 = sphi %s3000_s15, %s4341_s15   ;;  %s2964_s14 = sphi %s2998_s14, %s4340_s14   ;;  %s2960_s13 = sphi %s2996_s13, %s4339_s13   ;;  %s2956_s12 = sphi %s2994_s12, %s4338_s12  }
   0x9   : > { %s45_s18 = ssub.s32 %s2968_s15, %s3015_s16  ;;  %p55_p0 = scmp.ne.s32.totalorder %s2964_s14, %s2960_s13 }
   0xa   : > { %p46_p1 = scmp.eq.s32.totalorder %s45_s18, 0  ;;  %p56_p2 = scmp.eq.s32.totalorder %s2968_s15, 0 }
   0xb   : > { %p2769_p4 = scmp.lt.s32.totalorder %s2968_s15, 2  ;;  %s149_s20 = sand.u32 1, %s2968_s15  }
   0xc   : > { %s3026_s19 = scalar_select %p46_p1, %s2964_s14, %s48_s17  }
   0xd   : > { %p57_p5 = por %p56_p2, %p55_p0  ;;  %s151_s21 = sand.u32 1, %s2964_s14  }
   0xe   : > { %s2728_s22 = sshll.u32 %s151_s21, 13  ;;  %s2742_s23 = sshll.u32 %s2968_s15, 5 }
   0xf   : > { %s158_s26 = scalar_lea.hbm %s4327_s1, %s2742_s23  ;;  %s153_s28 = scalar_lea.vmem [#allocation5], %s2728_s22 }
  0x10   : > { %s159_s27 = sshll.u32 %s158_s26, 4  ;;  %s161_s29 = sshll.u32 %s153_s28, 4  ;;  %s160_s27 = int_to_ptr.hbm [resolvable:$true] %s159_s27  ;;  %s162_s29 = int_to_ptr.vmem [resolvable:$true] %s161_s29 }
  0x11   : > { %p3041_p6 = pnand %p2769_p4, %p57_p5  ;;  %s3045_s4 = scalar_lea.sflag [#allocation6], %s149_s20 }
  0x12   : > { %s2808_s5 = sshra.s32 %s160_s27, 4  ;;  %s2815_s9 = scalar_lea.hbm %s4327_s1, 16384  ;;  %s2809_s5 = int_to_ptr.hbm [resolvable:$true] %s2808_s5 }
  0x13   : > { %s2810_s6 = scalar_lea.hbm %s2809_s5, 8192  ;;  %p2812_p8 = pneg %p3041_p6 }
  0x14   : > { %p2811_p7 = scmp.ne.s32.totalorder %s2809_s5, %s2810_s6  ;;  %p2816_p11 = scmp.lt.s32.totalorder %s2809_s5, %s4327_s1 }
  0x15   : > { %p2817_p12 = scmp.lt.s32.totalorder %s2815_s9, %s2810_s6 }
  0x16   : > { %p2813_p9 = pnand %p2812_p8, %p2811_p7 }
  0x17   : > { %p2818_p13 = por %p2817_p12, %p2816_p11 }
  0x18   : > { %p2814_p10 = pneg %p2813_p9 }
  0x1a   : > { %p2819_p1 = pnand %p2818_p13, %p2814_p10 }
  0x1c   : > { %2822 = shalt.err (!%p2819_p1)
}
  0x1d   : > { %s2970_s17 = smov 1024   ;;  %s2971_s18 = smov 512  }
  0x1e   : > { %s2972_s20 = smov 32   ;;  %s3062_s22 = sadd.s32 4294967295, %s2968_s15  }
  0x1f   : > { %2760 = dma.hbm_to_vmem [thread:$0]  (!%p3041_p6), %s160_s27, 131072, %s162_s29, %s3045_s4, %s2970_s17, %s2971_s18, %s2972_s20  }
  0x20   : > { %s2724_s23 = sadd.s32 4294967294, %s2968_s15   ;;  %p61_p2 = scmp.ne.s32.totalorder %s2960_s13, %s2956_s12 }
  0x21   : > { %p62_p4 = scmp.eq.s32.totalorder %s3062_s22, 0  ;;  %p111_p5 = scmp.eq.s32.totalorder %s3062_s22, 1 }
  0x22   : > { %p117_p7 = scmp.eq.s32.totalorder %s2724_s23, 1  ;;  %p2725_p9 = scmp.ge.s32.totalorder %s2968_s15, 1 }
  0x23   : > { %p3072_p10 = por %p62_p4, %p61_p2  ;;  %p3079_p11 = por %p111_p5, %p55_p0 }
  0x24   : > { %p3083_p12 = por %p117_p7, %p61_p2  ;;  %p124_p13 = scmp.lt.s32.totalorder %s2968_s15, 3 }
  0x25   : > { %s4335_s0 = sld [smem:[#allocation12_spill]]  ;;  %s2731_s6 = sshll.u32 %s151_s21, 2 }
  0x26   : > { %p3091_p1 = pnand %p2725_p9, %p124_p13  ;;  %s2973_s7 = smov [#allocation2]  }
  0x27   : > { %s138_s8 = sshll.u32 %s2973_s7, 4  ;;  %s2732_s9 = sshll.u32 %s2968_s15, 2  ;;  %s139_s8 = int_to_ptr.vmem [resolvable:$true] %s138_s8 }
  0x28   : > { %p2753_p0 = pneg %p3091_p1  ;;  %s179_s17 = scalar_lea.hbm %s4328_s2, %s2732_s9 }
  0x29   : > { %s175_s18 = scalar_lea.vmem [#allocation7], %s2731_s6  ;;  %s181_s23 = sshll.u32 %s179_s17, 4  ;;  %s182_s23 = int_to_ptr.hbm [resolvable:$true] %s181_s23 }
  0x2a   : > { %p2754_p2 = pnand %p2753_p0, %p62_p4  ;;  %s183_s20 = sshll.u32 %s175_s18, 4  ;;  %s184_s20 = int_to_ptr.vmem [resolvable:$true] %s183_s20 }
  0x2b   : > { %s136_s29 = sshll.u32 %s4335_s0, 4  ;;  %s2868_s21 = sshra.s32 %s182_s23, 4  ;;  %s137_s29 = int_to_ptr.hbm [resolvable:$true] %s136_s29  ;;  %s2869_s21 = int_to_ptr.hbm [resolvable:$true] %s2868_s21 }
  0x2c   : > { %2756 = dma.hbm_to_vmem [thread:$0]  (!%p2754_p2), %s137_s29, 256, %s139_s8, [#allocation3]  }
  0x2d   : > { %s2870_s27 = scalar_lea.hbm %s2869_s21, 4  ;;  %s2875_s0 = scalar_lea.hbm %s4328_s2, 8 }
  0x2e   : > { %p2871_p5 = scmp.ne.s32.totalorder %s2869_s21, %s2870_s27  ;;  %p2876_p13 = scmp.lt.s32.totalorder %s2869_s21, %s4328_s2 }
  0x2f   : > { %p2877_p0 = scmp.lt.s32.totalorder %s2875_s0, %s2870_s27 }
  0x30   : > { %p2873_p7 = pnand %p2871_p5, %p2812_p8 }
  0x31   : > { %p2878_p2 = por %p2877_p0, %p2876_p13 }
  0x32   : > { %p2874_p9 = pneg %p2873_p7 }
  0x34   : > { %p2879_p3 = pnand %p2878_p2, %p2874_p9 }
  0x36   : > { %2882 = shalt.err (!%p2879_p3)
}
  0x37   : > { %2763 = dma.hbm_to_vmem [thread:$0]  (!%p3041_p6), %s182_s23, 64, %s184_s20, %s3045_s4  }
  0x38   : > { %192 = sbr.rel (%p3091_p1) target bundleno = 1098 (0x44a), region = 32 }
  0x3d   : > { %2943 = dma.done.wait (%p62_p4), [#allocation3], 256  }
  0x3e   : > { %2945 = vsyncadd (%p62_p4), [#allocation3], 4294967040  ;;  %s199_s0 = sand.u32 1, %s3062_s22   ;;  %s3125_s29 = sand.u32 1, %s2960_s13  }
  0x3f   : > { %s2735_s6 = sshll.u32 %s3125_s29, 13  ;;  %s200_s30 = scalar_lea.sflag [#allocation6], %s199_s0 }
  0x40   : > { %s3128_s8 = scalar_lea.vmem [#allocation5], %s2735_s6 }
  0x41   : > { %2947 = dma.done.wait (%p3072_p10), %s200_s30, 131136  }
  0x42   : > { %2949 = vsyncadd (%p3072_p10), %s200_s30, 4294836160  ;;  %v308_v0 = vld [vmem:[%s3128_s8 + $0x1e0] sm:$0xff]  ;;  %vm2593_vm0 = vcmask 1040384   ;;  %s2736_s4 = sshll.u32 %s3125_s29, 2  ;;  %s2739_s24 = sshll.u32 %s3062_s22, 2  ;;  %vm2595_vm1 = vcmask 1042434  }
  0x43   : > { %v436_v1 = vld [vmem:[%s3128_s8 + $0x5e0] sm:$0xff]  ;;  %1306 = vmatpush.msra.mxu0 %v308_v0  ;;  %s2617_s17 = scalar_lea.hbm %s4329_s3, %s2739_s24  ;;  %vm2597_vm2 = vcmask 1041408   ;;  %s213_s18 = scalar_lea.vmem [#allocation7], %s2736_s4 }
  0x44   : > { %v304_v2 = vld [vmem:[%s3128_s8 + $0x1c0] sm:$0xff]  ;;  %1346 = vmatpush.msra.mxu2 %v436_v1  ;;  %s241_s20 = scalar_lea.vmem [#allocation8], %s2736_s4  ;;  %s2621_s22 = sshll.u32 %s2617_s17, 4  ;;  %s2622_s22 = int_to_ptr.hbm [resolvable:$true] %s2621_s22 }
  0x45   : > { %v372_v3 = vld [vmem:[%s3128_s8 + $0x3e0] sm:$0xff]  ;;  %1307 = vmatpush.msra.mxu0 %v304_v2  ;;  %s2619_s23 = sshll.u32 %s241_s20, 4  ;;  %s2607_s21 = scalar_lea.sflag [#allocation4], %s3125_s29  ;;  %s2620_s23 = int_to_ptr.vmem [resolvable:$true] %s2619_s23 }
  0x46   : > { %v432_v4 = vld [vmem:[%s3128_s8 + $0x5c0] sm:$0xff]  ;;  %1326 = vmatpush.msra.mxu1 %v372_v3  ;;  %s2912_s27 = sshra.s32 %s2622_s22, 4  ;;  %s2918_s9 = scalar_lea.hbm %s4329_s3, 8  ;;  %s2913_s27 = int_to_ptr.hbm [resolvable:$true] %s2912_s27 }
  0x47   : > { %v500_v5 = vld [vmem:[%s3128_s8 + $0x7e0] sm:$0xff]  ;;  %1347 = vmatpush.msra.mxu2 %v432_v4  ;;  %s2914_s28 = scalar_lea.hbm %s2913_s27, 4  ;;  %p2919_p4 = scmp.lt.s32.totalorder %s2913_s27, %s4329_s3 }
  0x48   : > { %1366 = vmatpush.msra.mxu3 %v500_v5  ;;  %v300_v6 = vld [vmem:[%s3128_s8 + $0x1a0] sm:$0xff]  ;;  %p2915_p3 = scmp.ne.s32.totalorder %s2913_s27, %s2914_s28  ;;  %p2920_p10 = scmp.lt.s32.totalorder %s2918_s9, %s2914_s28 }
  0x49   : > { %v368_v7 = vld [vmem:[%s3128_s8 + $0x3c0] sm:$0xff]  ;;  %1308 = vmatpush.msra.mxu0 %v300_v6 }
  0x4a   : > { %v428_v8 = vld [vmem:[%s3128_s8 + $0x5a0] sm:$0xff]  ;;  %1327 = vmatpush.msra.mxu1 %v368_v7  ;;  %p2916_p6 = pnand %p2915_p3, %p3079_p11  ;;  %p2921_p1 = por %p2920_p10, %p2919_p4 }
  0x4b   : > { %v496_v9 = vld [vmem:[%s3128_s8 + $0x7c0] sm:$0xff]  ;;  %1348 = vmatpush.msra.mxu2 %v428_v8 }
  0x4c   : > { %v364_v10 = vld [vmem:[%s3128_s8 + $0x3a0] sm:$0xff]  ;;  %1367 = vmatpush.msra.mxu3 %v496_v9  ;;  %p2917_p8 = pneg %p2916_p6 }
  0x4d   : > { %v296_v11 = vld [vmem:[%s3128_s8 + $0x180] sm:$0xff]  ;;  %1328 = vmatpush.msra.mxu1 %v364_v10 }
  0x4e   : > { %v424_v12 = vld [vmem:[%s3128_s8 + $0x580] sm:$0xff]  ;;  %1309 = vmatpush.msra.mxu0 %v296_v11  ;;  %p2922_p5 = pnand %p2921_p1, %p2917_p8 }
  0x4f   : > { %v492_v13 = vld [vmem:[%s3128_s8 + $0x7a0] sm:$0xff]  ;;  %1349 = vmatpush.msra.mxu2 %v424_v12 }
  0x50   : > { %v360_v14 = vld [vmem:[%s3128_s8 + $0x380] sm:$0xff]  ;;  %1368 = vmatpush.msra.mxu3 %v492_v13 }
  0x51   : > { %v488_v15 = vld [vmem:[%s3128_s8 + $0x780] sm:$0xff]  ;;  %1329 = vmatpush.msra.mxu1 %v360_v14 }
  0x52   : > { %v292_v16 = vld [vmem:[%s3128_s8 + $0x160] sm:$0xff]  ;;  %1369 = vmatpush.msra.mxu3 %v488_v15 }
  0x53   : > { %v420_v17 = vld [vmem:[%s3128_s8 + $0x560] sm:$0xff]  ;;  %1310 = vmatpush.msra.mxu0 %v292_v16 }
  0x54   : > { %v356_v18 = vld [vmem:[%s3128_s8 + $0x360] sm:$0xff]  ;;  %1350 = vmatpush.msra.mxu2 %v420_v17 }
  0x55   : > { %v484_v19 = vld [vmem:[%s3128_s8 + $0x760] sm:$0xff]  ;;  %1330 = vmatpush.msra.mxu1 %v356_v18 }
  0x56   : > { %v288_v20 = vld [vmem:[%s3128_s8 + $0x140] sm:$0xff]  ;;  %1370 = vmatpush.msra.mxu3 %v484_v19 }
  0x57   : > { %v416_v21 = vld [vmem:[%s3128_s8 + $0x540] sm:$0xff]  ;;  %1311 = vmatpush.msra.mxu0 %v288_v20 }
  0x58   : > { %v352_v22 = vld [vmem:[%s3128_s8 + $0x340] sm:$0xff]  ;;  %1351 = vmatpush.msra.mxu2 %v416_v21 }
  0x59   : > { %v480_v23 = vld [vmem:[%s3128_s8 + $0x740] sm:$0xff]  ;;  %1331 = vmatpush.msra.mxu1 %v352_v22 }
  0x5a   : > { %v284_v24 = vld [vmem:[%s3128_s8 + $0x120] sm:$0xff]  ;;  %1371 = vmatpush.msra.mxu3 %v480_v23 }
  0x5b   : > { %v412_v25 = vld [vmem:[%s3128_s8 + $0x520] sm:$0xff]  ;;  %1312 = vmatpush.msra.mxu0 %v284_v24 }
  0x5c   : > { %v348_v26 = vld [vmem:[%s3128_s8 + $0x320] sm:$0xff]  ;;  %1352 = vmatpush.msra.mxu2 %v412_v25 }
  0x5d   : > { %v476_v27 = vld [vmem:[%s3128_s8 + $0x720] sm:$0xff]  ;;  %1332 = vmatpush.msra.mxu1 %v348_v26 }
  0x5e   : > { %v280_v28 = vld [vmem:[%s3128_s8 + $0x100] sm:$0xff]  ;;  %1372 = vmatpush.msra.mxu3 %v476_v27 }
  0x5f   : > { %v408_v29 = vld [vmem:[%s3128_s8 + $0x500] sm:$0xff]  ;;  %1313 = vmatpush.msra.mxu0 %v280_v28 }
  0x60   : > { %v344_v30 = vld [vmem:[%s3128_s8 + $0x300] sm:$0xff]  ;;  %1353 = vmatpush.msra.mxu2 %v408_v29 }
  0x61   : > { %v472_v31 = vld [vmem:[%s3128_s8 + $0x700] sm:$0xff]  ;;  %1333 = vmatpush.msra.mxu1 %v344_v30 }
  0x62   : > { %v276_v32 = vld [vmem:[%s3128_s8 + $0xe0] sm:$0xff]  ;;  %1373 = vmatpush.msra.mxu3 %v472_v31 }
  0x63   : > { %v404_v33 = vld [vmem:[%s3128_s8 + $0x4e0] sm:$0xff]  ;;  %1314 = vmatpush.msra.mxu0 %v276_v32 }
  0x64   : > { %v340_v34 = vld [vmem:[%s3128_s8 + $0x2e0] sm:$0xff]  ;;  %1354 = vmatpush.msra.mxu2 %v404_v33 }
  0x65   : > { %v468_v35 = vld [vmem:[%s3128_s8 + $0x6e0] sm:$0xff]  ;;  %1334 = vmatpush.msra.mxu1 %v340_v34 }
  0x66   : > { %v272_v36 = vld [vmem:[%s3128_s8 + $0xc0] sm:$0xff]  ;;  %1374 = vmatpush.msra.mxu3 %v468_v35 }
  0x67   : > { %v400_v37 = vld [vmem:[%s3128_s8 + $0x4c0] sm:$0xff]  ;;  %1315 = vmatpush.msra.mxu0 %v272_v36 }
  0x68   : > { %v336_v38 = vld [vmem:[%s3128_s8 + $0x2c0] sm:$0xff]  ;;  %1355 = vmatpush.msra.mxu2 %v400_v37 }
  0x69   : > { %v464_v39 = vld [vmem:[%s3128_s8 + $0x6c0] sm:$0xff]  ;;  %1335 = vmatpush.msra.mxu1 %v336_v38 }
  0x6a   : > { %v268_v40 = vld [vmem:[%s3128_s8 + $0xa0] sm:$0xff]  ;;  %1375 = vmatpush.msra.mxu3 %v464_v39 }
  0x6b   : > { %v396_v41 = vld [vmem:[%s3128_s8 + $0x4a0] sm:$0xff]  ;;  %1316 = vmatpush.msra.mxu0 %v268_v40 }
  0x6c   : > { %v332_v42 = vld [vmem:[%s3128_s8 + $0x2a0] sm:$0xff]  ;;  %1356 = vmatpush.msra.mxu2 %v396_v41 }
  0x6d   : > { %v460_v43 = vld [vmem:[%s3128_s8 + $0x6a0] sm:$0xff]  ;;  %1336 = vmatpush.msra.mxu1 %v332_v42 }
  0x6e   : > { %v264_v44 = vld [vmem:[%s3128_s8 + $0x80] sm:$0xff]  ;;  %1376 = vmatpush.msra.mxu3 %v460_v43 }
  0x6f   : > { %v392_v45 = vld [vmem:[%s3128_s8 + $0x480] sm:$0xff]  ;;  %1317 = vmatpush.msra.mxu0 %v264_v44 }
  0x70   : > { %v328_v46 = vld [vmem:[%s3128_s8 + $0x280] sm:$0xff]  ;;  %1357 = vmatpush.msra.mxu2 %v392_v45 }
  0x71   : > { %v456_v47 = vld [vmem:[%s3128_s8 + $0x680] sm:$0xff]  ;;  %1337 = vmatpush.msra.mxu1 %v328_v46 }
  0x72   : > { %v260_v48 = vld [vmem:[%s3128_s8 + $0x60] sm:$0xff]  ;;  %1377 = vmatpush.msra.mxu3 %v456_v47 }
  0x73   : > { %v388_v49 = vld [vmem:[%s3128_s8 + $0x460] sm:$0xff]  ;;  %1318 = vmatpush.msra.mxu0 %v260_v48 }
  0x74   : > { %v324_v50 = vld [vmem:[%s3128_s8 + $0x260] sm:$0xff]  ;;  %1358 = vmatpush.msra.mxu2 %v388_v49 }
  0x75   : > { %v452_v51 = vld [vmem:[%s3128_s8 + $0x660] sm:$0xff]  ;;  %1338 = vmatpush.msra.mxu1 %v324_v50 }
  0x76   : > { %v256_v52 = vld [vmem:[%s3128_s8 + $0x40] sm:$0xff]  ;;  %1378 = vmatpush.msra.mxu3 %v452_v51 }
  0x77   : > { %v384_v53 = vld [vmem:[%s3128_s8 + $0x440] sm:$0xff]  ;;  %1319 = vmatpush.msra.mxu0 %v256_v52  ;;  %v3250_v52 = vld [vmem:[#allocation2] sm:$0xff] }
  0x78   : > { %v320_v54 = vld [vmem:[%s3128_s8 + $0x240] sm:$0xff]  ;;  %1359 = vmatpush.msra.mxu2 %v384_v53 }
  0x79   : > { %v448_v55 = vld [vmem:[%s3128_s8 + $0x640] sm:$0xff]  ;;  %1339 = vmatpush.msra.mxu1 %v320_v54 }
  0x7a   : > { %v252_v56 = vld [vmem:[%s3128_s8 + $0x20] sm:$0xff]  ;;  %1379 = vmatpush.msra.mxu3 %v448_v55 }
  0x7b   : > { %v380_v57 = vld [vmem:[%s3128_s8 + $0x420] sm:$0xff]  ;;  %1320 = vmatpush.msra.mxu0 %v252_v56 }
  0x7c   : > { %v316_v58 = vld [vmem:[%s3128_s8 + $0x220] sm:$0xff]  ;;  %1360 = vmatpush.msra.mxu2 %v380_v57 }
  0x7d   : > { %v444_v59 = vld [vmem:[%s3128_s8 + $0x620] sm:$0xff]  ;;  %1340 = vmatpush.msra.mxu1 %v316_v58 }
  0x7e   : > { %v248_v60 = vld [vmem:[%s3128_s8] sm:$0xff]  ;;  %1380 = vmatpush.msra.mxu3 %v444_v59  ;;  %v3259_v59 = vperm.slane %v3250_v52, 2 }
  0x7f   : > { %v376_v61 = vld [vmem:[%s3128_s8 + $0x400] sm:$0xff]  ;;  %1321 = vmatpush.msra.mxu0 %v248_v60 }
  0x80   : > { %v564_v62 = vld [vmem:[%s3128_s8 + $0x9e0] sm:$0xff]  ;;  %1361 = vmatpush.msra.mxu2 %v376_v61 }
  0x81   : > { %v692_v63 = vld [vmem:[%s3128_s8 + $0xde0] sm:$0xff]  ;;  %1386 = vmatpush.msrb.mxu0 %v564_v62  ;;  %1362 = vmatmul.f32.vlgmr.msra.gmra.mxu2 %v3259_v59 }
  0x82   : > { %v312_v0 = vld [vmem:[%s3128_s8 + $0x200] sm:$0xff]  ;;  %1426 = vmatpush.msrb.mxu2 %v692_v63  ;;  %v3265_v63 = vperm.slane %v3250_v52, 0 }
  0x83   : > { %v440_v1 = vld [vmem:[%s3128_s8 + $0x600] sm:$0xff]  ;;  %1341 = vmatpush.msra.mxu1 %v312_v0 }
  0x84   : > { %v560_v2 = vld [vmem:[%s3128_s8 + $0x9c0] sm:$0xff]  ;;  %1381 = vmatpush.msra.mxu3 %v440_v1  ;;  %v3269_v1 = vperm.slane %v3250_v52, 3  ;;  %1322 = vmatmul.f32.vlgmr.msra.gmra.mxu0 %v3265_v63 }
  0x85   : > { %v628_v3 = vld [vmem:[%s3128_s8 + $0xbe0] sm:$0xff]  ;;  %1387 = vmatpush.msrb.mxu0 %v560_v2 }
  0x86   : > { %v688_v4 = vld [vmem:[%s3128_s8 + $0xdc0] sm:$0xff]  ;;  %1406 = vmatpush.msrb.mxu1 %v628_v3  ;;  %1382 = vmatmul.f32.vlgmr.msra.gmra.mxu3 %v3269_v1 }
  0x87   : > { %v756_v5 = vld [vmem:[%s3128_s8 + $0xfe0] sm:$0xff]  ;;  %1427 = vmatpush.msrb.mxu2 %v688_v4 }
  0x88   : > { %v556_v6 = vld [vmem:[%s3128_s8 + $0x9a0] sm:$0xff]  ;;  %1446 = vmatpush.msrb.mxu3 %v756_v5  ;;  %v3276_v5 = vperm.slane %v3250_v52, 1 }
  0x89   : > { %v624_v7 = vld [vmem:[%s3128_s8 + $0xbc0] sm:$0xff]  ;;  %1388 = vmatpush.msrb.mxu0 %v556_v6 }
  0x8a   : > { %v684_v8 = vld [vmem:[%s3128_s8 + $0xda0] sm:$0xff]  ;;  %1407 = vmatpush.msrb.mxu1 %v624_v7 }
  0x8b   : > { %v752_v9 = vld [vmem:[%s3128_s8 + $0xfc0] sm:$0xff]  ;;  %1428 = vmatpush.msrb.mxu2 %v684_v8  ;;  %1342 = vmatmul.f32.vlgmr.msra.gmra.mxu1 %v3276_v5 }
  0x8c   : > { %v552_v10 = vld [vmem:[%s3128_s8 + $0x980] sm:$0xff]  ;;  %1447 = vmatpush.msrb.mxu3 %v752_v9 }
  0x8d   : > { %v620_v11 = vld [vmem:[%s3128_s8 + $0xba0] sm:$0xff]  ;;  %1389 = vmatpush.msrb.mxu0 %v552_v10 }
  0x8e   : > { %v680_v12 = vld [vmem:[%s3128_s8 + $0xd80] sm:$0xff]  ;;  %1408 = vmatpush.msrb.mxu1 %v620_v11 }
  0x8f   : > { %v748_v13 = vld [vmem:[%s3128_s8 + $0xfa0] sm:$0xff]  ;;  %1429 = vmatpush.msrb.mxu2 %v680_v12 }
  0x90   : > { %v548_v14 = vld [vmem:[%s3128_s8 + $0x960] sm:$0xff]  ;;  %1448 = vmatpush.msrb.mxu3 %v748_v13 }
  0x91   : > { %v616_v15 = vld [vmem:[%s3128_s8 + $0xb80] sm:$0xff]  ;;  %1390 = vmatpush.msrb.mxu0 %v548_v14 }
  0x92   : > { %v676_v16 = vld [vmem:[%s3128_s8 + $0xd60] sm:$0xff]  ;;  %1409 = vmatpush.msrb.mxu1 %v616_v15  ;;  %v3291_v15 = vperm.slane %v3250_v52, 6 }
  0x93   : > { %v744_v17 = vld [vmem:[%s3128_s8 + $0xf80] sm:$0xff]  ;;  %1430 = vmatpush.msrb.mxu2 %v676_v16 }
  0x94   : > { %v544_v18 = vld [vmem:[%s3128_s8 + $0x940] sm:$0xff]  ;;  %1449 = vmatpush.msrb.mxu3 %v744_v17 }
  0x95   : > { %v612_v19 = vld [vmem:[%s3128_s8 + $0xb60] sm:$0xff]  ;;  %1391 = vmatpush.msrb.mxu0 %v544_v18 }
  0x96   : > { %v672_v20 = vld [vmem:[%s3128_s8 + $0xd40] sm:$0xff]  ;;  %1410 = vmatpush.msrb.mxu1 %v612_v19  ;;  %v3297_v19 = vperm.slane %v3250_v52, 4 }
  0x97   : > { %v740_v21 = vld [vmem:[%s3128_s8 + $0xf60] sm:$0xff]  ;;  %1431 = vmatpush.msrb.mxu2 %v672_v20 }
  0x98   : > { %v540_v22 = vld [vmem:[%s3128_s8 + $0x920] sm:$0xff]  ;;  %1450 = vmatpush.msrb.mxu3 %v740_v21  ;;  %v3301_v21 = vperm.slane %v3250_v52, 7 }
  0x99   : > { %v608_v23 = vld [vmem:[%s3128_s8 + $0xb40] sm:$0xff]  ;;  %1392 = vmatpush.msrb.mxu0 %v540_v22 }
  0x9a   : > { %v668_v24 = vld [vmem:[%s3128_s8 + $0xd20] sm:$0xff]  ;;  %1411 = vmatpush.msrb.mxu1 %v608_v23 }
  0x9b   : > { %v736_v25 = vld [vmem:[%s3128_s8 + $0xf40] sm:$0xff]  ;;  %1432 = vmatpush.msrb.mxu2 %v668_v24 }
  0x9c   : > { %v536_v26 = vld [vmem:[%s3128_s8 + $0x900] sm:$0xff]  ;;  %1451 = vmatpush.msrb.mxu3 %v736_v25  ;;  %v3308_v25 = vperm.slane %v3250_v52, 5 }
  0x9d   : > { %v604_v27 = vld [vmem:[%s3128_s8 + $0xb20] sm:$0xff]  ;;  %1393 = vmatpush.msrb.mxu0 %v536_v26 }
  0x9e   : > { %v664_v28 = vld [vmem:[%s3128_s8 + $0xd00] sm:$0xff]  ;;  %1412 = vmatpush.msrb.mxu1 %v604_v27 }
  0x9f   : > { %v732_v29 = vld [vmem:[%s3128_s8 + $0xf20] sm:$0xff]  ;;  %1433 = vmatpush.msrb.mxu2 %v664_v28 }
  0xa0   : > { %v532_v30 = vld [vmem:[%s3128_s8 + $0x8e0] sm:$0xff]  ;;  %1452 = vmatpush.msrb.mxu3 %v732_v29 }
  0xa1   : > { %v600_v31 = vld [vmem:[%s3128_s8 + $0xb00] sm:$0xff]  ;;  %1394 = vmatpush.msrb.mxu0 %v532_v30 }
  0xa2   : > { %v660_v32 = vld [vmem:[%s3128_s8 + $0xce0] sm:$0xff]  ;;  %1413 = vmatpush.msrb.mxu1 %v600_v31 }
  0xa3   : > { %v728_v33 = vld [vmem:[%s3128_s8 + $0xf00] sm:$0xff]  ;;  %1434 = vmatpush.msrb.mxu2 %v660_v32 }
  0xa4   : > { %v528_v34 = vld [vmem:[%s3128_s8 + $0x8c0] sm:$0xff]  ;;  %1453 = vmatpush.msrb.mxu3 %v728_v33 }
  0xa5   : > { %v596_v35 = vld [vmem:[%s3128_s8 + $0xae0] sm:$0xff]  ;;  %1395 = vmatpush.msrb.mxu0 %v528_v34 }
  0xa6   : > { %v656_v36 = vld [vmem:[%s3128_s8 + $0xcc0] sm:$0xff]  ;;  %1414 = vmatpush.msrb.mxu1 %v596_v35 }
  0xa7   : > { %v724_v37 = vld [vmem:[%s3128_s8 + $0xee0] sm:$0xff]  ;;  %1435 = vmatpush.msrb.mxu2 %v656_v36 }
  0xa8   : > { %v524_v38 = vld [vmem:[%s3128_s8 + $0x8a0] sm:$0xff]  ;;  %1454 = vmatpush.msrb.mxu3 %v724_v37 }
  0xa9   : > { %v592_v39 = vld [vmem:[%s3128_s8 + $0xac0] sm:$0xff]  ;;  %1396 = vmatpush.msrb.mxu0 %v524_v38 }
  0xaa   : > { %v652_v40 = vld [vmem:[%s3128_s8 + $0xca0] sm:$0xff]  ;;  %1415 = vmatpush.msrb.mxu1 %v592_v39 }
  0xab   : > { %v720_v41 = vld [vmem:[%s3128_s8 + $0xec0] sm:$0xff]  ;;  %1436 = vmatpush.msrb.mxu2 %v652_v40 }
  0xac   : > { %v520_v42 = vld [vmem:[%s3128_s8 + $0x880] sm:$0xff]  ;;  %1455 = vmatpush.msrb.mxu3 %v720_v41 }
  0xad   : > { %v588_v43 = vld [vmem:[%s3128_s8 + $0xaa0] sm:$0xff]  ;;  %1397 = vmatpush.msrb.mxu0 %v520_v42 }
  0xae   : > { %v648_v44 = vld [vmem:[%s3128_s8 + $0xc80] sm:$0xff]  ;;  %1416 = vmatpush.msrb.mxu1 %v588_v43 }
  0xaf   : > { %v716_v45 = vld [vmem:[%s3128_s8 + $0xea0] sm:$0xff]  ;;  %1437 = vmatpush.msrb.mxu2 %v648_v44 }
  0xb0   : > { %v516_v46 = vld [vmem:[%s3128_s8 + $0x860] sm:$0xff]  ;;  %1456 = vmatpush.msrb.mxu3 %v716_v45 }
  0xb1   : > { %v584_v47 = vld [vmem:[%s3128_s8 + $0xa80] sm:$0xff]  ;;  %1398 = vmatpush.msrb.mxu0 %v516_v46 }
  0xb2   : > { %v644_v48 = vld [vmem:[%s3128_s8 + $0xc60] sm:$0xff]  ;;  %1417 = vmatpush.msrb.mxu1 %v584_v47 }
  0xb3   : > { %v712_v49 = vld [vmem:[%s3128_s8 + $0xe80] sm:$0xff]  ;;  %1438 = vmatpush.msrb.mxu2 %v644_v48 }
  0xb4   : > { %v512_v50 = vld [vmem:[%s3128_s8 + $0x840] sm:$0xff]  ;;  %1457 = vmatpush.msrb.mxu3 %v712_v49 }
  0xb5   : > { %v580_v51 = vld [vmem:[%s3128_s8 + $0xa60] sm:$0xff]  ;;  %1399 = vmatpush.msrb.mxu0 %v512_v50 }
  0xb6   : > { %v640_v53 = vld [vmem:[%s3128_s8 + $0xc40] sm:$0xff]  ;;  %1418 = vmatpush.msrb.mxu1 %v580_v51 }
  0xb7   : > { %v708_v54 = vld [vmem:[%s3128_s8 + $0xe60] sm:$0xff]  ;;  %1439 = vmatpush.msrb.mxu2 %v640_v53 }
  0xb8   : > { %v508_v55 = vld [vmem:[%s3128_s8 + $0x820] sm:$0xff]  ;;  %1458 = vmatpush.msrb.mxu3 %v708_v54 }
  0xb9   : > { %v576_v56 = vld [vmem:[%s3128_s8 + $0xa40] sm:$0xff]  ;;  %1400 = vmatpush.msrb.mxu0 %v508_v55 }
  0xba   : > { %v636_v57 = vld [vmem:[%s3128_s8 + $0xc20] sm:$0xff]  ;;  %1419 = vmatpush.msrb.mxu1 %v576_v56 }
  0xbb   : > { %v704_v58 = vld [vmem:[%s3128_s8 + $0xe40] sm:$0xff]  ;;  %1440 = vmatpush.msrb.mxu2 %v636_v57 }
  0xbc   : > { %v504_v60 = vld [vmem:[%s3128_s8 + $0x800] sm:$0xff]  ;;  %1459 = vmatpush.msrb.mxu3 %v704_v58 }
  0xbd   : > { %v572_v61 = vld [vmem:[%s3128_s8 + $0xa20] sm:$0xff]  ;;  %1401 = vmatpush.msrb.mxu0 %v504_v60 }
  0xbe   : > { %v632_v62 = vld [vmem:[%s3128_s8 + $0xc00] sm:$0xff]  ;;  %1420 = vmatpush.msrb.mxu1 %v572_v61  ;;  %1402 = vmatmul.f32.vlgmr.msrb.gmra.mxu0 %v3297_v19 }
  0xbf   : > { %v700_v0 = vld [vmem:[%s3128_s8 + $0xe20] sm:$0xff]  ;;  %1441 = vmatpush.msrb.mxu2 %v632_v62 }
  0xc0   : > { %v820_v2 = vld [vmem:[%s3128_s8 + $0x11e0] sm:$0xff]  ;;  %1460 = vmatpush.msrb.mxu3 %v700_v0  ;;  %1442 = vmatmul.f32.vlgmr.msrb.gmra.mxu2 %v3291_v15 }
  0xc1   : > { %v948_v3 = vld [vmem:[%s3128_s8 + $0x15e0] sm:$0xff]  ;;  %1466 = vmatpush.msra.mxu0 %v820_v2 }
  0xc2   : > { %v568_v4 = vld [vmem:[%s3128_s8 + $0xa00] sm:$0xff]  ;;  %1506 = vmatpush.msra.mxu2 %v948_v3 }
  0xc3   : > { %v696_v6 = vld [vmem:[%s3128_s8 + $0xe00] sm:$0xff]  ;;  %1421 = vmatpush.msrb.mxu1 %v568_v4  ;;  %v3352_v4 = vld [vmem:[#allocation2 + $0x8] sm:$0xff] }
  0xc4   : > { %v816_v7 = vld [vmem:[%s3128_s8 + $0x11c0] sm:$0xff]  ;;  %1461 = vmatpush.msrb.mxu3 %v696_v6  ;;  %1422 = vmatmul.f32.vlgmr.msrb.gmra.mxu1 %v3308_v25 }
  0xc5   : > { %v884_v8 = vld [vmem:[%s3128_s8 + $0x13e0] sm:$0xff]  ;;  %1467 = vmatpush.msra.mxu0 %v816_v7  ;;  %1462 = vmatmul.f32.vlgmr.msrb.gmra.mxu3 %v3301_v21 }
  0xc6   : > { %v944_v9 = vld [vmem:[%s3128_s8 + $0x15c0] sm:$0xff]  ;;  %1486 = vmatpush.msra.mxu1 %v884_v8 }
  0xc7   : > { %v1012_v10 = vld [vmem:[%s3128_s8 + $0x17e0] sm:$0xff]  ;;  %1507 = vmatpush.msra.mxu2 %v944_v9 }
  0xc8   : > { %v812_v11 = vld [vmem:[%s3128_s8 + $0x11a0] sm:$0xff]  ;;  %1526 = vmatpush.msra.mxu3 %v1012_v10 }
  0xc9   : > { %v880_v12 = vld [vmem:[%s3128_s8 + $0x13c0] sm:$0xff]  ;;  %1468 = vmatpush.msra.mxu0 %v812_v11 }
  0xca   : > { %v940_v13 = vld [vmem:[%s3128_s8 + $0x15a0] sm:$0xff]  ;;  %1487 = vmatpush.msra.mxu1 %v880_v12  ;;  %v3361_v12 = vperm.slane %v3352_v4, 0 }
  0xcb   : > { %v1008_v14 = vld [vmem:[%s3128_s8 + $0x17c0] sm:$0xff]  ;;  %1508 = vmatpush.msra.mxu2 %v940_v13  ;;  %v3364_v13 = vperm.slane %v3352_v4, 2 }
  0xcc   : > { %v808_v16 = vld [vmem:[%s3128_s8 + $0x1180] sm:$0xff]  ;;  %1527 = vmatpush.msra.mxu3 %v1008_v14 }
  0xcd   : > { %v876_v17 = vld [vmem:[%s3128_s8 + $0x13a0] sm:$0xff]  ;;  %1469 = vmatpush.msra.mxu0 %v808_v16 }
  0xce   : > { %v936_v18 = vld [vmem:[%s3128_s8 + $0x1580] sm:$0xff]  ;;  %1488 = vmatpush.msra.mxu1 %v876_v17 }
  0xcf   : > { %v1004_v20 = vld [vmem:[%s3128_s8 + $0x17a0] sm:$0xff]  ;;  %1509 = vmatpush.msra.mxu2 %v936_v18 }
  0xd0   : > { %v804_v22 = vld [vmem:[%s3128_s8 + $0x1160] sm:$0xff]  ;;  %1528 = vmatpush.msra.mxu3 %v1004_v20  ;;  %v3371_v20 = vperm.slane %v3352_v4, 1 }
  0xd1   : > { %v872_v23 = vld [vmem:[%s3128_s8 + $0x1380] sm:$0xff]  ;;  %1470 = vmatpush.msra.mxu0 %v804_v22  ;;  %v3374_v22 = vperm.slane %v3352_v4, 3 }
  0xd2   : > { %v932_v24 = vld [vmem:[%s3128_s8 + $0x1560] sm:$0xff]  ;;  %1489 = vmatpush.msra.mxu1 %v872_v23 }
  0xd3   : > { %v1000_v26 = vld [vmem:[%s3128_s8 + $0x1780] sm:$0xff]  ;;  %1510 = vmatpush.msra.mxu2 %v932_v24 }
  0xd4   : > { %v800_v27 = vld [vmem:[%s3128_s8 + $0x1140] sm:$0xff]  ;;  %1529 = vmatpush.msra.mxu3 %v1000_v26 }
  0xd5   : > { %v868_v28 = vld [vmem:[%s3128_s8 + $0x1360] sm:$0xff]  ;;  %1471 = vmatpush.msra.mxu0 %v800_v27 }
  0xd6   : > { %v928_v29 = vld [vmem:[%s3128_s8 + $0x1540] sm:$0xff]  ;;  %1490 = vmatpush.msra.mxu1 %v868_v28 }
  0xd7   : > { %v996_v30 = vld [vmem:[%s3128_s8 + $0x1760] sm:$0xff]  ;;  %1511 = vmatpush.msra.mxu2 %v928_v29 }
  0xd8   : > { %v796_v31 = vld [vmem:[%s3128_s8 + $0x1120] sm:$0xff]  ;;  %1530 = vmatpush.msra.mxu3 %v996_v30 }
  0xd9   : > { %v864_v32 = vld [vmem:[%s3128_s8 + $0x1340] sm:$0xff]  ;;  %1472 = vmatpush.msra.mxu0 %v796_v31 }
  0xda   : > { %v924_v33 = vld [vmem:[%s3128_s8 + $0x1520] sm:$0xff]  ;;  %1491 = vmatpush.msra.mxu1 %v864_v32 }
  0xdb   : > { %v992_v34 = vld [vmem:[%s3128_s8 + $0x1740] sm:$0xff]  ;;  %1512 = vmatpush.msra.mxu2 %v924_v33 }
  0xdc   : > { %v792_v35 = vld [vmem:[%s3128_s8 + $0x1100] sm:$0xff]  ;;  %1531 = vmatpush.msra.mxu3 %v992_v34 }
  0xdd   : > { %v860_v36 = vld [vmem:[%s3128_s8 + $0x1320] sm:$0xff]  ;;  %1473 = vmatpush.msra.mxu0 %v792_v35 }
  0xde   : > { %v920_v37 = vld [vmem:[%s3128_s8 + $0x1500] sm:$0xff]  ;;  %1492 = vmatpush.msra.mxu1 %v860_v36 }
  0xdf   : > { %v988_v38 = vld [vmem:[%s3128_s8 + $0x1720] sm:$0xff]  ;;  %1513 = vmatpush.msra.mxu2 %v920_v37 }
  0xe0   : > { %v788_v39 = vld [vmem:[%s3128_s8 + $0x10e0] sm:$0xff]  ;;  %1532 = vmatpush.msra.mxu3 %v988_v38 }
  0xe1   : > { %v856_v40 = vld [vmem:[%s3128_s8 + $0x1300] sm:$0xff]  ;;  %1474 = vmatpush.msra.mxu0 %v788_v39 }
  0xe2   : > { %v916_v41 = vld [vmem:[%s3128_s8 + $0x14e0] sm:$0xff]  ;;  %1493 = vmatpush.msra.mxu1 %v856_v40 }
  0xe3   : > { %v984_v42 = vld [vmem:[%s3128_s8 + $0x1700] sm:$0xff]  ;;  %1514 = vmatpush.msra.mxu2 %v916_v41 }
  0xe4   : > { %v784_v43 = vld [vmem:[%s3128_s8 + $0x10c0] sm:$0xff]  ;;  %1533 = vmatpush.msra.mxu3 %v984_v42 }
  0xe5   : > { %v852_v44 = vld [vmem:[%s3128_s8 + $0x12e0] sm:$0xff]  ;;  %1475 = vmatpush.msra.mxu0 %v784_v43 }
  0xe6   : > { %v912_v45 = vld [vmem:[%s3128_s8 + $0x14c0] sm:$0xff]  ;;  %1494 = vmatpush.msra.mxu1 %v852_v44 }
  0xe7   : > { %v980_v46 = vld [vmem:[%s3128_s8 + $0x16e0] sm:$0xff]  ;;  %1515 = vmatpush.msra.mxu2 %v912_v45 }
  0xe8   : > { %v780_v47 = vld [vmem:[%s3128_s8 + $0x10a0] sm:$0xff]  ;;  %1534 = vmatpush.msra.mxu3 %v980_v46 }
  0xe9   : > { %v848_v48 = vld [vmem:[%s3128_s8 + $0x12c0] sm:$0xff]  ;;  %1476 = vmatpush.msra.mxu0 %v780_v47 }
  0xea   : > { %v908_v49 = vld [vmem:[%s3128_s8 + $0x14a0] sm:$0xff]  ;;  %1495 = vmatpush.msra.mxu1 %v848_v48 }
  0xeb   : > { %v976_v50 = vld [vmem:[%s3128_s8 + $0x16c0] sm:$0xff]  ;;  %1516 = vmatpush.msra.mxu2 %v908_v49 }
  0xec   : > { %v776_v51 = vld [vmem:[%s3128_s8 + $0x1080] sm:$0xff]  ;;  %1535 = vmatpush.msra.mxu3 %v976_v50 }
  0xed   : > { %v844_v52 = vld [vmem:[%s3128_s8 + $0x12a0] sm:$0xff]  ;;  %1477 = vmatpush.msra.mxu0 %v776_v51 }
  0xee   : > { %v904_v53 = vld [vmem:[%s3128_s8 + $0x1480] sm:$0xff]  ;;  %1496 = vmatpush.msra.mxu1 %v844_v52 }
  0xef   : > { %v972_v54 = vld [vmem:[%s3128_s8 + $0x16a0] sm:$0xff]  ;;  %1517 = vmatpush.msra.mxu2 %v904_v53 }
  0xf0   : > { %v772_v55 = vld [vmem:[%s3128_s8 + $0x1060] sm:$0xff]  ;;  %1536 = vmatpush.msra.mxu3 %v972_v54 }
  0xf1   : > { %v840_v56 = vld [vmem:[%s3128_s8 + $0x1280] sm:$0xff]  ;;  %1478 = vmatpush.msra.mxu0 %v772_v55 }
  0xf2   : > { %v900_v57 = vld [vmem:[%s3128_s8 + $0x1460] sm:$0xff]  ;;  %1497 = vmatpush.msra.mxu1 %v840_v56 }
  0xf3   : > { %v968_v58 = vld [vmem:[%s3128_s8 + $0x1680] sm:$0xff]  ;;  %1518 = vmatpush.msra.mxu2 %v900_v57 }
  0xf4   : > { %v768_v60 = vld [vmem:[%s3128_s8 + $0x1040] sm:$0xff]  ;;  %1537 = vmatpush.msra.mxu3 %v968_v58 }
  0xf5   : > { %v836_v61 = vld [vmem:[%s3128_s8 + $0x1260] sm:$0xff]  ;;  %1479 = vmatpush.msra.mxu0 %v768_v60 }
  0xf6   : > { %v896_v62 = vld [vmem:[%s3128_s8 + $0x1440] sm:$0xff]  ;;  %1498 = vmatpush.msra.mxu1 %v836_v61 }
  0xf7   : > { %v964_v0 = vld [vmem:[%s3128_s8 + $0x1660] sm:$0xff]  ;;  %1519 = vmatpush.msra.mxu2 %v896_v62 }
  0xf8   : > { %v764_v2 = vld [vmem:[%s3128_s8 + $0x1020] sm:$0xff]  ;;  %1538 = vmatpush.msra.mxu3 %v964_v0 }
  0xf9   : > { %v832_v3 = vld [vmem:[%s3128_s8 + $0x1240] sm:$0xff]  ;;  %1480 = vmatpush.msra.mxu0 %v764_v2 }
  0xfa   : > { %v892_v6 = vld [vmem:[%s3128_s8 + $0x1420] sm:$0xff]  ;;  %1499 = vmatpush.msra.mxu1 %v832_v3 }
  0xfb   : > { %v960_v7 = vld [vmem:[%s3128_s8 + $0x1640] sm:$0xff]  ;;  %1520 = vmatpush.msra.mxu2 %v892_v6 }
  0xfc   : > { %v760_v8 = vld [vmem:[%s3128_s8 + $0x1000] sm:$0xff]  ;;  %1539 = vmatpush.msra.mxu3 %v960_v7 }
  0xfd   : > { %v828_v9 = vld [vmem:[%s3128_s8 + $0x1220] sm:$0xff]  ;;  %1481 = vmatpush.msra.mxu0 %v760_v8 }
  0xfe   : > { %v888_v10 = vld [vmem:[%s3128_s8 + $0x1400] sm:$0xff]  ;;  %1500 = vmatpush.msra.mxu1 %v828_v9  ;;  %1482 = vmatmul.f32.vlgmr.msra.gmra.mxu0 %v3361_v12 }
  0xff   : > { %v956_v11 = vld [vmem:[%s3128_s8 + $0x1620] sm:$0xff]  ;;  %1521 = vmatpush.msra.mxu2 %v888_v10 }
 0x100   : > { %v1076_v14 = vld [vmem:[%s3128_s8 + $0x19e0] sm:$0xff]  ;;  %1540 = vmatpush.msra.mxu3 %v956_v11  ;;  %1522 = vmatmul.f32.vlgmr.msra.gmra.mxu2 %v3364_v13 }
 0x101   : > { %v1204_v16 = vld [vmem:[%s3128_s8 + $0x1de0] sm:$0xff]  ;;  %1546 = vmatpush.msrb.mxu0 %v1076_v14 }
 0x102   : > { %v824_v17 = vld [vmem:[%s3128_s8 + $0x1200] sm:$0xff]  ;;  %1586 = vmatpush.msrb.mxu2 %v1204_v16 }
 0x103   : > { %v952_v18 = vld [vmem:[%s3128_s8 + $0x1600] sm:$0xff]  ;;  %1501 = vmatpush.msra.mxu1 %v824_v17 }
 0x104   : > { %v1072_v23 = vld [vmem:[%s3128_s8 + $0x19c0] sm:$0xff]  ;;  %1541 = vmatpush.msra.mxu3 %v952_v18  ;;  %1502 = vmatmul.f32.vlgmr.msra.gmra.mxu1 %v3371_v20 }
 0x105   : > { %v1140_v24 = vld [vmem:[%s3128_s8 + $0x1be0] sm:$0xff]  ;;  %1542 = vmatmul.f32.vlgmr.msra.gmra.mxu3 %v3374_v22  ;;  %1547 = vmatpush.msrb.mxu0 %v1072_v23 }
 0x106   : > { %v1200_v26 = vld [vmem:[%s3128_s8 + $0x1dc0] sm:$0xff]  ;;  %1566 = vmatpush.msrb.mxu1 %v1140_v24 }
 0x107   : > { %v1268_v27 = vld [vmem:[%s3128_s8 + $0x1fe0] sm:$0xff]  ;;  %1587 = vmatpush.msrb.mxu2 %v1200_v26 }
 0x108   : > { %v1068_v28 = vld [vmem:[%s3128_s8 + $0x19a0] sm:$0xff]  ;;  %1606 = vmatpush.msrb.mxu3 %v1268_v27 }
 0x109   : > { %v1136_v29 = vld [vmem:[%s3128_s8 + $0x1bc0] sm:$0xff]  ;;  %1548 = vmatpush.msrb.mxu0 %v1068_v28 }
 0x10a   : > { %v1196_v30 = vld [vmem:[%s3128_s8 + $0x1da0] sm:$0xff]  ;;  %1567 = vmatpush.msrb.mxu1 %v1136_v29 }
 0x10b   : > { %v1264_v31 = vld [vmem:[%s3128_s8 + $0x1fc0] sm:$0xff]  ;;  %1588 = vmatpush.msrb.mxu2 %v1196_v30 }
 0x10c   : > { %v1064_v32 = vld [vmem:[%s3128_s8 + $0x1980] sm:$0xff]  ;;  %1607 = vmatpush.msrb.mxu3 %v1264_v31 }
 0x10d   : > { %v1132_v33 = vld [vmem:[%s3128_s8 + $0x1ba0] sm:$0xff]  ;;  %1549 = vmatpush.msrb.mxu0 %v1064_v32 }
 0x10e   : > { %v1192_v34 = vld [vmem:[%s3128_s8 + $0x1d80] sm:$0xff]  ;;  %1568 = vmatpush.msrb.mxu1 %v1132_v33  ;;  %v3441_v33 = vperm.slane %v3352_v4, 4 }
 0x10f   : > { %v1260_v35 = vld [vmem:[%s3128_s8 + $0x1fa0] sm:$0xff]  ;;  %1589 = vmatpush.msrb.mxu2 %v1192_v34  ;;  %v3444_v34 = vperm.slane %v3352_v4, 6 }
 0x110   : > { %v1060_v36 = vld [vmem:[%s3128_s8 + $0x1960] sm:$0xff]  ;;  %1608 = vmatpush.msrb.mxu3 %v1260_v35  ;;  %v309_v35 = vld [vmem:[%s3128_s8 + $0x1e8] sm:$0xff] }
 0x111   : > { %v1128_v37 = vld [vmem:[%s3128_s8 + $0x1b80] sm:$0xff]  ;;  %1550 = vmatpush.msrb.mxu0 %v1060_v36  ;;  %v437_v36 = vld [vmem:[%s3128_s8 + $0x5e8] sm:$0xff] }
 0x112   : > { %v1188_v38 = vld [vmem:[%s3128_s8 + $0x1d60] sm:$0xff]  ;;  %1569 = vmatpush.msrb.mxu1 %v1128_v37 }
 0x113   : > { %v1256_v39 = vld [vmem:[%s3128_s8 + $0x1f80] sm:$0xff]  ;;  %1590 = vmatpush.msrb.mxu2 %v1188_v38 }
 0x114   : > { %v1056_v40 = vld [vmem:[%s3128_s8 + $0x1940] sm:$0xff]  ;;  %1609 = vmatpush.msrb.mxu3 %v1256_v39  ;;  %v3451_v39 = vperm.slane %v3352_v4, 5 }
 0x115   : > { %v1124_v41 = vld [vmem:[%s3128_s8 + $0x1b60] sm:$0xff]  ;;  %1551 = vmatpush.msrb.mxu0 %v1056_v40  ;;  %v3454_v40 = vperm.slane %v3352_v4, 7  ;;  %v301_v4 = vld [vmem:[%s3128_s8 + $0x1a8] sm:$0xff] }
 0x116   : > { %v1184_v42 = vld [vmem:[%s3128_s8 + $0x1d40] sm:$0xff]  ;;  %1570 = vmatpush.msrb.mxu1 %v1124_v41  ;;  %v305_v41 = vld [vmem:[%s3128_s8 + $0x1c8] sm:$0xff] }
 0x117   : > { %v1252_v43 = vld [vmem:[%s3128_s8 + $0x1f60] sm:$0xff]  ;;  %1591 = vmatpush.msrb.mxu2 %v1184_v42  ;;  %v373_v42 = vld [vmem:[%s3128_s8 + $0x3e8] sm:$0xff] }
 0x118   : > { %v1052_v44 = vld [vmem:[%s3128_s8 + $0x1920] sm:$0xff]  ;;  %1610 = vmatpush.msrb.mxu3 %v1252_v43  ;;  %v433_v43 = vld [vmem:[%s3128_s8 + $0x5c8] sm:$0xff] }
 0x119   : > { %v1120_v45 = vld [vmem:[%s3128_s8 + $0x1b40] sm:$0xff]  ;;  %1552 = vmatpush.msrb.mxu0 %v1052_v44  ;;  %v501_v44 = vld [vmem:[%s3128_s8 + $0x7e8] sm:$0xff] }
 0x11a   : > { %v1180_v46 = vld [vmem:[%s3128_s8 + $0x1d20] sm:$0xff]  ;;  %1571 = vmatpush.msrb.mxu1 %v1120_v45  ;;  %v369_v45 = vld [vmem:[%s3128_s8 + $0x3c8] sm:$0xff] }
 0x11b   : > { %v1248_v47 = vld [vmem:[%s3128_s8 + $0x1f40] sm:$0xff]  ;;  %1592 = vmatpush.msrb.mxu2 %v1180_v46  ;;  %v429_v46 = vld [vmem:[%s3128_s8 + $0x5a8] sm:$0xff] }
 0x11c   : > { %v1048_v48 = vld [vmem:[%s3128_s8 + $0x1900] sm:$0xff]  ;;  %1611 = vmatpush.msrb.mxu3 %v1248_v47  ;;  %v497_v47 = vld [vmem:[%s3128_s8 + $0x7c8] sm:$0xff] }
 0x11d   : > { %v1116_v49 = vld [vmem:[%s3128_s8 + $0x1b20] sm:$0xff]  ;;  %1553 = vmatpush.msrb.mxu0 %v1048_v48  ;;  %v297_v48 = vld [vmem:[%s3128_s8 + $0x188] sm:$0xff] }
 0x11e   : > { %v1176_v50 = vld [vmem:[%s3128_s8 + $0x1d00] sm:$0xff]  ;;  %1572 = vmatpush.msrb.mxu1 %v1116_v49  ;;  %v365_v49 = vld [vmem:[%s3128_s8 + $0x3a8] sm:$0xff] }
 0x11f   : > { %v1244_v51 = vld [vmem:[%s3128_s8 + $0x1f20] sm:$0xff]  ;;  %1593 = vmatpush.msrb.mxu2 %v1176_v50  ;;  %v425_v50 = vld [vmem:[%s3128_s8 + $0x588] sm:$0xff] }
 0x120   : > { %v1044_v52 = vld [vmem:[%s3128_s8 + $0x18e0] sm:$0xff]  ;;  %1612 = vmatpush.msrb.mxu3 %v1244_v51  ;;  %v493_v51 = vld [vmem:[%s3128_s8 + $0x7a8] sm:$0xff] }
 0x121   : > { %v1112_v53 = vld [vmem:[%s3128_s8 + $0x1b00] sm:$0xff]  ;;  %1554 = vmatpush.msrb.mxu0 %v1044_v52  ;;  %v293_v52 = vld [vmem:[%s3128_s8 + $0x168] sm:$0xff] }
 0x122   : > { %v1172_v54 = vld [vmem:[%s3128_s8 + $0x1ce0] sm:$0xff]  ;;  %1573 = vmatpush.msrb.mxu1 %v1112_v53  ;;  %v361_v53 = vld [vmem:[%s3128_s8 + $0x388] sm:$0xff] }
 0x123   : > { %v1240_v55 = vld [vmem:[%s3128_s8 + $0x1f00] sm:$0xff]  ;;  %1594 = vmatpush.msrb.mxu2 %v1172_v54  ;;  %v421_v54 = vld [vmem:[%s3128_s8 + $0x568] sm:$0xff] }
 0x124   : > { %v1040_v56 = vld [vmem:[%s3128_s8 + $0x18c0] sm:$0xff]  ;;  %1613 = vmatpush.msrb.mxu3 %v1240_v55  ;;  %v489_v55 = vld [vmem:[%s3128_s8 + $0x788] sm:$0xff] }
 0x125   : > { %v1108_v57 = vld [vmem:[%s3128_s8 + $0x1ae0] sm:$0xff]  ;;  %1555 = vmatpush.msrb.mxu0 %v1040_v56  ;;  %v289_v56 = vld [vmem:[%s3128_s8 + $0x148] sm:$0xff] }
 0x126   : > { %v1168_v58 = vld [vmem:[%s3128_s8 + $0x1cc0] sm:$0xff]  ;;  %1574 = vmatpush.msrb.mxu1 %v1108_v57  ;;  %v357_v57 = vld [vmem:[%s3128_s8 + $0x368] sm:$0xff] }
 0x127   : > { %v1236_v60 = vld [vmem:[%s3128_s8 + $0x1ee0] sm:$0xff]  ;;  %1595 = vmatpush.msrb.mxu2 %v1168_v58  ;;  %v417_v58 = vld [vmem:[%s3128_s8 + $0x548] sm:$0xff] }
 0x128   : > { %v1036_v61 = vld [vmem:[%s3128_s8 + $0x18a0] sm:$0xff]  ;;  %1614 = vmatpush.msrb.mxu3 %v1236_v60  ;;  %v485_v60 = vld [vmem:[%s3128_s8 + $0x768] sm:$0xff] }
 0x129   : > { %v1104_v62 = vld [vmem:[%s3128_s8 + $0x1ac0] sm:$0xff]  ;;  %1556 = vmatpush.msrb.mxu0 %v1036_v61  ;;  %v285_v61 = vld [vmem:[%s3128_s8 + $0x128] sm:$0xff] }
 0x12a   : > { %v1164_v0 = vld [vmem:[%s3128_s8 + $0x1ca0] sm:$0xff]  ;;  %1575 = vmatpush.msrb.mxu1 %v1104_v62  ;;  %v353_v62 = vld [vmem:[%s3128_s8 + $0x348] sm:$0xff] }
 0x12b   : > { %v1232_v2 = vld [vmem:[%s3128_s8 + $0x1ec0] sm:$0xff]  ;;  %1596 = vmatpush.msrb.mxu2 %v1164_v0  ;;  %v413_v0 = vld [vmem:[%s3128_s8 + $0x528] sm:$0xff] }
 0x12c   : > { %v1032_v3 = vld [vmem:[%s3128_s8 + $0x1880] sm:$0xff]  ;;  %1615 = vmatpush.msrb.mxu3 %v1232_v2  ;;  %v481_v2 = vld [vmem:[%s3128_s8 + $0x748] sm:$0xff] }
 0x12d   : > { %v1100_v6 = vld [vmem:[%s3128_s8 + $0x1aa0] sm:$0xff]  ;;  %1557 = vmatpush.msrb.mxu0 %v1032_v3  ;;  %v281_v3 = vld [vmem:[%s3128_s8 + $0x108] sm:$0xff] }
 0x12e   : > { %v1160_v7 = vld [vmem:[%s3128_s8 + $0x1c80] sm:$0xff]  ;;  %1576 = vmatpush.msrb.mxu1 %v1100_v6  ;;  %v349_v6 = vld [vmem:[%s3128_s8 + $0x328] sm:$0xff] }
 0x12f   : > { %v1228_v8 = vld [vmem:[%s3128_s8 + $0x1ea0] sm:$0xff]  ;;  %1597 = vmatpush.msrb.mxu2 %v1160_v7  ;;  %v409_v7 = vld [vmem:[%s3128_s8 + $0x508] sm:$0xff] }
 0x130   : > { %v1028_v9 = vld [vmem:[%s3128_s8 + $0x1860] sm:$0xff]  ;;  %1616 = vmatpush.msrb.mxu3 %v1228_v8  ;;  %v477_v8 = vld [vmem:[%s3128_s8 + $0x728] sm:$0xff] }
 0x131   : > { %v1096_v10 = vld [vmem:[%s3128_s8 + $0x1a80] sm:$0xff]  ;;  %1558 = vmatpush.msrb.mxu0 %v1028_v9  ;;  %v277_v9 = vld [vmem:[%s3128_s8 + $0xe8] sm:$0xff] }
 0x132   : > { %v1156_v11 = vld [vmem:[%s3128_s8 + $0x1c60] sm:$0xff]  ;;  %1577 = vmatpush.msrb.mxu1 %v1096_v10  ;;  %v345_v10 = vld [vmem:[%s3128_s8 + $0x308] sm:$0xff] }
 0x133   : > { %v1224_v14 = vld [vmem:[%s3128_s8 + $0x1e80] sm:$0xff]  ;;  %1598 = vmatpush.msrb.mxu2 %v1156_v11  ;;  %v405_v11 = vld [vmem:[%s3128_s8 + $0x4e8] sm:$0xff] }
 0x134   : > { %v1024_v16 = vld [vmem:[%s3128_s8 + $0x1840] sm:$0xff]  ;;  %1617 = vmatpush.msrb.mxu3 %v1224_v14  ;;  %v473_v14 = vld [vmem:[%s3128_s8 + $0x708] sm:$0xff] }
 0x135   : > { %v1092_v17 = vld [vmem:[%s3128_s8 + $0x1a60] sm:$0xff]  ;;  %1559 = vmatpush.msrb.mxu0 %v1024_v16  ;;  %v273_v16 = vld [vmem:[%s3128_s8 + $0xc8] sm:$0xff] }
 0x136   : > { %v1152_v18 = vld [vmem:[%s3128_s8 + $0x1c40] sm:$0xff]  ;;  %1578 = vmatpush.msrb.mxu1 %v1092_v17  ;;  %v341_v17 = vld [vmem:[%s3128_s8 + $0x2e8] sm:$0xff] }
 0x137   : > { %v1220_v23 = vld [vmem:[%s3128_s8 + $0x1e60] sm:$0xff]  ;;  %1599 = vmatpush.msrb.mxu2 %v1152_v18  ;;  %v401_v18 = vld [vmem:[%s3128_s8 + $0x4c8] sm:$0xff] }
 0x138   : > { %v1020_v24 = vld [vmem:[%s3128_s8 + $0x1820] sm:$0xff]  ;;  %1618 = vmatpush.msrb.mxu3 %v1220_v23  ;;  %v469_v23 = vld [vmem:[%s3128_s8 + $0x6e8] sm:$0xff] }
 0x139   : > { %v1088_v26 = vld [vmem:[%s3128_s8 + $0x1a40] sm:$0xff]  ;;  %1560 = vmatpush.msrb.mxu0 %v1020_v24  ;;  %v269_v24 = vld [vmem:[%s3128_s8 + $0xa8] sm:$0xff] }
 0x13a   : > { %v1148_v27 = vld [vmem:[%s3128_s8 + $0x1c20] sm:$0xff]  ;;  %1579 = vmatpush.msrb.mxu1 %v1088_v26  ;;  %v337_v26 = vld [vmem:[%s3128_s8 + $0x2c8] sm:$0xff] }
 0x13b   : > { %v1216_v28 = vld [vmem:[%s3128_s8 + $0x1e40] sm:$0xff]  ;;  %1600 = vmatpush.msrb.mxu2 %v1148_v27  ;;  %v397_v27 = vld [vmem:[%s3128_s8 + $0x4a8] sm:$0xff] }
 0x13c   : > { %v1016_v29 = vld [vmem:[%s3128_s8 + $0x1800] sm:$0xff]  ;;  %1619 = vmatpush.msrb.mxu3 %v1216_v28  ;;  %v465_v28 = vld [vmem:[%s3128_s8 + $0x6c8] sm:$0xff] }
 0x13d   : > { %v1084_v30 = vld [vmem:[%s3128_s8 + $0x1a20] sm:$0xff]  ;;  %1561 = vmatpush.msrb.mxu0 %v1016_v29  ;;  %v265_v29 = vld [vmem:[%s3128_s8 + $0x88] sm:$0xff] }
 0x13e   : > { %v1144_v31 = vld [vmem:[%s3128_s8 + $0x1c00] sm:$0xff]  ;;  %1580 = vmatpush.msrb.mxu1 %v1084_v30  ;;  %1562 = vmatmul.f32.vlgmr.msrb.gmra.mxu0 %v3441_v33  ;;  %v333_v30 = vld [vmem:[%s3128_s8 + $0x2a8] sm:$0xff] }
 0x13f   : > { %v1212_v32 = vld [vmem:[%s3128_s8 + $0x1e20] sm:$0xff]  ;;  %1601 = vmatpush.msrb.mxu2 %v1144_v31  ;;  %1626 = vmatpush.msra.mxu0 %v309_v35  ;;  %v393_v31 = vld [vmem:[%s3128_s8 + $0x488] sm:$0xff] }
 0x140   : > { %1620 = vmatpush.msrb.mxu3 %v1212_v32  ;;  %v1080_v37 = vld [vmem:[%s3128_s8 + $0x1a00] sm:$0xff]  ;;  %1602 = vmatmul.f32.vlgmr.msrb.gmra.mxu2 %v3444_v34  ;;  %v461_v32 = vld [vmem:[%s3128_s8 + $0x6a8] sm:$0xff] }
 0x141   : > { %v1208_v38 = vld [vmem:[%s3128_s8 + $0x1e00] sm:$0xff]  ;;  %1666 = vmatpush.msra.mxu2 %v437_v36  ;;  %1581 = vmatpush.msrb.mxu1 %v1080_v37  ;;  %v261_v35 = vld [vmem:[%s3128_s8 + $0x68] sm:$0xff] }
 0x142   : > { %1621 = vmatpush.msrb.mxu3 %v1208_v38  ;;  %1582 = vmatmul.f32.vlgmr.msrb.gmra.mxu1 %v3451_v39  ;;  %v329_v36 = vld [vmem:[%s3128_s8 + $0x288] sm:$0xff] }
 0x143   : > { %1622 = vmatmul.f32.vlgmr.msrb.gmra.mxu3 %v3454_v40  ;;  %1627 = vmatpush.msra.mxu0 %v305_v41  ;;  %v389_v37 = vld [vmem:[%s3128_s8 + $0x468] sm:$0xff] }
 0x144   : > { %1646 = vmatpush.msra.mxu1 %v373_v42  ;;  %1667 = vmatpush.msra.mxu2 %v433_v43  ;;  %v457_v38 = vld [vmem:[%s3128_s8 + $0x688] sm:$0xff] }
 0x145   : > { %1686 = vmatpush.msra.mxu3 %v501_v44  ;;  %1628 = vmatpush.msra.mxu0 %v301_v4  ;;  %v257_v41 = vld [vmem:[%s3128_s8 + $0x48] sm:$0xff] }
 0x146   : > { %1647 = vmatpush.msra.mxu1 %v369_v45  ;;  %1668 = vmatpush.msra.mxu2 %v429_v46  ;;  %v325_v42 = vld [vmem:[%s3128_s8 + $0x268] sm:$0xff] }
 0x147   : > { %1687 = vmatpush.msra.mxu3 %v497_v47  ;;  %1629 = vmatpush.msra.mxu0 %v297_v48  ;;  %v385_v43 = vld [vmem:[%s3128_s8 + $0x448] sm:$0xff] }
 0x148   : > { %1648 = vmatpush.msra.mxu1 %v365_v49  ;;  %1669 = vmatpush.msra.mxu2 %v425_v50  ;;  %v453_v44 = vld [vmem:[%s3128_s8 + $0x668] sm:$0xff] }
 0x149   : > { %1688 = vmatpush.msra.mxu3 %v493_v51  ;;  %1630 = vmatpush.msra.mxu0 %v293_v52  ;;  %v253_v4 = vld [vmem:[%s3128_s8 + $0x28] sm:$0xff] }
 0x14a   : > { %1649 = vmatpush.msra.mxu1 %v361_v53  ;;  %1670 = vmatpush.msra.mxu2 %v421_v54  ;;  %v321_v45 = vld [vmem:[%s3128_s8 + $0x248] sm:$0xff] }
 0x14b   : > { %1689 = vmatpush.msra.mxu3 %v489_v55  ;;  %1631 = vmatpush.msra.mxu0 %v289_v56  ;;  %v381_v46 = vld [vmem:[%s3128_s8 + $0x428] sm:$0xff] }
 0x14c   : > { %1650 = vmatpush.msra.mxu1 %v357_v57  ;;  %1671 = vmatpush.msra.mxu2 %v417_v58  ;;  %v449_v47 = vld [vmem:[%s3128_s8 + $0x648] sm:$0xff] }
 0x14d   : > { %1690 = vmatpush.msra.mxu3 %v485_v60  ;;  %1632 = vmatpush.msra.mxu0 %v285_v61  ;;  %v249_v48 = vld [vmem:[%s3128_s8 + $0x8] sm:$0xff] }
 0x14e   : > { %1651 = vmatpush.msra.mxu1 %v353_v62  ;;  %1672 = vmatpush.msra.mxu2 %v413_v0  ;;  %v317_v49 = vld [vmem:[%s3128_s8 + $0x228] sm:$0xff] }
 0x14f   : > { %1691 = vmatpush.msra.mxu3 %v481_v2  ;;  %1633 = vmatpush.msra.mxu0 %v281_v3  ;;  %v377_v50 = vld [vmem:[%s3128_s8 + $0x408] sm:$0xff] }
 0x150   : > { %1652 = vmatpush.msra.mxu1 %v349_v6  ;;  %1673 = vmatpush.msra.mxu2 %v409_v7  ;;  %v445_v51 = vld [vmem:[%s3128_s8 + $0x628] sm:$0xff] }
 0x151   : > { %1692 = vmatpush.msra.mxu3 %v477_v8  ;;  %1634 = vmatpush.msra.mxu0 %v277_v9  ;;  %v565_v52 = vld [vmem:[%s3128_s8 + $0x9e8] sm:$0xff] }
 0x152   : > { %1653 = vmatpush.msra.mxu1 %v345_v10  ;;  %1674 = vmatpush.msra.mxu2 %v405_v11  ;;  %v693_v53 = vld [vmem:[%s3128_s8 + $0xde8] sm:$0xff] }
 0x153   : > { %1693 = vmatpush.msra.mxu3 %v473_v14  ;;  %1635 = vmatpush.msra.mxu0 %v273_v16  ;;  %v313_v54 = vld [vmem:[%s3128_s8 + $0x208] sm:$0xff] }
 0x154   : > { %1654 = vmatpush.msra.mxu1 %v341_v17  ;;  %1675 = vmatpush.msra.mxu2 %v401_v18  ;;  %v441_v55 = vld [vmem:[%s3128_s8 + $0x608] sm:$0xff] }
 0x155   : > { %1694 = vmatpush.msra.mxu3 %v469_v23  ;;  %1636 = vmatpush.msra.mxu0 %v269_v24  ;;  %v561_v56 = vld [vmem:[%s3128_s8 + $0x9c8] sm:$0xff] }
 0x156   : > { %1655 = vmatpush.msra.mxu1 %v337_v26  ;;  %1676 = vmatpush.msra.mxu2 %v397_v27  ;;  %v629_v57 = vld [vmem:[%s3128_s8 + $0xbe8] sm:$0xff] }
 0x157   : > { %1695 = vmatpush.msra.mxu3 %v465_v28  ;;  %1637 = vmatpush.msra.mxu0 %v265_v29  ;;  %v689_v58 = vld [vmem:[%s3128_s8 + $0xdc8] sm:$0xff] }
 0x158   : > { %1656 = vmatpush.msra.mxu1 %v333_v30  ;;  %1677 = vmatpush.msra.mxu2 %v393_v31  ;;  %v757_v60 = vld [vmem:[%s3128_s8 + $0xfe8] sm:$0xff] }
 0x159   : > { %1696 = vmatpush.msra.mxu3 %v461_v32  ;;  %1638 = vmatpush.msra.mxu0 %v261_v35  ;;  %v557_v61 = vld [vmem:[%s3128_s8 + $0x9a8] sm:$0xff] }
 0x15a   : > { %1657 = vmatpush.msra.mxu1 %v329_v36  ;;  %1678 = vmatpush.msra.mxu2 %v389_v37  ;;  %v625_v62 = vld [vmem:[%s3128_s8 + $0xbc8] sm:$0xff] }
 0x15b   : > { %1697 = vmatpush.msra.mxu3 %v457_v38  ;;  %1639 = vmatpush.msra.mxu0 %v257_v41  ;;  %v685_v0 = vld [vmem:[%s3128_s8 + $0xda8] sm:$0xff] }
 0x15c   : > { %1658 = vmatpush.msra.mxu1 %v325_v42  ;;  %1679 = vmatpush.msra.mxu2 %v385_v43  ;;  %v753_v2 = vld [vmem:[%s3128_s8 + $0xfc8] sm:$0xff] }
 0x15d   : > { %1698 = vmatpush.msra.mxu3 %v453_v44  ;;  %1640 = vmatpush.msra.mxu0 %v253_v4  ;;  %v553_v3 = vld [vmem:[%s3128_s8 + $0x988] sm:$0xff] }
 0x15e   : > { %1659 = vmatpush.msra.mxu1 %v321_v45  ;;  %1680 = vmatpush.msra.mxu2 %v381_v46  ;;  %v621_v6 = vld [vmem:[%s3128_s8 + $0xba8] sm:$0xff] }
 0x15f   : > { %1699 = vmatpush.msra.mxu3 %v449_v47  ;;  %1641 = vmatpush.msra.mxu0 %v249_v48  ;;  %v681_v7 = vld [vmem:[%s3128_s8 + $0xd88] sm:$0xff] }
 0x160   : > { %1660 = vmatpush.msra.mxu1 %v317_v49  ;;  %1681 = vmatpush.msra.mxu2 %v377_v50  ;;  %v749_v8 = vld [vmem:[%s3128_s8 + $0xfa8] sm:$0xff] }
 0x161   : > { %1700 = vmatpush.msra.mxu3 %v445_v51  ;;  %1706 = vmatpush.msrb.mxu0 %v565_v52  ;;  %v549_v9 = vld [vmem:[%s3128_s8 + $0x968] sm:$0xff] }
 0x162   : > { %1746 = vmatpush.msrb.mxu2 %v693_v53  ;;  %1661 = vmatpush.msra.mxu1 %v313_v54  ;;  %v617_v10 = vld [vmem:[%s3128_s8 + $0xb88] sm:$0xff]  ;;  %v1323_v54 = vpop.f32.mrf.mxu0 }
 0x163   : > { %1701 = vmatpush.msra.mxu3 %v441_v55  ;;  %1707 = vmatpush.msrb.mxu0 %v561_v56  ;;  %v677_v11 = vld [vmem:[%s3128_s8 + $0xd68] sm:$0xff] }
 0x164   : > { %1726 = vmatpush.msrb.mxu1 %v629_v57  ;;  %1747 = vmatpush.msrb.mxu2 %v689_v58  ;;  %v745_v14 = vld [vmem:[%s3128_s8 + $0xf88] sm:$0xff] }
 0x165   : > { %1766 = vmatpush.msrb.mxu3 %v757_v60  ;;  %1708 = vmatpush.msrb.mxu0 %v557_v61  ;;  %v545_v16 = vld [vmem:[%s3128_s8 + $0x948] sm:$0xff] }
 0x166   : > { %1727 = vmatpush.msrb.mxu1 %v625_v62  ;;  %1748 = vmatpush.msrb.mxu2 %v685_v0  ;;  %v613_v17 = vld [vmem:[%s3128_s8 + $0xb68] sm:$0xff]  ;;  %v1343_v62 = vpop.f32.mrf.mxu1 }
 0x167   : > { %1767 = vmatpush.msrb.mxu3 %v753_v2  ;;  %1709 = vmatpush.msrb.mxu0 %v553_v3  ;;  %v673_v18 = vld [vmem:[%s3128_s8 + $0xd48] sm:$0xff]  ;;  %v1344_v3 = vadd.f32 %v1343_v62, %v1323_v54 }
 0x168   : > { %1728 = vmatpush.msrb.mxu1 %v621_v6  ;;  %1749 = vmatpush.msrb.mxu2 %v681_v7  ;;  %v741_v23 = vld [vmem:[%s3128_s8 + $0xf68] sm:$0xff]  ;;  %v1363_v6 = vpop.f32.mrf.mxu2 }
 0x169   : > { %1768 = vmatpush.msrb.mxu3 %v749_v8  ;;  %1710 = vmatpush.msrb.mxu0 %v549_v9  ;;  %v541_v24 = vld [vmem:[%s3128_s8 + $0x928] sm:$0xff] }
 0x16a   : > { %1729 = vmatpush.msrb.mxu1 %v617_v10  ;;  %1750 = vmatpush.msrb.mxu2 %v677_v11  ;;  %v609_v26 = vld [vmem:[%s3128_s8 + $0xb48] sm:$0xff]  ;;  %v1364_v10 = vadd.f32 %v1363_v6, %v1344_v3 }
 0x16b   : > { %1769 = vmatpush.msrb.mxu3 %v745_v14  ;;  %1711 = vmatpush.msrb.mxu0 %v545_v16  ;;  %v669_v27 = vld [vmem:[%s3128_s8 + $0xd28] sm:$0xff]  ;;  %v1383_v16 = vpop.f32.mrf.mxu3 }
 0x16c   : > { %1730 = vmatpush.msrb.mxu1 %v613_v17  ;;  %v737_v28 = vld [vmem:[%s3128_s8 + $0xf48] sm:$0xff]  ;;  %1751 = vmatpush.msrb.mxu2 %v673_v18  ;;  %v1384_v18 = vadd.f32 %v1383_v16, %v1364_v10 }
 0x16d   : > { %1770 = vmatpush.msrb.mxu3 %v741_v23  ;;  %v537_v29 = vld [vmem:[%s3128_s8 + $0x908] sm:$0xff]  ;;  %1712 = vmatpush.msrb.mxu0 %v541_v24 }
 0x16e   : > { %v605_v30 = vld [vmem:[%s3128_s8 + $0xb28] sm:$0xff]  ;;  %1731 = vmatpush.msrb.mxu1 %v609_v26  ;;  %1752 = vmatpush.msrb.mxu2 %v669_v27  ;;  %v1403_v27 = vpop.f32.mrf.mxu0 }
 0x16f   : > { %v665_v31 = vld [vmem:[%s3128_s8 + $0xd08] sm:$0xff]  ;;  %1771 = vmatpush.msrb.mxu3 %v737_v28  ;;  %1713 = vmatpush.msrb.mxu0 %v537_v29  ;;  %v1404_v29 = vadd.f32 %v1403_v27, %v1384_v18 }
 0x170   : > { %v733_v32 = vld [vmem:[%s3128_s8 + $0xf28] sm:$0xff]  ;;  %1732 = vmatpush.msrb.mxu1 %v605_v30  ;;  %1753 = vmatpush.msrb.mxu2 %v665_v31 }
 0x171   : > { %v533_v35 = vld [vmem:[%s3128_s8 + $0x8e8] sm:$0xff]  ;;  %1772 = vmatpush.msrb.mxu3 %v733_v32  ;;  %1682 = vmatmul.f32.vlgmr.msra.gmra.mxu2 %v3259_v59 }
 0x172   : > { %v601_v36 = vld [vmem:[%s3128_s8 + $0xb08] sm:$0xff]  ;;  %1714 = vmatpush.msrb.mxu0 %v533_v35  ;;  %1702 = vmatmul.f32.vlgmr.msra.gmra.mxu3 %v3269_v1 }
 0x173   : > { %v661_v37 = vld [vmem:[%s3128_s8 + $0xce8] sm:$0xff]  ;;  %1733 = vmatpush.msrb.mxu1 %v601_v36  ;;  %1642 = vmatmul.f32.vlgmr.msra.gmra.mxu0 %v3265_v63  ;;  %v1423_v36 = vpop.f32.mrf.mxu1 }
 0x174   : > { %v729_v38 = vld [vmem:[%s3128_s8 + $0xf08] sm:$0xff]  ;;  %1754 = vmatpush.msrb.mxu2 %v661_v37  ;;  %1662 = vmatmul.f32.vlgmr.msra.gmra.mxu1 %v3276_v5 }
 0x175   : > { %v529_v41 = vld [vmem:[%s3128_s8 + $0x8c8] sm:$0xff]  ;;  %1773 = vmatpush.msrb.mxu3 %v729_v38 }
 0x176   : > { %v597_v42 = vld [vmem:[%s3128_s8 + $0xae8] sm:$0xff]  ;;  %1715 = vmatpush.msrb.mxu0 %v529_v41  ;;  %v1424_v41 = vadd.f32 %v1423_v36, %v1404_v29 }
 0x177   : > { %v657_v43 = vld [vmem:[%s3128_s8 + $0xcc8] sm:$0xff]  ;;  %1734 = vmatpush.msrb.mxu1 %v597_v42  ;;  %v1443_v42 = vpop.f32.mrf.mxu2 }
 0x178   : > { %v725_v44 = vld [vmem:[%s3128_s8 + $0xee8] sm:$0xff]  ;;  %1755 = vmatpush.msrb.mxu2 %v657_v43 }
 0x179   : > { %v525_v4 = vld [vmem:[%s3128_s8 + $0x8a8] sm:$0xff]  ;;  %1774 = vmatpush.msrb.mxu3 %v725_v44 }
 0x17a   : > { %v593_v45 = vld [vmem:[%s3128_s8 + $0xac8] sm:$0xff]  ;;  %1716 = vmatpush.msrb.mxu0 %v525_v4 }
 0x17b   : > { %v653_v46 = vld [vmem:[%s3128_s8 + $0xca8] sm:$0xff]  ;;  %1735 = vmatpush.msrb.mxu1 %v593_v45  ;;  %v1444_v45 = vadd.f32 %v1443_v42, %v1424_v41  ;;  %v1483_v36 = vpop.f32.mrf.mxu0 }
 0x17c   : > { %v721_v47 = vld [vmem:[%s3128_s8 + $0xec8] sm:$0xff]  ;;  %1756 = vmatpush.msrb.mxu2 %v653_v46 }
 0x17d   : > { %v521_v48 = vld [vmem:[%s3128_s8 + $0x888] sm:$0xff]  ;;  %1775 = vmatpush.msrb.mxu3 %v721_v47 }
 0x17e   : > { %v589_v49 = vld [vmem:[%s3128_s8 + $0xaa8] sm:$0xff]  ;;  %1717 = vmatpush.msrb.mxu0 %v521_v48  ;;  %v1463_v48 = vpop.f32.mrf.mxu3 }
 0x17f   : > { %v649_v50 = vld [vmem:[%s3128_s8 + $0xc88] sm:$0xff]  ;;  %1736 = vmatpush.msrb.mxu1 %v589_v49 }
 0x180   : > { %v717_v51 = vld [vmem:[%s3128_s8 + $0xea8] sm:$0xff]  ;;  %1757 = vmatpush.msrb.mxu2 %v649_v50  ;;  %v3604_v50 = vadd.f32 %v1463_v48, %v1444_v45 }
 0x181   : > { %v517_v52 = vld [vmem:[%s3128_s8 + $0x868] sm:$0xff]  ;;  %1776 = vmatpush.msrb.mxu3 %v717_v51  ;;  %v1503_v45 = vpop.f32.mrf.mxu1 }
 0x182   : > { %v585_v53 = vld [vmem:[%s3128_s8 + $0xa88] sm:$0xff]  ;;  %1718 = vmatpush.msrb.mxu0 %v517_v52  ;;  %v1484_v41 = vadd.f32 %v1483_v36, %v3604_v50 }
 0x183   : > { %v645_v55 = vld [vmem:[%s3128_s8 + $0xc68] sm:$0xff]  ;;  %1737 = vmatpush.msrb.mxu1 %v585_v53 }
 0x184   : > { %v713_v56 = vld [vmem:[%s3128_s8 + $0xe88] sm:$0xff]  ;;  %1758 = vmatpush.msrb.mxu2 %v645_v55  ;;  %v1504_v48 = vadd.f32 %v1503_v45, %v1484_v41 }
 0x185   : > { %v513_v57 = vld [vmem:[%s3128_s8 + $0x848] sm:$0xff]  ;;  %1777 = vmatpush.msrb.mxu3 %v713_v56 }
 0x186   : > { %v581_v58 = vld [vmem:[%s3128_s8 + $0xa68] sm:$0xff]  ;;  %1719 = vmatpush.msrb.mxu0 %v513_v57 }
 0x187   : > { %v641_v60 = vld [vmem:[%s3128_s8 + $0xc48] sm:$0xff]  ;;  %1738 = vmatpush.msrb.mxu1 %v581_v58 }
 0x188   : > { %v709_v61 = vld [vmem:[%s3128_s8 + $0xe68] sm:$0xff]  ;;  %1759 = vmatpush.msrb.mxu2 %v641_v60 }
 0x189   : > { %v509_v0 = vld [vmem:[%s3128_s8 + $0x828] sm:$0xff]  ;;  %1778 = vmatpush.msrb.mxu3 %v709_v61 }
 0x18a   : > { %v577_v2 = vld [vmem:[%s3128_s8 + $0xa48] sm:$0xff]  ;;  %1720 = vmatpush.msrb.mxu0 %v509_v0 }
 0x18b   : > { %v637_v7 = vld [vmem:[%s3128_s8 + $0xc28] sm:$0xff]  ;;  %1739 = vmatpush.msrb.mxu1 %v577_v2 }
 0x18c   : > { %v705_v8 = vld [vmem:[%s3128_s8 + $0xe48] sm:$0xff]  ;;  %1760 = vmatpush.msrb.mxu2 %v637_v7 }
 0x18d   : > { %v505_v9 = vld [vmem:[%s3128_s8 + $0x808] sm:$0xff]  ;;  %1779 = vmatpush.msrb.mxu3 %v705_v8 }
 0x18e   : > { %v573_v11 = vld [vmem:[%s3128_s8 + $0xa28] sm:$0xff]  ;;  %1721 = vmatpush.msrb.mxu0 %v505_v9 }
 0x18f   : > { %v633_v14 = vld [vmem:[%s3128_s8 + $0xc08] sm:$0xff]  ;;  %1740 = vmatpush.msrb.mxu1 %v573_v11  ;;  %1722 = vmatmul.f32.vlgmr.msrb.gmra.mxu0 %v3297_v19 }
 0x190   : > { %v701_v17 = vld [vmem:[%s3128_s8 + $0xe28] sm:$0xff]  ;;  %1761 = vmatpush.msrb.mxu2 %v633_v14 }
 0x191   : > { %v821_v23 = vld [vmem:[%s3128_s8 + $0x11e8] sm:$0xff]  ;;  %1780 = vmatpush.msrb.mxu3 %v701_v17  ;;  %1762 = vmatmul.f32.vlgmr.msrb.gmra.mxu2 %v3291_v15 }
 0x192   : > { %v949_v24 = vld [vmem:[%s3128_s8 + $0x15e8] sm:$0xff]  ;;  %1786 = vmatpush.msra.mxu0 %v821_v23 }
 0x193   : > { %v569_v26 = vld [vmem:[%s3128_s8 + $0xa08] sm:$0xff]  ;;  %1826 = vmatpush.msra.mxu2 %v949_v24 }
 0x194   : > { %v697_v28 = vld [vmem:[%s3128_s8 + $0xe08] sm:$0xff]  ;;  %1741 = vmatpush.msrb.mxu1 %v569_v26 }
 0x195   : > { %v817_v30 = vld [vmem:[%s3128_s8 + $0x11c8] sm:$0xff]  ;;  %1781 = vmatpush.msrb.mxu3 %v697_v28  ;;  %1742 = vmatmul.f32.vlgmr.msrb.gmra.mxu1 %v3308_v25 }
 0x196   : > { %v885_v31 = vld [vmem:[%s3128_s8 + $0x13e8] sm:$0xff]  ;;  %1787 = vmatpush.msra.mxu0 %v817_v30  ;;  %1782 = vmatmul.f32.vlgmr.msrb.gmra.mxu3 %v3301_v21 }
 0x197   : > { %v945_v32 = vld [vmem:[%s3128_s8 + $0x15c8] sm:$0xff]  ;;  %1806 = vmatpush.msra.mxu1 %v885_v31 }
 0x198   : > { %v1013_v35 = vld [vmem:[%s3128_s8 + $0x17e8] sm:$0xff]  ;;  %1827 = vmatpush.msra.mxu2 %v945_v32 }
 0x199   : > { %v813_v37 = vld [vmem:[%s3128_s8 + $0x11a8] sm:$0xff]  ;;  %1846 = vmatpush.msra.mxu3 %v1013_v35 }
 0x19a   : > { %v881_v38 = vld [vmem:[%s3128_s8 + $0x13c8] sm:$0xff]  ;;  %1788 = vmatpush.msra.mxu0 %v813_v37 }
 0x19b   : > { %v941_v43 = vld [vmem:[%s3128_s8 + $0x15a8] sm:$0xff]  ;;  %1807 = vmatpush.msra.mxu1 %v881_v38 }
 0x19c   : > { %v1009_v44 = vld [vmem:[%s3128_s8 + $0x17c8] sm:$0xff]  ;;  %1828 = vmatpush.msra.mxu2 %v941_v43 }
 0x19d   : > { %v809_v4 = vld [vmem:[%s3128_s8 + $0x1188] sm:$0xff]  ;;  %1847 = vmatpush.msra.mxu3 %v1009_v44 }
 0x19e   : > { %v877_v46 = vld [vmem:[%s3128_s8 + $0x13a8] sm:$0xff]  ;;  %1789 = vmatpush.msra.mxu0 %v809_v4 }
 0x19f   : > { %v937_v47 = vld [vmem:[%s3128_s8 + $0x1588] sm:$0xff]  ;;  %1808 = vmatpush.msra.mxu1 %v877_v46 }
 0x1a0   : > { %v1005_v49 = vld [vmem:[%s3128_s8 + $0x17a8] sm:$0xff]  ;;  %1829 = vmatpush.msra.mxu2 %v937_v47 }
 0x1a1   : > { %v805_v51 = vld [vmem:[%s3128_s8 + $0x1168] sm:$0xff]  ;;  %1848 = vmatpush.msra.mxu3 %v1005_v49 }
 0x1a2   : > { %v873_v52 = vld [vmem:[%s3128_s8 + $0x1388] sm:$0xff]  ;;  %1790 = vmatpush.msra.mxu0 %v805_v51 }
 0x1a3   : > { %v933_v53 = vld [vmem:[%s3128_s8 + $0x1568] sm:$0xff]  ;;  %1809 = vmatpush.msra.mxu1 %v873_v52 }
 0x1a4   : > { %v1001_v54 = vld [vmem:[%s3128_s8 + $0x1788] sm:$0xff]  ;;  %1830 = vmatpush.msra.mxu2 %v933_v53  ;;  %v1523_v53 = vpop.f32.mrf.mxu2 }
 0x1a5   : > { %v801_v55 = vld [vmem:[%s3128_s8 + $0x1148] sm:$0xff]  ;;  %1849 = vmatpush.msra.mxu3 %v1001_v54 }
 0x1a6   : > { %v869_v56 = vld [vmem:[%s3128_s8 + $0x1368] sm:$0xff]  ;;  %1791 = vmatpush.msra.mxu0 %v801_v55 }
 0x1a7   : > { %v929_v57 = vld [vmem:[%s3128_s8 + $0x1548] sm:$0xff]  ;;  %1810 = vmatpush.msra.mxu1 %v869_v56  ;;  %v1524_v56 = vadd.f32 %v1523_v53, %v1504_v48 }
 0x1a8   : > { %v997_v58 = vld [vmem:[%s3128_s8 + $0x1768] sm:$0xff]  ;;  %1831 = vmatpush.msra.mxu2 %v929_v57 }
 0x1a9   : > { %v797_v60 = vld [vmem:[%s3128_s8 + $0x1128] sm:$0xff]  ;;  %1850 = vmatpush.msra.mxu3 %v997_v58 }
 0x1aa   : > { %v865_v61 = vld [vmem:[%s3128_s8 + $0x1348] sm:$0xff]  ;;  %1792 = vmatpush.msra.mxu0 %v797_v60  ;;  %v1543_v60 = vpop.f32.mrf.mxu3 }
 0x1ab   : > { %v925_v62 = vld [vmem:[%s3128_s8 + $0x1528] sm:$0xff]  ;;  %1811 = vmatpush.msra.mxu1 %v865_v61 }
 0x1ac   : > { %v993_v0 = vld [vmem:[%s3128_s8 + $0x1748] sm:$0xff]  ;;  %1832 = vmatpush.msra.mxu2 %v925_v62 }
 0x1ad   : > { %v793_v2 = vld [vmem:[%s3128_s8 + $0x1108] sm:$0xff]  ;;  %1851 = vmatpush.msra.mxu3 %v993_v0  ;;  %v3663_v0 = vadd.f32 %v1543_v60, %v1524_v56 }
 0x1ae   : > { %v861_v3 = vld [vmem:[%s3128_s8 + $0x1328] sm:$0xff]  ;;  %1793 = vmatpush.msra.mxu0 %v793_v2 }
 0x1af   : > { %v921_v6 = vld [vmem:[%s3128_s8 + $0x1508] sm:$0xff]  ;;  %1812 = vmatpush.msra.mxu1 %v861_v3 }
 0x1b0   : > { %v989_v7 = vld [vmem:[%s3128_s8 + $0x1728] sm:$0xff]  ;;  %1833 = vmatpush.msra.mxu2 %v921_v6 }
 0x1b1   : > { %v789_v8 = vld [vmem:[%s3128_s8 + $0x10e8] sm:$0xff]  ;;  %1852 = vmatpush.msra.mxu3 %v989_v7 }
 0x1b2   : > { %v857_v9 = vld [vmem:[%s3128_s8 + $0x1308] sm:$0xff]  ;;  %1794 = vmatpush.msra.mxu0 %v789_v8 }
 0x1b3   : > { %v917_v10 = vld [vmem:[%s3128_s8 + $0x14e8] sm:$0xff]  ;;  %1813 = vmatpush.msra.mxu1 %v857_v9 }
 0x1b4   : > { %v985_v11 = vld [vmem:[%s3128_s8 + $0x1708] sm:$0xff]  ;;  %1834 = vmatpush.msra.mxu2 %v917_v10 }
 0x1b5   : > { %v785_v14 = vld [vmem:[%s3128_s8 + $0x10c8] sm:$0xff]  ;;  %1853 = vmatpush.msra.mxu3 %v985_v11 }
 0x1b6   : > { %v853_v16 = vld [vmem:[%s3128_s8 + $0x12e8] sm:$0xff]  ;;  %1795 = vmatpush.msra.mxu0 %v785_v14 }
 0x1b7   : > { %v913_v17 = vld [vmem:[%s3128_s8 + $0x14c8] sm:$0xff]  ;;  %1814 = vmatpush.msra.mxu1 %v853_v16 }
 0x1b8   : > { %v981_v18 = vld [vmem:[%s3128_s8 + $0x16e8] sm:$0xff]  ;;  %1835 = vmatpush.msra.mxu2 %v913_v17 }
 0x1b9   : > { %v781_v23 = vld [vmem:[%s3128_s8 + $0x10a8] sm:$0xff]  ;;  %1854 = vmatpush.msra.mxu3 %v981_v18 }
 0x1ba   : > { %v849_v24 = vld [vmem:[%s3128_s8 + $0x12c8] sm:$0xff]  ;;  %1796 = vmatpush.msra.mxu0 %v781_v23 }
 0x1bb   : > { %v909_v26 = vld [vmem:[%s3128_s8 + $0x14a8] sm:$0xff]  ;;  %1815 = vmatpush.msra.mxu1 %v849_v24 }
 0x1bc   : > { %v977_v27 = vld [vmem:[%s3128_s8 + $0x16c8] sm:$0xff]  ;;  %1836 = vmatpush.msra.mxu2 %v909_v26 }
 0x1bd   : > { %v777_v28 = vld [vmem:[%s3128_s8 + $0x1088] sm:$0xff]  ;;  %1855 = vmatpush.msra.mxu3 %v977_v27 }
 0x1be   : > { %v845_v29 = vld [vmem:[%s3128_s8 + $0x12a8] sm:$0xff]  ;;  %1797 = vmatpush.msra.mxu0 %v777_v28 }
 0x1bf   : > { %v905_v30 = vld [vmem:[%s3128_s8 + $0x1488] sm:$0xff]  ;;  %1816 = vmatpush.msra.mxu1 %v845_v29 }
 0x1c0   : > { %v973_v31 = vld [vmem:[%s3128_s8 + $0x16a8] sm:$0xff]  ;;  %1837 = vmatpush.msra.mxu2 %v905_v30 }
 0x1c1   : > { %v773_v32 = vld [vmem:[%s3128_s8 + $0x1068] sm:$0xff]  ;;  %1856 = vmatpush.msra.mxu3 %v973_v31 }
 0x1c2   : > { %v841_v35 = vld [vmem:[%s3128_s8 + $0x1288] sm:$0xff]  ;;  %1798 = vmatpush.msra.mxu0 %v773_v32 }
 0x1c3   : > { %v901_v37 = vld [vmem:[%s3128_s8 + $0x1468] sm:$0xff]  ;;  %1817 = vmatpush.msra.mxu1 %v841_v35 }
 0x1c4   : > { %v969_v38 = vld [vmem:[%s3128_s8 + $0x1688] sm:$0xff]  ;;  %1838 = vmatpush.msra.mxu2 %v901_v37 }
 0x1c5   : > { %v769_v42 = vld [vmem:[%s3128_s8 + $0x1048] sm:$0xff]  ;;  %1857 = vmatpush.msra.mxu3 %v969_v38 }
 0x1c6   : > { %v837_v43 = vld [vmem:[%s3128_s8 + $0x1268] sm:$0xff]  ;;  %1799 = vmatpush.msra.mxu0 %v769_v42 }
 0x1c7   : > { %v897_v44 = vld [vmem:[%s3128_s8 + $0x1448] sm:$0xff]  ;;  %1818 = vmatpush.msra.mxu1 %v837_v43 }
 0x1c8   : > { %v965_v4 = vld [vmem:[%s3128_s8 + $0x1668] sm:$0xff]  ;;  %1839 = vmatpush.msra.mxu2 %v897_v44 }
 0x1c9   : > { %v765_v46 = vld [vmem:[%s3128_s8 + $0x1028] sm:$0xff]  ;;  %1858 = vmatpush.msra.mxu3 %v965_v4 }
 0x1ca   : > { %v833_v47 = vld [vmem:[%s3128_s8 + $0x1248] sm:$0xff]  ;;  %1800 = vmatpush.msra.mxu0 %v765_v46 }
 0x1cb   : > { %v893_v49 = vld [vmem:[%s3128_s8 + $0x1428] sm:$0xff]  ;;  %1819 = vmatpush.msra.mxu1 %v833_v47 }
 0x1cc   : > { %v961_v50 = vld [vmem:[%s3128_s8 + $0x1648] sm:$0xff]  ;;  %1840 = vmatpush.msra.mxu2 %v893_v49 }
 0x1cd   : > { %v761_v51 = vld [vmem:[%s3128_s8 + $0x1008] sm:$0xff]  ;;  %1859 = vmatpush.msra.mxu3 %v961_v50 }
 0x1ce   : > { %v829_v52 = vld [vmem:[%s3128_s8 + $0x1228] sm:$0xff]  ;;  %1801 = vmatpush.msra.mxu0 %v761_v51 }
 0x1cf   : > { %v889_v54 = vld [vmem:[%s3128_s8 + $0x1408] sm:$0xff]  ;;  %1820 = vmatpush.msra.mxu1 %v829_v52  ;;  %1802 = vmatmul.f32.vlgmr.msra.gmra.mxu0 %v3361_v12 }
 0x1d0   : > { %v957_v55 = vld [vmem:[%s3128_s8 + $0x1628] sm:$0xff]  ;;  %1841 = vmatpush.msra.mxu2 %v889_v54 }
 0x1d1   : > { %v1077_v57 = vld [vmem:[%s3128_s8 + $0x19e8] sm:$0xff]  ;;  %1860 = vmatpush.msra.mxu3 %v957_v55  ;;  %1842 = vmatmul.f32.vlgmr.msra.gmra.mxu2 %v3364_v13 }
 0x1d2   : > { %v1205_v58 = vld [vmem:[%s3128_s8 + $0x1de8] sm:$0xff]  ;;  %1866 = vmatpush.msrb.mxu0 %v1077_v57 }
 0x1d3   : > { %v825_v61 = vld [vmem:[%s3128_s8 + $0x1208] sm:$0xff]  ;;  %1906 = vmatpush.msrb.mxu2 %v1205_v58 }
 0x1d4   : > { %v953_v62 = vld [vmem:[%s3128_s8 + $0x1608] sm:$0xff]  ;;  %1821 = vmatpush.msra.mxu1 %v825_v61 }
 0x1d5   : > { %v1073_v2 = vld [vmem:[%s3128_s8 + $0x19c8] sm:$0xff]  ;;  %1861 = vmatpush.msra.mxu3 %v953_v62  ;;  %1822 = vmatmul.f32.vlgmr.msra.gmra.mxu1 %v3371_v20  ;;  %v1563_v62 = vpop.f32.mrf.mxu0 }
 0x1d6   : > { %v1141_v3 = vld [vmem:[%s3128_s8 + $0x1be8] sm:$0xff]  ;;  %1862 = vmatmul.f32.vlgmr.msra.gmra.mxu3 %v3374_v22  ;;  %1867 = vmatpush.msrb.mxu0 %v1073_v2 }
 0x1d7   : > { %v1201_v6 = vld [vmem:[%s3128_s8 + $0x1dc8] sm:$0xff]  ;;  %1886 = vmatpush.msrb.mxu1 %v1141_v3 }
 0x1d8   : > { %v1269_v7 = vld [vmem:[%s3128_s8 + $0x1fe8] sm:$0xff]  ;;  %1907 = vmatpush.msrb.mxu2 %v1201_v6  ;;  %v1564_v6 = vadd.f32 %v1563_v62, %v3663_v0  ;;  %v414_v62 = vld [vmem:[%s3128_s8 + $0x530] sm:$0xff] }
 0x1d9   : > { %v1069_v8 = vld [vmem:[%s3128_s8 + $0x19a8] sm:$0xff]  ;;  %1926 = vmatpush.msrb.mxu3 %v1269_v7 }
 0x1da   : > { %v1137_v9 = vld [vmem:[%s3128_s8 + $0x1bc8] sm:$0xff]  ;;  %1868 = vmatpush.msrb.mxu0 %v1069_v8 }
 0x1db   : > { %v1197_v10 = vld [vmem:[%s3128_s8 + $0x1da8] sm:$0xff]  ;;  %1887 = vmatpush.msrb.mxu1 %v1137_v9 }
 0x1dc   : > { %v1265_v11 = vld [vmem:[%s3128_s8 + $0x1fc8] sm:$0xff]  ;;  %1908 = vmatpush.msrb.mxu2 %v1197_v10 }
 0x1dd   : > { %v1065_v14 = vld [vmem:[%s3128_s8 + $0x1988] sm:$0xff]  ;;  %1927 = vmatpush.msrb.mxu3 %v1265_v11  ;;  %v1583_v11 = vpop.f32.mrf.mxu1 }
 0x1de   : > { %v1133_v16 = vld [vmem:[%s3128_s8 + $0x1ba8] sm:$0xff]  ;;  %1869 = vmatpush.msrb.mxu0 %v1065_v14 }
 0x1df   : > { %v1193_v17 = vld [vmem:[%s3128_s8 + $0x1d88] sm:$0xff]  ;;  %1888 = vmatpush.msrb.mxu1 %v1133_v16 }
 0x1e0   : > { %v1261_v18 = vld [vmem:[%s3128_s8 + $0x1fa8] sm:$0xff]  ;;  %1909 = vmatpush.msrb.mxu2 %v1193_v17 }
 0x1e1   : > { %v1061_v23 = vld [vmem:[%s3128_s8 + $0x1968] sm:$0xff]  ;;  %1928 = vmatpush.msrb.mxu3 %v1261_v18  ;;  %v1584_v18 = vadd.f32 %v1583_v11, %v1564_v6  ;;  %v350_v6 = vld [vmem:[%s3128_s8 + $0x330] sm:$0xff] }
 0x1e2   : > { %v1129_v24 = vld [vmem:[%s3128_s8 + $0x1b88] sm:$0xff]  ;;  %1870 = vmatpush.msrb.mxu0 %v1061_v23  ;;  %v406_v11 = vld [vmem:[%s3128_s8 + $0x4f0] sm:$0xff] }
 0x1e3   : > { %v1189_v26 = vld [vmem:[%s3128_s8 + $0x1d68] sm:$0xff]  ;;  %1889 = vmatpush.msrb.mxu1 %v1129_v24 }
 0x1e4   : > { %v1257_v27 = vld [vmem:[%s3128_s8 + $0x1f88] sm:$0xff]  ;;  %1910 = vmatpush.msrb.mxu2 %v1189_v26  ;;  %v1603_v26 = vpop.f32.mrf.mxu2 }
 0x1e5   : > { %v1057_v28 = vld [vmem:[%s3128_s8 + $0x1948] sm:$0xff]  ;;  %1929 = vmatpush.msrb.mxu3 %v1257_v27 }
 0x1e6   : > { %v1125_v29 = vld [vmem:[%s3128_s8 + $0x1b68] sm:$0xff]  ;;  %1871 = vmatpush.msrb.mxu0 %v1057_v28 }
 0x1e7   : > { %v1185_v30 = vld [vmem:[%s3128_s8 + $0x1d48] sm:$0xff]  ;;  %1890 = vmatpush.msrb.mxu1 %v1125_v29  ;;  %v1604_v29 = vadd.f32 %v1603_v26, %v1584_v18  ;;  %v470_v18 = vld [vmem:[%s3128_s8 + $0x6f0] sm:$0xff] }
 0x1e8   : > { %v1253_v31 = vld [vmem:[%s3128_s8 + $0x1f68] sm:$0xff]  ;;  %1911 = vmatpush.msrb.mxu2 %v1185_v30  ;;  %v310_v30 = vld [vmem:[%s3128_s8 + $0x1f0] sm:$0xff] }
 0x1e9   : > { %v1053_v32 = vld [vmem:[%s3128_s8 + $0x1928] sm:$0xff]  ;;  %1930 = vmatpush.msrb.mxu3 %v1253_v31  ;;  %v438_v31 = vld [vmem:[%s3128_s8 + $0x5f0] sm:$0xff] }
 0x1ea   : > { %v1121_v35 = vld [vmem:[%s3128_s8 + $0x1b48] sm:$0xff]  ;;  %1872 = vmatpush.msrb.mxu0 %v1053_v32  ;;  %v1623_v32 = vpop.f32.mrf.mxu3  ;;  %v398_v26 = vld [vmem:[%s3128_s8 + $0x4b0] sm:$0xff] }
 0x1eb   : > { %v1181_v36 = vld [vmem:[%s3128_s8 + $0x1d28] sm:$0xff]  ;;  %1891 = vmatpush.msrb.mxu1 %v1121_v35 }
 0x1ec   : > { %v1249_v37 = vld [vmem:[%s3128_s8 + $0x1f48] sm:$0xff]  ;;  %1912 = vmatpush.msrb.mxu2 %v1181_v36 }
 0x1ed   : > { %v1049_v38 = vld [vmem:[%s3128_s8 + $0x1908] sm:$0xff]  ;;  %1931 = vmatpush.msrb.mxu3 %v1249_v37  ;;  %v3734_v37 = vadd.f32 %v1623_v32, %v1604_v29  ;;  %v334_v29 = vld [vmem:[%s3128_s8 + $0x2b0] sm:$0xff] }
 0x1ee   : > { %v1117_v41 = vld [vmem:[%s3128_s8 + $0x1b28] sm:$0xff]  ;;  %1873 = vmatpush.msrb.mxu0 %v1049_v38  ;;  %v306_v38 = vld [vmem:[%s3128_s8 + $0x1d0] sm:$0xff] }
 0x1ef   : > { %v1177_v42 = vld [vmem:[%s3128_s8 + $0x1d08] sm:$0xff]  ;;  %1892 = vmatpush.msrb.mxu1 %v1117_v41  ;;  %v374_v41 = vld [vmem:[%s3128_s8 + $0x3f0] sm:$0xff] }
 0x1f0   : > { %v1245_v43 = vld [vmem:[%s3128_s8 + $0x1f28] sm:$0xff]  ;;  %1913 = vmatpush.msrb.mxu2 %v1177_v42  ;;  %v434_v42 = vld [vmem:[%s3128_s8 + $0x5d0] sm:$0xff] }
 0x1f1   : > { %v1045_v44 = vld [vmem:[%s3128_s8 + $0x18e8] sm:$0xff]  ;;  %1932 = vmatpush.msrb.mxu3 %v1245_v43  ;;  %v502_v43 = vld [vmem:[%s3128_s8 + $0x7f0] sm:$0xff] }
 0x1f2   : > { %v1113_v4 = vld [vmem:[%s3128_s8 + $0x1b08] sm:$0xff]  ;;  %1874 = vmatpush.msrb.mxu0 %v1045_v44  ;;  %v302_v44 = vld [vmem:[%s3128_s8 + $0x1b0] sm:$0xff] }
 0x1f3   : > { %v1173_v45 = vld [vmem:[%s3128_s8 + $0x1ce8] sm:$0xff]  ;;  %1893 = vmatpush.msrb.mxu1 %v1113_v4  ;;  %v370_v4 = vld [vmem:[%s3128_s8 + $0x3d0] sm:$0xff] }
 0x1f4   : > { %v1241_v46 = vld [vmem:[%s3128_s8 + $0x1f08] sm:$0xff]  ;;  %1914 = vmatpush.msrb.mxu2 %v1173_v45  ;;  %v430_v45 = vld [vmem:[%s3128_s8 + $0x5b0] sm:$0xff] }
 0x1f5   : > { %v1041_v47 = vld [vmem:[%s3128_s8 + $0x18c8] sm:$0xff]  ;;  %1933 = vmatpush.msrb.mxu3 %v1241_v46  ;;  %v498_v46 = vld [vmem:[%s3128_s8 + $0x7d0] sm:$0xff] }
 0x1f6   : > { %v1109_v48 = vld [vmem:[%s3128_s8 + $0x1ae8] sm:$0xff]  ;;  %1875 = vmatpush.msrb.mxu0 %v1041_v47  ;;  %v298_v47 = vld [vmem:[%s3128_s8 + $0x190] sm:$0xff] }
 0x1f7   : > { %v1169_v49 = vld [vmem:[%s3128_s8 + $0x1cc8] sm:$0xff]  ;;  %1894 = vmatpush.msrb.mxu1 %v1109_v48  ;;  %v366_v48 = vld [vmem:[%s3128_s8 + $0x3b0] sm:$0xff] }
 0x1f8   : > { %v1237_v50 = vld [vmem:[%s3128_s8 + $0x1ee8] sm:$0xff]  ;;  %1915 = vmatpush.msrb.mxu2 %v1169_v49  ;;  %v426_v49 = vld [vmem:[%s3128_s8 + $0x590] sm:$0xff] }
 0x1f9   : > { %v1037_v51 = vld [vmem:[%s3128_s8 + $0x18a8] sm:$0xff]  ;;  %1934 = vmatpush.msrb.mxu3 %v1237_v50  ;;  %v494_v50 = vld [vmem:[%s3128_s8 + $0x7b0] sm:$0xff] }
 0x1fa   : > { %v1105_v52 = vld [vmem:[%s3128_s8 + $0x1ac8] sm:$0xff]  ;;  %1876 = vmatpush.msrb.mxu0 %v1037_v51  ;;  %v294_v51 = vld [vmem:[%s3128_s8 + $0x170] sm:$0xff] }
 0x1fb   : > { %v1165_v53 = vld [vmem:[%s3128_s8 + $0x1ca8] sm:$0xff]  ;;  %1895 = vmatpush.msrb.mxu1 %v1105_v52  ;;  %v362_v52 = vld [vmem:[%s3128_s8 + $0x390] sm:$0xff] }
 0x1fc   : > { %v1233_v54 = vld [vmem:[%s3128_s8 + $0x1ec8] sm:$0xff]  ;;  %1916 = vmatpush.msrb.mxu2 %v1165_v53  ;;  %v422_v53 = vld [vmem:[%s3128_s8 + $0x570] sm:$0xff] }
 0x1fd   : > { %v1033_v55 = vld [vmem:[%s3128_s8 + $0x1888] sm:$0xff]  ;;  %1935 = vmatpush.msrb.mxu3 %v1233_v54  ;;  %v490_v54 = vld [vmem:[%s3128_s8 + $0x790] sm:$0xff] }
 0x1fe   : > { %v1101_v56 = vld [vmem:[%s3128_s8 + $0x1aa8] sm:$0xff]  ;;  %1877 = vmatpush.msrb.mxu0 %v1033_v55  ;;  %v290_v55 = vld [vmem:[%s3128_s8 + $0x150] sm:$0xff] }
 0x1ff   : > { %v1161_v57 = vld [vmem:[%s3128_s8 + $0x1c88] sm:$0xff]  ;;  %1896 = vmatpush.msrb.mxu1 %v1101_v56  ;;  %v358_v56 = vld [vmem:[%s3128_s8 + $0x370] sm:$0xff] }
 0x200   : > { %v1229_v58 = vld [vmem:[%s3128_s8 + $0x1ea8] sm:$0xff]  ;;  %1917 = vmatpush.msrb.mxu2 %v1161_v57  ;;  %v418_v57 = vld [vmem:[%s3128_s8 + $0x550] sm:$0xff] }
 0x201   : > { %v1029_v60 = vld [vmem:[%s3128_s8 + $0x1868] sm:$0xff]  ;;  %1936 = vmatpush.msrb.mxu3 %v1229_v58  ;;  %v486_v58 = vld [vmem:[%s3128_s8 + $0x770] sm:$0xff] }
 0x202   : > { %v1097_v61 = vld [vmem:[%s3128_s8 + $0x1a88] sm:$0xff]  ;;  %1878 = vmatpush.msrb.mxu0 %v1029_v60  ;;  %v286_v60 = vld [vmem:[%s3128_s8 + $0x130] sm:$0xff] }
 0x203   : > { %v1157_v2 = vld [vmem:[%s3128_s8 + $0x1c68] sm:$0xff]  ;;  %1897 = vmatpush.msrb.mxu1 %v1097_v61  ;;  %v354_v61 = vld [vmem:[%s3128_s8 + $0x350] sm:$0xff] }
 0x204   : > { %v1225_v3 = vld [vmem:[%s3128_s8 + $0x1e88] sm:$0xff]  ;;  %1918 = vmatpush.msrb.mxu2 %v1157_v2  ;;  %v482_v2 = vld [vmem:[%s3128_s8 + $0x750] sm:$0xff] }
 0x205   : > { %v1025_v7 = vld [vmem:[%s3128_s8 + $0x1848] sm:$0xff]  ;;  %1937 = vmatpush.msrb.mxu3 %v1225_v3  ;;  %v282_v3 = vld [vmem:[%s3128_s8 + $0x110] sm:$0xff] }
 0x206   : > { %v1093_v8 = vld [vmem:[%s3128_s8 + $0x1a68] sm:$0xff]  ;;  %1879 = vmatpush.msrb.mxu0 %v1025_v7  ;;  %v410_v7 = vld [vmem:[%s3128_s8 + $0x510] sm:$0xff] }
 0x207   : > { %v1153_v9 = vld [vmem:[%s3128_s8 + $0x1c48] sm:$0xff]  ;;  %1898 = vmatpush.msrb.mxu1 %v1093_v8  ;;  %v478_v8 = vld [vmem:[%s3128_s8 + $0x730] sm:$0xff] }
 0x208   : > { %v1221_v10 = vld [vmem:[%s3128_s8 + $0x1e68] sm:$0xff]  ;;  %1919 = vmatpush.msrb.mxu2 %v1153_v9  ;;  %v278_v9 = vld [vmem:[%s3128_s8 + $0xf0] sm:$0xff] }
 0x209   : > { %v1021_v14 = vld [vmem:[%s3128_s8 + $0x1828] sm:$0xff]  ;;  %1938 = vmatpush.msrb.mxu3 %v1221_v10  ;;  %v346_v10 = vld [vmem:[%s3128_s8 + $0x310] sm:$0xff] }
 0x20a   : > { %v1089_v16 = vld [vmem:[%s3128_s8 + $0x1a48] sm:$0xff]  ;;  %1880 = vmatpush.msrb.mxu0 %v1021_v14  ;;  %v474_v14 = vld [vmem:[%s3128_s8 + $0x710] sm:$0xff] }
 0x20b   : > { %v1149_v0 = vld [vmem:[%s3128_s8 + $0x1c28] sm:$0xff]  ;;  %1899 = vmatpush.msrb.mxu1 %v1089_v16  ;;  %v274_v16 = vld [vmem:[%s3128_s8 + $0xd0] sm:$0xff] }
 0x20c   : > { %v1217_v17 = vld [vmem:[%s3128_s8 + $0x1e48] sm:$0xff]  ;;  %1920 = vmatpush.msrb.mxu2 %v1149_v0  ;;  %v342_v0 = vld [vmem:[%s3128_s8 + $0x2f0] sm:$0xff] }
 0x20d   : > { %v1017_v23 = vld [vmem:[%s3128_s8 + $0x1808] sm:$0xff]  ;;  %1939 = vmatpush.msrb.mxu3 %v1217_v17  ;;  %v402_v17 = vld [vmem:[%s3128_s8 + $0x4d0] sm:$0xff] }
 0x20e   : > { %v1085_v24 = vld [vmem:[%s3128_s8 + $0x1a28] sm:$0xff]  ;;  %1881 = vmatpush.msrb.mxu0 %v1017_v23  ;;  %v270_v23 = vld [vmem:[%s3128_s8 + $0xb0] sm:$0xff] }
 0x20f   : > { %v1145_v27 = vld [vmem:[%s3128_s8 + $0x1c08] sm:$0xff]  ;;  %1900 = vmatpush.msrb.mxu1 %v1085_v24  ;;  %1882 = vmatmul.f32.vlgmr.msrb.gmra.mxu0 %v3441_v33  ;;  %v338_v24 = vld [vmem:[%s3128_s8 + $0x2d0] sm:$0xff] }
 0x210   : > { %v1213_v28 = vld [vmem:[%s3128_s8 + $0x1e28] sm:$0xff]  ;;  %1921 = vmatpush.msrb.mxu2 %v1145_v27  ;;  %1946 = vmatpush.msra.mxu0 %v310_v30  ;;  %v466_v27 = vld [vmem:[%s3128_s8 + $0x6d0] sm:$0xff] }
 0x211   : > { %1940 = vmatpush.msrb.mxu3 %v1213_v28  ;;  %v1081_v35 = vld [vmem:[%s3128_s8 + $0x1a08] sm:$0xff]  ;;  %1922 = vmatmul.f32.vlgmr.msrb.gmra.mxu2 %v3444_v34  ;;  %v266_v28 = vld [vmem:[%s3128_s8 + $0x90] sm:$0xff] }
 0x212   : > { %v1209_v36 = vld [vmem:[%s3128_s8 + $0x1e08] sm:$0xff]  ;;  %1986 = vmatpush.msra.mxu2 %v438_v31  ;;  %1901 = vmatpush.msrb.mxu1 %v1081_v35  ;;  %v394_v30 = vld [vmem:[%s3128_s8 + $0x490] sm:$0xff] }
 0x213   : > { %1941 = vmatpush.msrb.mxu3 %v1209_v36  ;;  %1902 = vmatmul.f32.vlgmr.msrb.gmra.mxu1 %v3451_v39  ;;  %v462_v31 = vld [vmem:[%s3128_s8 + $0x6b0] sm:$0xff] }
 0x214   : > { %1942 = vmatmul.f32.vlgmr.msrb.gmra.mxu3 %v3454_v40  ;;  %1947 = vmatpush.msra.mxu0 %v306_v38  ;;  %v262_v32 = vld [vmem:[%s3128_s8 + $0x70] sm:$0xff] }
 0x215   : > { %1966 = vmatpush.msra.mxu1 %v374_v41  ;;  %1987 = vmatpush.msra.mxu2 %v434_v42  ;;  %v330_v35 = vld [vmem:[%s3128_s8 + $0x290] sm:$0xff] }
 0x216   : > { %2006 = vmatpush.msra.mxu3 %v502_v43  ;;  %1948 = vmatpush.msra.mxu0 %v302_v44  ;;  %v390_v36 = vld [vmem:[%s3128_s8 + $0x470] sm:$0xff] }
 0x217   : > { %1967 = vmatpush.msra.mxu1 %v370_v4  ;;  %1988 = vmatpush.msra.mxu2 %v430_v45  ;;  %v458_v38 = vld [vmem:[%s3128_s8 + $0x690] sm:$0xff] }
 0x218   : > { %2007 = vmatpush.msra.mxu3 %v498_v46  ;;  %1949 = vmatpush.msra.mxu0 %v298_v47  ;;  %v258_v41 = vld [vmem:[%s3128_s8 + $0x50] sm:$0xff] }
 0x219   : > { %1968 = vmatpush.msra.mxu1 %v366_v48  ;;  %1989 = vmatpush.msra.mxu2 %v426_v49  ;;  %v326_v42 = vld [vmem:[%s3128_s8 + $0x270] sm:$0xff] }
 0x21a   : > { %2008 = vmatpush.msra.mxu3 %v494_v50  ;;  %1950 = vmatpush.msra.mxu0 %v294_v51  ;;  %v386_v43 = vld [vmem:[%s3128_s8 + $0x450] sm:$0xff] }
 0x21b   : > { %1969 = vmatpush.msra.mxu1 %v362_v52  ;;  %1990 = vmatpush.msra.mxu2 %v422_v53  ;;  %v454_v44 = vld [vmem:[%s3128_s8 + $0x670] sm:$0xff] }
 0x21c   : > { %2009 = vmatpush.msra.mxu3 %v490_v54  ;;  %1951 = vmatpush.msra.mxu0 %v290_v55  ;;  %v254_v4 = vld [vmem:[%s3128_s8 + $0x30] sm:$0xff] }
 0x21d   : > { %1970 = vmatpush.msra.mxu1 %v358_v56  ;;  %1991 = vmatpush.msra.mxu2 %v418_v57  ;;  %v322_v45 = vld [vmem:[%s3128_s8 + $0x250] sm:$0xff] }
 0x21e   : > { %2010 = vmatpush.msra.mxu3 %v486_v58  ;;  %1952 = vmatpush.msra.mxu0 %v286_v60  ;;  %v382_v46 = vld [vmem:[%s3128_s8 + $0x430] sm:$0xff] }
 0x21f   : > { %1971 = vmatpush.msra.mxu1 %v354_v61  ;;  %1992 = vmatpush.msra.mxu2 %v414_v62  ;;  %v450_v47 = vld [vmem:[%s3128_s8 + $0x650] sm:$0xff] }
 0x220   : > { %2011 = vmatpush.msra.mxu3 %v482_v2  ;;  %1953 = vmatpush.msra.mxu0 %v282_v3  ;;  %v250_v48 = vld [vmem:[%s3128_s8 + $0x10] sm:$0xff] }
 0x221   : > { %1972 = vmatpush.msra.mxu1 %v350_v6  ;;  %1993 = vmatpush.msra.mxu2 %v410_v7  ;;  %v318_v49 = vld [vmem:[%s3128_s8 + $0x230] sm:$0xff] }
 0x222   : > { %2012 = vmatpush.msra.mxu3 %v478_v8  ;;  %1954 = vmatpush.msra.mxu0 %v278_v9  ;;  %v378_v50 = vld [vmem:[%s3128_s8 + $0x410] sm:$0xff] }
 0x223   : > { %1973 = vmatpush.msra.mxu1 %v346_v10  ;;  %1994 = vmatpush.msra.mxu2 %v406_v11  ;;  %v446_v51 = vld [vmem:[%s3128_s8 + $0x630] sm:$0xff] }
 0x224   : > { %2013 = vmatpush.msra.mxu3 %v474_v14  ;;  %1955 = vmatpush.msra.mxu0 %v274_v16  ;;  %v566_v52 = vld [vmem:[%s3128_s8 + $0x9f0] sm:$0xff] }
 0x225   : > { %1974 = vmatpush.msra.mxu1 %v342_v0  ;;  %1995 = vmatpush.msra.mxu2 %v402_v17  ;;  %v694_v53 = vld [vmem:[%s3128_s8 + $0xdf0] sm:$0xff] }
 0x226   : > { %2014 = vmatpush.msra.mxu3 %v470_v18  ;;  %1956 = vmatpush.msra.mxu0 %v270_v23  ;;  %v314_v54 = vld [vmem:[%s3128_s8 + $0x210] sm:$0xff] }
 0x227   : > { %1975 = vmatpush.msra.mxu1 %v338_v24  ;;  %1996 = vmatpush.msra.mxu2 %v398_v26  ;;  %v442_v55 = vld [vmem:[%s3128_s8 + $0x610] sm:$0xff] }
 0x228   : > { %2015 = vmatpush.msra.mxu3 %v466_v27  ;;  %1957 = vmatpush.msra.mxu0 %v266_v28  ;;  %v562_v56 = vld [vmem:[%s3128_s8 + $0x9d0] sm:$0xff] }
 0x229   : > { %1976 = vmatpush.msra.mxu1 %v334_v29  ;;  %1997 = vmatpush.msra.mxu2 %v394_v30  ;;  %v630_v57 = vld [vmem:[%s3128_s8 + $0xbf0] sm:$0xff] }
 0x22a   : > { %2016 = vmatpush.msra.mxu3 %v462_v31  ;;  %1958 = vmatpush.msra.mxu0 %v262_v32  ;;  %v690_v58 = vld [vmem:[%s3128_s8 + $0xdd0] sm:$0xff] }
 0x22b   : > { %1977 = vmatpush.msra.mxu1 %v330_v35  ;;  %1998 = vmatpush.msra.mxu2 %v390_v36  ;;  %v758_v60 = vld [vmem:[%s3128_s8 + $0xff0] sm:$0xff] }
 0x22c   : > { %2017 = vmatpush.msra.mxu3 %v458_v38  ;;  %1959 = vmatpush.msra.mxu0 %v258_v41  ;;  %v558_v61 = vld [vmem:[%s3128_s8 + $0x9b0] sm:$0xff] }
 0x22d   : > { %1978 = vmatpush.msra.mxu1 %v326_v42  ;;  %1999 = vmatpush.msra.mxu2 %v386_v43  ;;  %v626_v62 = vld [vmem:[%s3128_s8 + $0xbd0] sm:$0xff] }
 0x22e   : > { %2018 = vmatpush.msra.mxu3 %v454_v44  ;;  %1960 = vmatpush.msra.mxu0 %v254_v4  ;;  %v686_v2 = vld [vmem:[%s3128_s8 + $0xdb0] sm:$0xff] }
 0x22f   : > { %1979 = vmatpush.msra.mxu1 %v322_v45  ;;  %2000 = vmatpush.msra.mxu2 %v382_v46  ;;  %v754_v3 = vld [vmem:[%s3128_s8 + $0xfd0] sm:$0xff] }
 0x230   : > { %2019 = vmatpush.msra.mxu3 %v450_v47  ;;  %1961 = vmatpush.msra.mxu0 %v250_v48  ;;  %v554_v6 = vld [vmem:[%s3128_s8 + $0x990] sm:$0xff] }
 0x231   : > { %1980 = vmatpush.msra.mxu1 %v318_v49  ;;  %2001 = vmatpush.msra.mxu2 %v378_v50  ;;  %v622_v7 = vld [vmem:[%s3128_s8 + $0xbb0] sm:$0xff] }
 0x232   : > { %2020 = vmatpush.msra.mxu3 %v446_v51  ;;  %2026 = vmatpush.msrb.mxu0 %v566_v52  ;;  %v682_v8 = vld [vmem:[%s3128_s8 + $0xd90] sm:$0xff] }
 0x233   : > { %2066 = vmatpush.msrb.mxu2 %v694_v53  ;;  %1981 = vmatpush.msra.mxu1 %v314_v54  ;;  %v750_v9 = vld [vmem:[%s3128_s8 + $0xfb0] sm:$0xff] }
 0x234   : > { %2021 = vmatpush.msra.mxu3 %v442_v55  ;;  %2027 = vmatpush.msrb.mxu0 %v562_v56  ;;  %v550_v10 = vld [vmem:[%s3128_s8 + $0x970] sm:$0xff]  ;;  %v1643_v55 = vpop.f32.mrf.mxu0 }
 0x235   : > { %2046 = vmatpush.msrb.mxu1 %v630_v57  ;;  %2067 = vmatpush.msrb.mxu2 %v690_v58  ;;  %v618_v11 = vld [vmem:[%s3128_s8 + $0xb90] sm:$0xff] }
 0x236   : > { %2086 = vmatpush.msrb.mxu3 %v758_v60  ;;  %2028 = vmatpush.msrb.mxu0 %v558_v61  ;;  %v678_v14 = vld [vmem:[%s3128_s8 + $0xd70] sm:$0xff] }
 0x237   : > { %2047 = vmatpush.msrb.mxu1 %v626_v62  ;;  %2068 = vmatpush.msrb.mxu2 %v686_v2  ;;  %v746_v16 = vld [vmem:[%s3128_s8 + $0xf90] sm:$0xff]  ;;  %v1663_v2 = vpop.f32.mrf.mxu1 }
 0x238   : > { %2087 = vmatpush.msrb.mxu3 %v754_v3  ;;  %2029 = vmatpush.msrb.mxu0 %v554_v6  ;;  %v546_v0 = vld [vmem:[%s3128_s8 + $0x950] sm:$0xff] }
 0x239   : > { %2048 = vmatpush.msrb.mxu1 %v622_v7  ;;  %2069 = vmatpush.msrb.mxu2 %v682_v8  ;;  %v614_v17 = vld [vmem:[%s3128_s8 + $0xb70] sm:$0xff]  ;;  %v1664_v7 = vadd.f32 %v1663_v2, %v1643_v55  ;;  %v1683_v8 = vpop.f32.mrf.mxu2 }
 0x23a   : > { %2088 = vmatpush.msrb.mxu3 %v750_v9  ;;  %2030 = vmatpush.msrb.mxu0 %v550_v10  ;;  %v674_v18 = vld [vmem:[%s3128_s8 + $0xd50] sm:$0xff] }
 0x23b   : > { %2049 = vmatpush.msrb.mxu1 %v618_v11  ;;  %v742_v23 = vld [vmem:[%s3128_s8 + $0xf70] sm:$0xff]  ;;  %2070 = vmatpush.msrb.mxu2 %v678_v14  ;;  %v1684_v14 = vadd.f32 %v1683_v8, %v1664_v7 }
 0x23c   : > { %2089 = vmatpush.msrb.mxu3 %v746_v16  ;;  %v542_v24 = vld [vmem:[%s3128_s8 + $0x930] sm:$0xff]  ;;  %2031 = vmatpush.msrb.mxu0 %v546_v0 }
 0x23d   : > { %v610_v26 = vld [vmem:[%s3128_s8 + $0xb50] sm:$0xff]  ;;  %2050 = vmatpush.msrb.mxu1 %v614_v17  ;;  %2071 = vmatpush.msrb.mxu2 %v674_v18  ;;  %v1703_v17 = vpop.f32.mrf.mxu3 }
 0x23e   : > { %v670_v27 = vld [vmem:[%s3128_s8 + $0xd30] sm:$0xff]  ;;  %2090 = vmatpush.msrb.mxu3 %v742_v23  ;;  %2032 = vmatpush.msrb.mxu0 %v542_v24  ;;  %v1704_v23 = vadd.f32 %v1703_v17, %v1684_v14 }
 0x23f   : > { %v738_v28 = vld [vmem:[%s3128_s8 + $0xf50] sm:$0xff]  ;;  %2051 = vmatpush.msrb.mxu1 %v610_v26  ;;  %2072 = vmatpush.msrb.mxu2 %v670_v27 }
 0x240   : > { %v538_v29 = vld [vmem:[%s3128_s8 + $0x910] sm:$0xff]  ;;  %2091 = vmatpush.msrb.mxu3 %v738_v28  ;;  %2002 = vmatmul.f32.vlgmr.msra.gmra.mxu2 %v3259_v59  ;;  %v1723_v28 = vpop.f32.mrf.mxu0 }
 0x241   : > { %v606_v30 = vld [vmem:[%s3128_s8 + $0xb30] sm:$0xff]  ;;  %2033 = vmatpush.msrb.mxu0 %v538_v29  ;;  %2022 = vmatmul.f32.vlgmr.msra.gmra.mxu3 %v3269_v1 }
 0x242   : > { %v666_v31 = vld [vmem:[%s3128_s8 + $0xd10] sm:$0xff]  ;;  %2052 = vmatpush.msrb.mxu1 %v606_v30  ;;  %1962 = vmatmul.f32.vlgmr.msra.gmra.mxu0 %v3265_v63  ;;  %v1724_v30 = vadd.f32 %v1723_v28, %v1704_v23 }
 0x243   : > { %v734_v32 = vld [vmem:[%s3128_s8 + $0xf30] sm:$0xff]  ;;  %2073 = vmatpush.msrb.mxu2 %v666_v31  ;;  %1982 = vmatmul.f32.vlgmr.msra.gmra.mxu1 %v3276_v5 }
 0x244   : > { %v534_v35 = vld [vmem:[%s3128_s8 + $0x8f0] sm:$0xff]  ;;  %2092 = vmatpush.msrb.mxu3 %v734_v32 }
 0x245   : > { %v602_v36 = vld [vmem:[%s3128_s8 + $0xb10] sm:$0xff]  ;;  %2034 = vmatpush.msrb.mxu0 %v534_v35 }
 0x246   : > { %v662_v38 = vld [vmem:[%s3128_s8 + $0xcf0] sm:$0xff]  ;;  %2053 = vmatpush.msrb.mxu1 %v602_v36 }
 0x247   : > { %v730_v41 = vld [vmem:[%s3128_s8 + $0xf10] sm:$0xff]  ;;  %2074 = vmatpush.msrb.mxu2 %v662_v38  ;;  %v1743_v38 = vpop.f32.mrf.mxu1 }
 0x248   : > { %v530_v42 = vld [vmem:[%s3128_s8 + $0x8d0] sm:$0xff]  ;;  %2093 = vmatpush.msrb.mxu3 %v730_v41 }
 0x249   : > { %v598_v43 = vld [vmem:[%s3128_s8 + $0xaf0] sm:$0xff]  ;;  %2035 = vmatpush.msrb.mxu0 %v530_v42 }
 0x24a   : > { %v658_v44 = vld [vmem:[%s3128_s8 + $0xcd0] sm:$0xff]  ;;  %2054 = vmatpush.msrb.mxu1 %v598_v43  ;;  %v1744_v43 = vadd.f32 %v1743_v38, %v1724_v30 }
 0x24b   : > { %v726_v4 = vld [vmem:[%s3128_s8 + $0xef0] sm:$0xff]  ;;  %2075 = vmatpush.msrb.mxu2 %v658_v44  ;;  %v1763_v44 = vpop.f32.mrf.mxu2 }
 0x24c   : > { %v526_v45 = vld [vmem:[%s3128_s8 + $0x8b0] sm:$0xff]  ;;  %2094 = vmatpush.msrb.mxu3 %v726_v4 }
 0x24d   : > { %v594_v46 = vld [vmem:[%s3128_s8 + $0xad0] sm:$0xff]  ;;  %2036 = vmatpush.msrb.mxu0 %v526_v45 }
 0x24e   : > { %v654_v47 = vld [vmem:[%s3128_s8 + $0xcb0] sm:$0xff]  ;;  %2055 = vmatpush.msrb.mxu1 %v594_v46 }
 0x24f   : > { %v722_v48 = vld [vmem:[%s3128_s8 + $0xed0] sm:$0xff]  ;;  %2076 = vmatpush.msrb.mxu2 %v654_v47  ;;  %v1764_v47 = vadd.f32 %v1763_v44, %v1744_v43 }
 0x250   : > { %v522_v49 = vld [vmem:[%s3128_s8 + $0x890] sm:$0xff]  ;;  %2095 = vmatpush.msrb.mxu3 %v722_v48 }
 0x251   : > { %v590_v50 = vld [vmem:[%s3128_s8 + $0xab0] sm:$0xff]  ;;  %2037 = vmatpush.msrb.mxu0 %v522_v49 }
 0x252   : > { %v650_v51 = vld [vmem:[%s3128_s8 + $0xc90] sm:$0xff]  ;;  %2056 = vmatpush.msrb.mxu1 %v590_v50  ;;  %v1783_v50 = vpop.f32.mrf.mxu3 }
 0x253   : > { %v718_v52 = vld [vmem:[%s3128_s8 + $0xeb0] sm:$0xff]  ;;  %2077 = vmatpush.msrb.mxu2 %v650_v51 }
 0x254   : > { %v518_v53 = vld [vmem:[%s3128_s8 + $0x870] sm:$0xff]  ;;  %2096 = vmatpush.msrb.mxu3 %v718_v52  ;;  %v3884_v52 = vadd.f32 %v1783_v50, %v1764_v47 }
 0x255   : > { %v586_v54 = vld [vmem:[%s3128_s8 + $0xa90] sm:$0xff]  ;;  %2038 = vmatpush.msrb.mxu0 %v518_v53 }
 0x256   : > { %v646_v56 = vld [vmem:[%s3128_s8 + $0xc70] sm:$0xff]  ;;  %2057 = vmatpush.msrb.mxu1 %v586_v54 }
 0x257   : > { %v714_v57 = vld [vmem:[%s3128_s8 + $0xe90] sm:$0xff]  ;;  %2078 = vmatpush.msrb.mxu2 %v646_v56 }
 0x258   : > { %v514_v58 = vld [vmem:[%s3128_s8 + $0x850] sm:$0xff]  ;;  %2097 = vmatpush.msrb.mxu3 %v714_v57 }
 0x259   : > { %v582_v60 = vld [vmem:[%s3128_s8 + $0xa70] sm:$0xff]  ;;  %2039 = vmatpush.msrb.mxu0 %v514_v58 }
 0x25a   : > { %v642_v61 = vld [vmem:[%s3128_s8 + $0xc50] sm:$0xff]  ;;  %2058 = vmatpush.msrb.mxu1 %v582_v60 }
 0x25b   : > { %v710_v62 = vld [vmem:[%s3128_s8 + $0xe70] sm:$0xff]  ;;  %2079 = vmatpush.msrb.mxu2 %v642_v61 }
 0x25c   : > { %v510_v3 = vld [vmem:[%s3128_s8 + $0x830] sm:$0xff]  ;;  %2098 = vmatpush.msrb.mxu3 %v710_v62 }
 0x25d   : > { %v578_v6 = vld [vmem:[%s3128_s8 + $0xa50] sm:$0xff]  ;;  %2040 = vmatpush.msrb.mxu0 %v510_v3 }
 0x25e   : > { %v638_v9 = vld [vmem:[%s3128_s8 + $0xc30] sm:$0xff]  ;;  %2059 = vmatpush.msrb.mxu1 %v578_v6 }
 0x25f   : > { %v706_v10 = vld [vmem:[%s3128_s8 + $0xe50] sm:$0xff]  ;;  %2080 = vmatpush.msrb.mxu2 %v638_v9 }
 0x260   : > { %v506_v11 = vld [vmem:[%s3128_s8 + $0x810] sm:$0xff]  ;;  %2099 = vmatpush.msrb.mxu3 %v706_v10 }
 0x261   : > { %v574_v16 = vld [vmem:[%s3128_s8 + $0xa30] sm:$0xff]  ;;  %2041 = vmatpush.msrb.mxu0 %v506_v11 }
 0x262   : > { %v634_v0 = vld [vmem:[%s3128_s8 + $0xc10] sm:$0xff]  ;;  %2060 = vmatpush.msrb.mxu1 %v574_v16  ;;  %2042 = vmatmul.f32.vlgmr.msrb.gmra.mxu0 %v3297_v19 }
 0x263   : > { %v702_v18 = vld [vmem:[%s3128_s8 + $0xe30] sm:$0xff]  ;;  %2081 = vmatpush.msrb.mxu2 %v634_v0 }
 0x264   : > { %v822_v24 = vld [vmem:[%s3128_s8 + $0x11f0] sm:$0xff]  ;;  %2100 = vmatpush.msrb.mxu3 %v702_v18  ;;  %2082 = vmatmul.f32.vlgmr.msrb.gmra.mxu2 %v3291_v15 }
 0x265   : > { %v950_v26 = vld [vmem:[%s3128_s8 + $0x15f0] sm:$0xff]  ;;  %2106 = vmatpush.msra.mxu0 %v822_v24 }
 0x266   : > { %v570_v27 = vld [vmem:[%s3128_s8 + $0xa10] sm:$0xff]  ;;  %2146 = vmatpush.msra.mxu2 %v950_v26 }
 0x267   : > { %v698_v29 = vld [vmem:[%s3128_s8 + $0xe10] sm:$0xff]  ;;  %2061 = vmatpush.msrb.mxu1 %v570_v27 }
 0x268   : > { %v818_v31 = vld [vmem:[%s3128_s8 + $0x11d0] sm:$0xff]  ;;  %2101 = vmatpush.msrb.mxu3 %v698_v29  ;;  %2062 = vmatmul.f32.vlgmr.msrb.gmra.mxu1 %v3308_v25 }
 0x269   : > { %v886_v32 = vld [vmem:[%s3128_s8 + $0x13f0] sm:$0xff]  ;;  %2107 = vmatpush.msra.mxu0 %v818_v31  ;;  %2102 = vmatmul.f32.vlgmr.msrb.gmra.mxu3 %v3301_v21 }
 0x26a   : > { %v946_v35 = vld [vmem:[%s3128_s8 + $0x15d0] sm:$0xff]  ;;  %2126 = vmatpush.msra.mxu1 %v886_v32 }
 0x26b   : > { %v1014_v36 = vld [vmem:[%s3128_s8 + $0x17f0] sm:$0xff]  ;;  %2147 = vmatpush.msra.mxu2 %v946_v35 }
 0x26c   : > { %v814_v41 = vld [vmem:[%s3128_s8 + $0x11b0] sm:$0xff]  ;;  %2166 = vmatpush.msra.mxu3 %v1014_v36 }
 0x26d   : > { %v882_v42 = vld [vmem:[%s3128_s8 + $0x13d0] sm:$0xff]  ;;  %2108 = vmatpush.msra.mxu0 %v814_v41  ;;  %v1803_v41 = vpop.f32.mrf.mxu0 }
 0x26e   : > { %v942_v4 = vld [vmem:[%s3128_s8 + $0x15b0] sm:$0xff]  ;;  %2127 = vmatpush.msra.mxu1 %v882_v42  ;;  %v1804_v44 = vadd.f32 %v1803_v41, %v3884_v52 }
 0x26f   : > { %v1010_v45 = vld [vmem:[%s3128_s8 + $0x17d0] sm:$0xff]  ;;  %2148 = vmatpush.msra.mxu2 %v942_v4 }
 0x270   : > { %v810_v46 = vld [vmem:[%s3128_s8 + $0x1190] sm:$0xff]  ;;  %2167 = vmatpush.msra.mxu3 %v1010_v45 }
 0x271   : > { %v878_v48 = vld [vmem:[%s3128_s8 + $0x13b0] sm:$0xff]  ;;  %2109 = vmatpush.msra.mxu0 %v810_v46 }
 0x272   : > { %v938_v49 = vld [vmem:[%s3128_s8 + $0x1590] sm:$0xff]  ;;  %2128 = vmatpush.msra.mxu1 %v878_v48  ;;  %v1823_v48 = vpop.f32.mrf.mxu1 }
 0x273   : > { %v1006_v51 = vld [vmem:[%s3128_s8 + $0x17b0] sm:$0xff]  ;;  %2149 = vmatpush.msra.mxu2 %v938_v49 }
 0x274   : > { %v806_v53 = vld [vmem:[%s3128_s8 + $0x1170] sm:$0xff]  ;;  %2168 = vmatpush.msra.mxu3 %v1006_v51  ;;  %v1824_v51 = vadd.f32 %v1823_v48, %v1804_v44 }
 0x275   : > { %v874_v54 = vld [vmem:[%s3128_s8 + $0x1390] sm:$0xff]  ;;  %2110 = vmatpush.msra.mxu0 %v806_v53 }
 0x276   : > { %v934_v55 = vld [vmem:[%s3128_s8 + $0x1570] sm:$0xff]  ;;  %2129 = vmatpush.msra.mxu1 %v874_v54 }
 0x277   : > { %v1002_v56 = vld [vmem:[%s3128_s8 + $0x1790] sm:$0xff]  ;;  %2150 = vmatpush.msra.mxu2 %v934_v55 }
 0x278   : > { %v802_v57 = vld [vmem:[%s3128_s8 + $0x1150] sm:$0xff]  ;;  %2169 = vmatpush.msra.mxu3 %v1002_v56  ;;  %v1843_v56 = vpop.f32.mrf.mxu2 }
 0x279   : > { %v870_v58 = vld [vmem:[%s3128_s8 + $0x1370] sm:$0xff]  ;;  %2111 = vmatpush.msra.mxu0 %v802_v57 }
 0x27a   : > { %v930_v60 = vld [vmem:[%s3128_s8 + $0x1550] sm:$0xff]  ;;  %2130 = vmatpush.msra.mxu1 %v870_v58 }
 0x27b   : > { %v998_v61 = vld [vmem:[%s3128_s8 + $0x1770] sm:$0xff]  ;;  %2151 = vmatpush.msra.mxu2 %v930_v60  ;;  %v1844_v60 = vadd.f32 %v1843_v56, %v1824_v51 }
 0x27c   : > { %v798_v62 = vld [vmem:[%s3128_s8 + $0x1130] sm:$0xff]  ;;  %2170 = vmatpush.msra.mxu3 %v998_v61 }
 0x27d   : > { %v866_v2 = vld [vmem:[%s3128_s8 + $0x1350] sm:$0xff]  ;;  %2112 = vmatpush.msra.mxu0 %v798_v62 }
 0x27e   : > { %v926_v3 = vld [vmem:[%s3128_s8 + $0x1530] sm:$0xff]  ;;  %2131 = vmatpush.msra.mxu1 %v866_v2  ;;  %v1863_v2 = vpop.f32.mrf.mxu3 }
 0x27f   : > { %v994_v6 = vld [vmem:[%s3128_s8 + $0x1750] sm:$0xff]  ;;  %2152 = vmatpush.msra.mxu2 %v926_v3 }
 0x280   : > { %v794_v7 = vld [vmem:[%s3128_s8 + $0x1110] sm:$0xff]  ;;  %2171 = vmatpush.msra.mxu3 %v994_v6 }
 0x281   : > { %v862_v8 = vld [vmem:[%s3128_s8 + $0x1330] sm:$0xff]  ;;  %2113 = vmatpush.msra.mxu0 %v794_v7  ;;  %v3943_v7 = vadd.f32 %v1863_v2, %v1844_v60 }
 0x282   : > { %v922_v9 = vld [vmem:[%s3128_s8 + $0x1510] sm:$0xff]  ;;  %2132 = vmatpush.msra.mxu1 %v862_v8 }
 0x283   : > { %v990_v10 = vld [vmem:[%s3128_s8 + $0x1730] sm:$0xff]  ;;  %2153 = vmatpush.msra.mxu2 %v922_v9 }
 0x284   : > { %v790_v11 = vld [vmem:[%s3128_s8 + $0x10f0] sm:$0xff]  ;;  %2172 = vmatpush.msra.mxu3 %v990_v10 }
 0x285   : > { %v858_v14 = vld [vmem:[%s3128_s8 + $0x1310] sm:$0xff]  ;;  %2114 = vmatpush.msra.mxu0 %v790_v11 }
 0x286   : > { %v918_v16 = vld [vmem:[%s3128_s8 + $0x14f0] sm:$0xff]  ;;  %2133 = vmatpush.msra.mxu1 %v858_v14 }
 0x287   : > { %v986_v0 = vld [vmem:[%s3128_s8 + $0x1710] sm:$0xff]  ;;  %2154 = vmatpush.msra.mxu2 %v918_v16 }
 0x288   : > { %v786_v17 = vld [vmem:[%s3128_s8 + $0x10d0] sm:$0xff]  ;;  %2173 = vmatpush.msra.mxu3 %v986_v0 }
 0x289   : > { %v854_v18 = vld [vmem:[%s3128_s8 + $0x12f0] sm:$0xff]  ;;  %2115 = vmatpush.msra.mxu0 %v786_v17 }
 0x28a   : > { %v914_v23 = vld [vmem:[%s3128_s8 + $0x14d0] sm:$0xff]  ;;  %2134 = vmatpush.msra.mxu1 %v854_v18 }
 0x28b   : > { %v982_v24 = vld [vmem:[%s3128_s8 + $0x16f0] sm:$0xff]  ;;  %2155 = vmatpush.msra.mxu2 %v914_v23 }
 0x28c   : > { %v782_v26 = vld [vmem:[%s3128_s8 + $0x10b0] sm:$0xff]  ;;  %2174 = vmatpush.msra.mxu3 %v982_v24 }
 0x28d   : > { %v850_v27 = vld [vmem:[%s3128_s8 + $0x12d0] sm:$0xff]  ;;  %2116 = vmatpush.msra.mxu0 %v782_v26 }
 0x28e   : > { %v910_v28 = vld [vmem:[%s3128_s8 + $0x14b0] sm:$0xff]  ;;  %2135 = vmatpush.msra.mxu1 %v850_v27 }
 0x28f   : > { %v978_v29 = vld [vmem:[%s3128_s8 + $0x16d0] sm:$0xff]  ;;  %2156 = vmatpush.msra.mxu2 %v910_v28 }
 0x290   : > { %v778_v30 = vld [vmem:[%s3128_s8 + $0x1090] sm:$0xff]  ;;  %2175 = vmatpush.msra.mxu3 %v978_v29 }
 0x291   : > { %v846_v31 = vld [vmem:[%s3128_s8 + $0x12b0] sm:$0xff]  ;;  %2117 = vmatpush.msra.mxu0 %v778_v30 }
 0x292   : > { %v906_v32 = vld [vmem:[%s3128_s8 + $0x1490] sm:$0xff]  ;;  %2136 = vmatpush.msra.mxu1 %v846_v31 }
 0x293   : > { %v974_v35 = vld [vmem:[%s3128_s8 + $0x16b0] sm:$0xff]  ;;  %2157 = vmatpush.msra.mxu2 %v906_v32 }
 0x294   : > { %v774_v36 = vld [vmem:[%s3128_s8 + $0x1070] sm:$0xff]  ;;  %2176 = vmatpush.msra.mxu3 %v974_v35 }
 0x295   : > { %v842_v38 = vld [vmem:[%s3128_s8 + $0x1290] sm:$0xff]  ;;  %2118 = vmatpush.msra.mxu0 %v774_v36 }
 0x296   : > { %v902_v42 = vld [vmem:[%s3128_s8 + $0x1470] sm:$0xff]  ;;  %2137 = vmatpush.msra.mxu1 %v842_v38 }
 0x297   : > { %v970_v43 = vld [vmem:[%s3128_s8 + $0x1690] sm:$0xff]  ;;  %2158 = vmatpush.msra.mxu2 %v902_v42 }
 0x298   : > { %v770_v4 = vld [vmem:[%s3128_s8 + $0x1050] sm:$0xff]  ;;  %2177 = vmatpush.msra.mxu3 %v970_v43 }
 0x299   : > { %v838_v45 = vld [vmem:[%s3128_s8 + $0x1270] sm:$0xff]  ;;  %2119 = vmatpush.msra.mxu0 %v770_v4 }
 0x29a   : > { %v898_v46 = vld [vmem:[%s3128_s8 + $0x1450] sm:$0xff]  ;;  %2138 = vmatpush.msra.mxu1 %v838_v45 }
 0x29b   : > { %v966_v47 = vld [vmem:[%s3128_s8 + $0x1670] sm:$0xff]  ;;  %2159 = vmatpush.msra.mxu2 %v898_v46 }
 0x29c   : > { %v766_v49 = vld [vmem:[%s3128_s8 + $0x1030] sm:$0xff]  ;;  %2178 = vmatpush.msra.mxu3 %v966_v47 }
 0x29d   : > { %v834_v50 = vld [vmem:[%s3128_s8 + $0x1250] sm:$0xff]  ;;  %2120 = vmatpush.msra.mxu0 %v766_v49 }
 0x29e   : > { %v894_v52 = vld [vmem:[%s3128_s8 + $0x1430] sm:$0xff]  ;;  %2139 = vmatpush.msra.mxu1 %v834_v50 }
 0x29f   : > { %v962_v53 = vld [vmem:[%s3128_s8 + $0x1650] sm:$0xff]  ;;  %2160 = vmatpush.msra.mxu2 %v894_v52 }
 0x2a0   : > { %v762_v54 = vld [vmem:[%s3128_s8 + $0x1010] sm:$0xff]  ;;  %2179 = vmatpush.msra.mxu3 %v962_v53 }
 0x2a1   : > { %v830_v55 = vld [vmem:[%s3128_s8 + $0x1230] sm:$0xff]  ;;  %2121 = vmatpush.msra.mxu0 %v762_v54 }
 0x2a2   : > { %v890_v57 = vld [vmem:[%s3128_s8 + $0x1410] sm:$0xff]  ;;  %2140 = vmatpush.msra.mxu1 %v830_v55  ;;  %2122 = vmatmul.f32.vlgmr.msra.gmra.mxu0 %v3361_v12 }
 0x2a3   : > { %v958_v58 = vld [vmem:[%s3128_s8 + $0x1630] sm:$0xff]  ;;  %2161 = vmatpush.msra.mxu2 %v890_v57 }
 0x2a4   : > { %v1078_v61 = vld [vmem:[%s3128_s8 + $0x19f0] sm:$0xff]  ;;  %2180 = vmatpush.msra.mxu3 %v958_v58  ;;  %2162 = vmatmul.f32.vlgmr.msra.gmra.mxu2 %v3364_v13 }
 0x2a5   : > { %v1206_v62 = vld [vmem:[%s3128_s8 + $0x1df0] sm:$0xff]  ;;  %2186 = vmatpush.msrb.mxu0 %v1078_v61 }
 0x2a6   : > { %v826_v3 = vld [vmem:[%s3128_s8 + $0x1210] sm:$0xff]  ;;  %2226 = vmatpush.msrb.mxu2 %v1206_v62 }
 0x2a7   : > { %v954_v6 = vld [vmem:[%s3128_s8 + $0x1610] sm:$0xff]  ;;  %2141 = vmatpush.msra.mxu1 %v826_v3 }
 0x2a8   : > { %v1074_v8 = vld [vmem:[%s3128_s8 + $0x19d0] sm:$0xff]  ;;  %2181 = vmatpush.msra.mxu3 %v954_v6  ;;  %2142 = vmatmul.f32.vlgmr.msra.gmra.mxu1 %v3371_v20 }
 0x2a9   : > { %v1142_v9 = vld [vmem:[%s3128_s8 + $0x1bf0] sm:$0xff]  ;;  %2182 = vmatmul.f32.vlgmr.msra.gmra.mxu3 %v3374_v22  ;;  %2187 = vmatpush.msrb.mxu0 %v1074_v8  ;;  %v1883_v8 = vpop.f32.mrf.mxu0 }
 0x2aa   : > { %v1202_v10 = vld [vmem:[%s3128_s8 + $0x1dd0] sm:$0xff]  ;;  %2206 = vmatpush.msrb.mxu1 %v1142_v9 }
 0x2ab   : > { %v1270_v11 = vld [vmem:[%s3128_s8 + $0x1ff0] sm:$0xff]  ;;  %2227 = vmatpush.msrb.mxu2 %v1202_v10 }
 0x2ac   : > { %v1070_v14 = vld [vmem:[%s3128_s8 + $0x19b0] sm:$0xff]  ;;  %2246 = vmatpush.msrb.mxu3 %v1270_v11  ;;  %v1884_v11 = vadd.f32 %v1883_v8, %v3943_v7  ;;  %v287_v8 = vld [vmem:[%s3128_s8 + $0x138] sm:$0xff] }
 0x2ad   : > { %v1138_v16 = vld [vmem:[%s3128_s8 + $0x1bd0] sm:$0xff]  ;;  %2188 = vmatpush.msrb.mxu0 %v1070_v14 }
 0x2ae   : > { %v1198_v0 = vld [vmem:[%s3128_s8 + $0x1db0] sm:$0xff]  ;;  %2207 = vmatpush.msrb.mxu1 %v1138_v16 }
 0x2af   : > { %v1266_v17 = vld [vmem:[%s3128_s8 + $0x1fd0] sm:$0xff]  ;;  %2228 = vmatpush.msrb.mxu2 %v1198_v0 }
 0x2b0   : > { %v1066_v18 = vld [vmem:[%s3128_s8 + $0x1990] sm:$0xff]  ;;  %2247 = vmatpush.msrb.mxu3 %v1266_v17 }
 0x2b1   : > { %v1134_v23 = vld [vmem:[%s3128_s8 + $0x1bb0] sm:$0xff]  ;;  %2189 = vmatpush.msrb.mxu0 %v1066_v18  ;;  %v1903_v18 = vpop.f32.mrf.mxu1 }
 0x2b2   : > { %v1194_v24 = vld [vmem:[%s3128_s8 + $0x1d90] sm:$0xff]  ;;  %2208 = vmatpush.msrb.mxu1 %v1134_v23  ;;  %v1904_v7 = vadd.f32 %v1903_v18, %v1884_v11  ;;  %v483_v11 = vld [vmem:[%s3128_s8 + $0x758] sm:$0xff] }
 0x2b3   : > { %v1262_v26 = vld [vmem:[%s3128_s8 + $0x1fb0] sm:$0xff]  ;;  %2229 = vmatpush.msrb.mxu2 %v1194_v24  ;;  %v279_v18 = vld [vmem:[%s3128_s8 + $0xf8] sm:$0xff] }
 0x2b4   : > { %v1062_v27 = vld [vmem:[%s3128_s8 + $0x1970] sm:$0xff]  ;;  %2248 = vmatpush.msrb.mxu3 %v1262_v26 }
 0x2b5   : > { %v1130_v28 = vld [vmem:[%s3128_s8 + $0x1b90] sm:$0xff]  ;;  %2190 = vmatpush.msrb.mxu0 %v1062_v27 }
 0x2b6   : > { %v1190_v29 = vld [vmem:[%s3128_s8 + $0x1d70] sm:$0xff]  ;;  %2209 = vmatpush.msrb.mxu1 %v1130_v28 }
 0x2b7   : > { %v1258_v30 = vld [vmem:[%s3128_s8 + $0x1f90] sm:$0xff]  ;;  %2230 = vmatpush.msrb.mxu2 %v1190_v29 }
 0x2b8   : > { %v1058_v31 = vld [vmem:[%s3128_s8 + $0x1950] sm:$0xff]  ;;  %2249 = vmatpush.msrb.mxu3 %v1258_v30  ;;  %v1923_v30 = vpop.f32.mrf.mxu2 }
 0x2b9   : > { %v1126_v32 = vld [vmem:[%s3128_s8 + $0x1b70] sm:$0xff]  ;;  %2191 = vmatpush.msrb.mxu0 %v1058_v31 }
 0x2ba   : > { %v1186_v35 = vld [vmem:[%s3128_s8 + $0x1d50] sm:$0xff]  ;;  %2210 = vmatpush.msrb.mxu1 %v1126_v32 }
 0x2bb   : > { %v1254_v36 = vld [vmem:[%s3128_s8 + $0x1f70] sm:$0xff]  ;;  %2231 = vmatpush.msrb.mxu2 %v1186_v35  ;;  %v1924_v35 = vadd.f32 %v1923_v30, %v1904_v7  ;;  %v475_v7 = vld [vmem:[%s3128_s8 + $0x718] sm:$0xff] }
 0x2bc   : > { %v1054_v38 = vld [vmem:[%s3128_s8 + $0x1930] sm:$0xff]  ;;  %2250 = vmatpush.msrb.mxu3 %v1254_v36  ;;  %v311_v36 = vld [vmem:[%s3128_s8 + $0x1f8] sm:$0xff] }
 0x2bd   : > { %v1122_v41 = vld [vmem:[%s3128_s8 + $0x1b50] sm:$0xff]  ;;  %2192 = vmatpush.msrb.mxu0 %v1054_v38  ;;  %v439_v38 = vld [vmem:[%s3128_s8 + $0x5f8] sm:$0xff] }
 0x2be   : > { %v1182_v42 = vld [vmem:[%s3128_s8 + $0x1d30] sm:$0xff]  ;;  %2211 = vmatpush.msrb.mxu1 %v1122_v41  ;;  %v1943_v41 = vpop.f32.mrf.mxu3  ;;  %v271_v30 = vld [vmem:[%s3128_s8 + $0xb8] sm:$0xff] }
 0x2bf   : > { %v1250_v43 = vld [vmem:[%s3128_s8 + $0x1f50] sm:$0xff]  ;;  %2232 = vmatpush.msrb.mxu2 %v1182_v42 }
 0x2c0   : > { %v1050_v44 = vld [vmem:[%s3128_s8 + $0x1910] sm:$0xff]  ;;  %2251 = vmatpush.msrb.mxu3 %v1250_v43 }
 0x2c1   : > { %v1118_v4 = vld [vmem:[%s3128_s8 + $0x1b30] sm:$0xff]  ;;  %2193 = vmatpush.msrb.mxu0 %v1050_v44  ;;  %v1944_v44 = vadd.f32 %v1943_v41, %v1924_v35  ;;  %v467_v35 = vld [vmem:[%s3128_s8 + $0x6d8] sm:$0xff] }
 0x2c2   : > { %v1178_v45 = vld [vmem:[%s3128_s8 + $0x1d10] sm:$0xff]  ;;  %2212 = vmatpush.msrb.mxu1 %v1118_v4  ;;  %v307_v4 = vld [vmem:[%s3128_s8 + $0x1d8] sm:$0xff] }
 0x2c3   : > { %v1246_v46 = vld [vmem:[%s3128_s8 + $0x1f30] sm:$0xff]  ;;  %2233 = vmatpush.msrb.mxu2 %v1178_v45  ;;  %v375_v45 = vld [vmem:[%s3128_s8 + $0x3f8] sm:$0xff] }
 0x2c4   : > { %v1046_v47 = vld [vmem:[%s3128_s8 + $0x18f0] sm:$0xff]  ;;  %2252 = vmatpush.msrb.mxu3 %v1246_v46  ;;  %v2590_v46 = vrot.slane %v1944_v44, 7  ;;  %v395_v41 = vld [vmem:[%s3128_s8 + $0x498] sm:$0xff] }
 0x2c5   : > { %v1114_v48 = vld [vmem:[%s3128_s8 + $0x1b10] sm:$0xff]  ;;  %2194 = vmatpush.msrb.mxu0 %v1046_v47  ;;  %v435_v47 = vld [vmem:[%s3128_s8 + $0x5d8] sm:$0xff] }
 0x2c6   : > { %v1174_v49 = vld [vmem:[%s3128_s8 + $0x1cf0] sm:$0xff]  ;;  %2213 = vmatpush.msrb.mxu1 %v1114_v48  ;;  %v503_v48 = vld [vmem:[%s3128_s8 + $0x7f8] sm:$0xff] }
 0x2c7   : > { %v1242_v50 = vld [vmem:[%s3128_s8 + $0x1f10] sm:$0xff]  ;;  %2234 = vmatpush.msrb.mxu2 %v1174_v49  ;;  %v303_v49 = vld [vmem:[%s3128_s8 + $0x1b8] sm:$0xff] }
 0x2c8   : > { %v1042_v51 = vld [vmem:[%s3128_s8 + $0x18d0] sm:$0xff]  ;;  %2253 = vmatpush.msrb.mxu3 %v1242_v50  ;;  %v371_v50 = vld [vmem:[%s3128_s8 + $0x3d8] sm:$0xff] }
 0x2c9   : > { %v1110_v52 = vld [vmem:[%s3128_s8 + $0x1af0] sm:$0xff]  ;;  %2195 = vmatpush.msrb.mxu0 %v1042_v51  ;;  %v4025_v51 = vsel %vm2593_vm0, %v3734_v37, %v2590_v46  ;;  %v295_v37 = vld [vmem:[%s3128_s8 + $0x178] sm:$0xff] }
 0x2ca   : > { %v1170_v53 = vld [vmem:[%s3128_s8 + $0x1cd0] sm:$0xff]  ;;  %2214 = vmatpush.msrb.mxu1 %v1110_v52  ;;  %v431_v52 = vld [vmem:[%s3128_s8 + $0x5b8] sm:$0xff] }
 0x2cb   : > { %v1238_v54 = vld [vmem:[%s3128_s8 + $0x1ef0] sm:$0xff]  ;;  %2235 = vmatpush.msrb.mxu2 %v1170_v53  ;;  %v499_v53 = vld [vmem:[%s3128_s8 + $0x7d8] sm:$0xff] }
 0x2cc   : > { %v1038_v55 = vld [vmem:[%s3128_s8 + $0x18b0] sm:$0xff]  ;;  %2254 = vmatpush.msrb.mxu3 %v1238_v54  ;;  %v299_v54 = vld [vmem:[%s3128_s8 + $0x198] sm:$0xff] }
 0x2cd   : > { %v1106_v56 = vld [vmem:[%s3128_s8 + $0x1ad0] sm:$0xff]  ;;  %2196 = vmatpush.msrb.mxu0 %v1038_v55  ;;  %v367_v55 = vld [vmem:[%s3128_s8 + $0x3b8] sm:$0xff] }
 0x2ce   : > { %v1166_v57 = vld [vmem:[%s3128_s8 + $0x1cb0] sm:$0xff]  ;;  %2215 = vmatpush.msrb.mxu1 %v1106_v56  ;;  %v427_v56 = vld [vmem:[%s3128_s8 + $0x598] sm:$0xff] }
 0x2cf   : > { %v1234_v58 = vld [vmem:[%s3128_s8 + $0x1ed0] sm:$0xff]  ;;  %2236 = vmatpush.msrb.mxu2 %v1166_v57  ;;  %v495_v57 = vld [vmem:[%s3128_s8 + $0x7b8] sm:$0xff] }
 0x2d0   : > { %v1034_v60 = vld [vmem:[%s3128_s8 + $0x1890] sm:$0xff]  ;;  %2255 = vmatpush.msrb.mxu3 %v1234_v58  ;;  %v363_v58 = vld [vmem:[%s3128_s8 + $0x398] sm:$0xff] }
 0x2d1   : > { %v1102_v61 = vld [vmem:[%s3128_s8 + $0x1ab0] sm:$0xff]  ;;  %2197 = vmatpush.msrb.mxu0 %v1034_v60  ;;  %v423_v60 = vld [vmem:[%s3128_s8 + $0x578] sm:$0xff] }
 0x2d2   : > { %v1162_v62 = vld [vmem:[%s3128_s8 + $0x1c90] sm:$0xff]  ;;  %2216 = vmatpush.msrb.mxu1 %v1102_v61  ;;  %v491_v61 = vld [vmem:[%s3128_s8 + $0x798] sm:$0xff] }
 0x2d3   : > { %v1230_v2 = vld [vmem:[%s3128_s8 + $0x1eb0] sm:$0xff]  ;;  %2237 = vmatpush.msrb.mxu2 %v1162_v62  ;;  %v291_v62 = vld [vmem:[%s3128_s8 + $0x158] sm:$0xff] }
 0x2d4   : > { %v1030_v3 = vld [vmem:[%s3128_s8 + $0x1870] sm:$0xff]  ;;  %2256 = vmatpush.msrb.mxu3 %v1230_v2  ;;  %v359_v2 = vld [vmem:[%s3128_s8 + $0x378] sm:$0xff] }
 0x2d5   : > { %v1098_v6 = vld [vmem:[%s3128_s8 + $0x1a90] sm:$0xff]  ;;  %2198 = vmatpush.msrb.mxu0 %v1030_v3  ;;  %v419_v3 = vld [vmem:[%s3128_s8 + $0x558] sm:$0xff] }
 0x2d6   : > { %v1158_v9 = vld [vmem:[%s3128_s8 + $0x1c70] sm:$0xff]  ;;  %2217 = vmatpush.msrb.mxu1 %v1098_v6  ;;  %v487_v6 = vld [vmem:[%s3128_s8 + $0x778] sm:$0xff] }
 0x2d7   : > { %v1226_v10 = vld [vmem:[%s3128_s8 + $0x1e90] sm:$0xff]  ;;  %2238 = vmatpush.msrb.mxu2 %v1158_v9  ;;  %v355_v9 = vld [vmem:[%s3128_s8 + $0x358] sm:$0xff] }
 0x2d8   : > { %v1026_v14 = vld [vmem:[%s3128_s8 + $0x1850] sm:$0xff]  ;;  %2257 = vmatpush.msrb.mxu3 %v1226_v10  ;;  %v415_v10 = vld [vmem:[%s3128_s8 + $0x538] sm:$0xff] }
 0x2d9   : > { %v1094_v16 = vld [vmem:[%s3128_s8 + $0x1a70] sm:$0xff]  ;;  %2199 = vmatpush.msrb.mxu0 %v1026_v14  ;;  %v283_v14 = vld [vmem:[%s3128_s8 + $0x118] sm:$0xff] }
 0x2da   : > { %v1154_v0 = vld [vmem:[%s3128_s8 + $0x1c50] sm:$0xff]  ;;  %2218 = vmatpush.msrb.mxu1 %v1094_v16  ;;  %v351_v16 = vld [vmem:[%s3128_s8 + $0x338] sm:$0xff] }
 0x2db   : > { %v1222_v17 = vld [vmem:[%s3128_s8 + $0x1e70] sm:$0xff]  ;;  %2239 = vmatpush.msrb.mxu2 %v1154_v0  ;;  %v411_v0 = vld [vmem:[%s3128_s8 + $0x518] sm:$0xff] }
 0x2dc   : > { %v1022_v23 = vld [vmem:[%s3128_s8 + $0x1830] sm:$0xff]  ;;  %2258 = vmatpush.msrb.mxu3 %v1222_v17  ;;  %v479_v17 = vld [vmem:[%s3128_s8 + $0x738] sm:$0xff] }
 0x2dd   : > { %v1090_v24 = vld [vmem:[%s3128_s8 + $0x1a50] sm:$0xff]  ;;  %2200 = vmatpush.msrb.mxu0 %v1022_v23  ;;  %v347_v23 = vld [vmem:[%s3128_s8 + $0x318] sm:$0xff] }
 0x2de   : > { %v1150_v26 = vld [vmem:[%s3128_s8 + $0x1c30] sm:$0xff]  ;;  %2219 = vmatpush.msrb.mxu1 %v1090_v24  ;;  %v407_v24 = vld [vmem:[%s3128_s8 + $0x4f8] sm:$0xff] }
 0x2df   : > { %v1218_v27 = vld [vmem:[%s3128_s8 + $0x1e50] sm:$0xff]  ;;  %2240 = vmatpush.msrb.mxu2 %v1150_v26  ;;  %v275_v26 = vld [vmem:[%s3128_s8 + $0xd8] sm:$0xff] }
 0x2e0   : > { %v1018_v28 = vld [vmem:[%s3128_s8 + $0x1810] sm:$0xff]  ;;  %2259 = vmatpush.msrb.mxu3 %v1218_v27  ;;  %v343_v27 = vld [vmem:[%s3128_s8 + $0x2f8] sm:$0xff] }
 0x2e1   : > { %v1086_v29 = vld [vmem:[%s3128_s8 + $0x1a30] sm:$0xff]  ;;  %2201 = vmatpush.msrb.mxu0 %v1018_v28  ;;  %v403_v28 = vld [vmem:[%s3128_s8 + $0x4d8] sm:$0xff] }
 0x2e2   : > { %v1146_v31 = vld [vmem:[%s3128_s8 + $0x1c10] sm:$0xff]  ;;  %2220 = vmatpush.msrb.mxu1 %v1086_v29  ;;  %2202 = vmatmul.f32.vlgmr.msrb.gmra.mxu0 %v3441_v33  ;;  %v471_v29 = vld [vmem:[%s3128_s8 + $0x6f8] sm:$0xff] }
 0x2e3   : > { %v1214_v32 = vld [vmem:[%s3128_s8 + $0x1e30] sm:$0xff]  ;;  %2241 = vmatpush.msrb.mxu2 %v1146_v31  ;;  %2266 = vmatpush.msra.mxu0 %v311_v36  ;;  %v339_v31 = vld [vmem:[%s3128_s8 + $0x2d8] sm:$0xff] }
 0x2e4   : > { %2260 = vmatpush.msrb.mxu3 %v1214_v32  ;;  %v1082_v42 = vld [vmem:[%s3128_s8 + $0x1a10] sm:$0xff]  ;;  %2242 = vmatmul.f32.vlgmr.msrb.gmra.mxu2 %v3444_v34  ;;  %v399_v32 = vld [vmem:[%s3128_s8 + $0x4b8] sm:$0xff] }
 0x2e5   : > { %v1210_v43 = vld [vmem:[%s3128_s8 + $0x1e10] sm:$0xff]  ;;  %2306 = vmatpush.msra.mxu2 %v439_v38  ;;  %2221 = vmatpush.msrb.mxu1 %v1082_v42  ;;  %v267_v36 = vld [vmem:[%s3128_s8 + $0x98] sm:$0xff] }
 0x2e6   : > { %2261 = vmatpush.msrb.mxu3 %v1210_v43  ;;  %2222 = vmatmul.f32.vlgmr.msrb.gmra.mxu1 %v3451_v39  ;;  %v335_v38 = vld [vmem:[%s3128_s8 + $0x2b8] sm:$0xff] }
 0x2e7   : > { %2262 = vmatmul.f32.vlgmr.msrb.gmra.mxu3 %v3454_v40  ;;  %2267 = vmatpush.msra.mxu0 %v307_v4  ;;  %v463_v42 = vld [vmem:[%s3128_s8 + $0x6b8] sm:$0xff] }
 0x2e8   : > { %2286 = vmatpush.msra.mxu1 %v375_v45  ;;  %2307 = vmatpush.msra.mxu2 %v435_v47  ;;  %v263_v43 = vld [vmem:[%s3128_s8 + $0x78] sm:$0xff] }
 0x2e9   : > { %2326 = vmatpush.msra.mxu3 %v503_v48  ;;  %2268 = vmatpush.msra.mxu0 %v303_v49  ;;  %v331_v44 = vld [vmem:[%s3128_s8 + $0x298] sm:$0xff] }
 0x2ea   : > { %2287 = vmatpush.msra.mxu1 %v371_v50  ;;  %2308 = vmatpush.msra.mxu2 %v431_v52  ;;  %v391_v4 = vld [vmem:[%s3128_s8 + $0x478] sm:$0xff] }
 0x2eb   : > { %2327 = vmatpush.msra.mxu3 %v499_v53  ;;  %2269 = vmatpush.msra.mxu0 %v299_v54  ;;  %v459_v45 = vld [vmem:[%s3128_s8 + $0x698] sm:$0xff] }
 0x2ec   : > { %2288 = vmatpush.msra.mxu1 %v367_v55  ;;  %2309 = vmatpush.msra.mxu2 %v427_v56  ;;  %v259_v46 = vld [vmem:[%s3128_s8 + $0x58] sm:$0xff] }
 0x2ed   : > { %2328 = vmatpush.msra.mxu3 %v495_v57  ;;  %2270 = vmatpush.msra.mxu0 %v295_v37  ;;  %v327_v47 = vld [vmem:[%s3128_s8 + $0x278] sm:$0xff] }
 0x2ee   : > { %2289 = vmatpush.msra.mxu1 %v363_v58  ;;  %2310 = vmatpush.msra.mxu2 %v423_v60  ;;  %v387_v48 = vld [vmem:[%s3128_s8 + $0x458] sm:$0xff] }
 0x2ef   : > { %2329 = vmatpush.msra.mxu3 %v491_v61  ;;  %2271 = vmatpush.msra.mxu0 %v291_v62  ;;  %v455_v49 = vld [vmem:[%s3128_s8 + $0x678] sm:$0xff] }
 0x2f0   : > { %2290 = vmatpush.msra.mxu1 %v359_v2  ;;  %2311 = vmatpush.msra.mxu2 %v419_v3  ;;  %v255_v50 = vld [vmem:[%s3128_s8 + $0x38] sm:$0xff] }
 0x2f1   : > { %2330 = vmatpush.msra.mxu3 %v487_v6  ;;  %2272 = vmatpush.msra.mxu0 %v287_v8  ;;  %v323_v52 = vld [vmem:[%s3128_s8 + $0x258] sm:$0xff] }
 0x2f2   : > { %2291 = vmatpush.msra.mxu1 %v355_v9  ;;  %2312 = vmatpush.msra.mxu2 %v415_v10  ;;  %v383_v53 = vld [vmem:[%s3128_s8 + $0x438] sm:$0xff] }
 0x2f3   : > { %2331 = vmatpush.msra.mxu3 %v483_v11  ;;  %2273 = vmatpush.msra.mxu0 %v283_v14  ;;  %v451_v54 = vld [vmem:[%s3128_s8 + $0x658] sm:$0xff] }
 0x2f4   : > { %2292 = vmatpush.msra.mxu1 %v351_v16  ;;  %2313 = vmatpush.msra.mxu2 %v411_v0  ;;  %v251_v55 = vld [vmem:[%s3128_s8 + $0x18] sm:$0xff] }
 0x2f5   : > { %2332 = vmatpush.msra.mxu3 %v479_v17  ;;  %2274 = vmatpush.msra.mxu0 %v279_v18  ;;  %v319_v56 = vld [vmem:[%s3128_s8 + $0x238] sm:$0xff] }
 0x2f6   : > { %2293 = vmatpush.msra.mxu1 %v347_v23  ;;  %2314 = vmatpush.msra.mxu2 %v407_v24  ;;  %v379_v57 = vld [vmem:[%s3128_s8 + $0x418] sm:$0xff] }
 0x2f7   : > { %2333 = vmatpush.msra.mxu3 %v475_v7  ;;  %2275 = vmatpush.msra.mxu0 %v275_v26  ;;  %v447_v37 = vld [vmem:[%s3128_s8 + $0x638] sm:$0xff] }
 0x2f8   : > { %2294 = vmatpush.msra.mxu1 %v343_v27  ;;  %2315 = vmatpush.msra.mxu2 %v403_v28  ;;  %v567_v58 = vld [vmem:[%s3128_s8 + $0x9f8] sm:$0xff] }
 0x2f9   : > { %2334 = vmatpush.msra.mxu3 %v471_v29  ;;  %2276 = vmatpush.msra.mxu0 %v271_v30  ;;  %v695_v60 = vld [vmem:[%s3128_s8 + $0xdf8] sm:$0xff] }
 0x2fa   : > { %2295 = vmatpush.msra.mxu1 %v339_v31  ;;  %2316 = vmatpush.msra.mxu2 %v399_v32  ;;  %v315_v61 = vld [vmem:[%s3128_s8 + $0x218] sm:$0xff] }
 0x2fb   : > { %2335 = vmatpush.msra.mxu3 %v467_v35  ;;  %2277 = vmatpush.msra.mxu0 %v267_v36  ;;  %v443_v62 = vld [vmem:[%s3128_s8 + $0x618] sm:$0xff] }
 0x2fc   : > { %2296 = vmatpush.msra.mxu1 %v335_v38  ;;  %2317 = vmatpush.msra.mxu2 %v395_v41  ;;  %v563_v2 = vld [vmem:[%s3128_s8 + $0x9d8] sm:$0xff] }
 0x2fd   : > { %2336 = vmatpush.msra.mxu3 %v463_v42  ;;  %2278 = vmatpush.msra.mxu0 %v263_v43  ;;  %v631_v3 = vld [vmem:[%s3128_s8 + $0xbf8] sm:$0xff] }
 0x2fe   : > { %2297 = vmatpush.msra.mxu1 %v331_v44  ;;  %2318 = vmatpush.msra.mxu2 %v391_v4  ;;  %v691_v6 = vld [vmem:[%s3128_s8 + $0xdd8] sm:$0xff] }
 0x2ff   : > { %2337 = vmatpush.msra.mxu3 %v459_v45  ;;  %2279 = vmatpush.msra.mxu0 %v259_v46  ;;  %v759_v8 = vld [vmem:[%s3128_s8 + $0xff8] sm:$0xff] }
 0x300   : > { %2298 = vmatpush.msra.mxu1 %v327_v47  ;;  %2319 = vmatpush.msra.mxu2 %v387_v48  ;;  %v559_v9 = vld [vmem:[%s3128_s8 + $0x9b8] sm:$0xff] }
 0x301   : > { %2338 = vmatpush.msra.mxu3 %v455_v49  ;;  %2280 = vmatpush.msra.mxu0 %v255_v50  ;;  %v627_v10 = vld [vmem:[%s3128_s8 + $0xbd8] sm:$0xff] }
 0x302   : > { %2299 = vmatpush.msra.mxu1 %v323_v52  ;;  %2320 = vmatpush.msra.mxu2 %v383_v53  ;;  %v687_v11 = vld [vmem:[%s3128_s8 + $0xdb8] sm:$0xff] }
 0x303   : > { %2339 = vmatpush.msra.mxu3 %v451_v54  ;;  %2281 = vmatpush.msra.mxu0 %v251_v55  ;;  %v755_v14 = vld [vmem:[%s3128_s8 + $0xfd8] sm:$0xff] }
 0x304   : > { %2300 = vmatpush.msra.mxu1 %v319_v56  ;;  %2321 = vmatpush.msra.mxu2 %v379_v57  ;;  %v555_v16 = vld [vmem:[%s3128_s8 + $0x998] sm:$0xff] }
 0x305   : > { %2340 = vmatpush.msra.mxu3 %v447_v37  ;;  %2346 = vmatpush.msrb.mxu0 %v567_v58  ;;  %v623_v0 = vld [vmem:[%s3128_s8 + $0xbb8] sm:$0xff] }
 0x306   : > { %2386 = vmatpush.msrb.mxu2 %v695_v60  ;;  %2301 = vmatpush.msra.mxu1 %v315_v61  ;;  %v683_v17 = vld [vmem:[%s3128_s8 + $0xd98] sm:$0xff] }
 0x307   : > { %2341 = vmatpush.msra.mxu3 %v443_v62  ;;  %2347 = vmatpush.msrb.mxu0 %v563_v2  ;;  %v751_v18 = vld [vmem:[%s3128_s8 + $0xfb8] sm:$0xff] }
 0x308   : > { %2366 = vmatpush.msrb.mxu1 %v631_v3  ;;  %2387 = vmatpush.msrb.mxu2 %v691_v6  ;;  %v551_v23 = vld [vmem:[%s3128_s8 + $0x978] sm:$0xff] }
 0x309   : > { %2406 = vmatpush.msrb.mxu3 %v759_v8  ;;  %2348 = vmatpush.msrb.mxu0 %v559_v9  ;;  %v619_v24 = vld [vmem:[%s3128_s8 + $0xb98] sm:$0xff] }
 0x30a   : > { %2367 = vmatpush.msrb.mxu1 %v627_v10  ;;  %2388 = vmatpush.msrb.mxu2 %v687_v11  ;;  %v679_v7 = vld [vmem:[%s3128_s8 + $0xd78] sm:$0xff] }
 0x30b   : > { %2407 = vmatpush.msrb.mxu3 %v755_v14  ;;  %2349 = vmatpush.msrb.mxu0 %v555_v16  ;;  %v747_v26 = vld [vmem:[%s3128_s8 + $0xf98] sm:$0xff] }
 0x30c   : > { %2368 = vmatpush.msrb.mxu1 %v623_v0  ;;  %2389 = vmatpush.msrb.mxu2 %v683_v17  ;;  %v547_v27 = vld [vmem:[%s3128_s8 + $0x958] sm:$0xff] }
 0x30d   : > { %2408 = vmatpush.msrb.mxu3 %v751_v18  ;;  %v615_v28 = vld [vmem:[%s3128_s8 + $0xb78] sm:$0xff]  ;;  %2350 = vmatpush.msrb.mxu0 %v551_v23 }
 0x30e   : > { %2369 = vmatpush.msrb.mxu1 %v619_v24  ;;  %v675_v29 = vld [vmem:[%s3128_s8 + $0xd58] sm:$0xff]  ;;  %2390 = vmatpush.msrb.mxu2 %v679_v7 }
 0x30f   : > { %v743_v30 = vld [vmem:[%s3128_s8 + $0xf78] sm:$0xff]  ;;  %2409 = vmatpush.msrb.mxu3 %v747_v26  ;;  %2351 = vmatpush.msrb.mxu0 %v547_v27 }
 0x310   : > { %v543_v31 = vld [vmem:[%s3128_s8 + $0x938] sm:$0xff]  ;;  %2370 = vmatpush.msrb.mxu1 %v615_v28  ;;  %2391 = vmatpush.msrb.mxu2 %v675_v29 }
 0x311   : > { %v611_v32 = vld [vmem:[%s3128_s8 + $0xb58] sm:$0xff]  ;;  %2410 = vmatpush.msrb.mxu3 %v743_v30  ;;  %2352 = vmatpush.msrb.mxu0 %v543_v31 }
 0x312   : > { %v671_v35 = vld [vmem:[%s3128_s8 + $0xd38] sm:$0xff]  ;;  %2371 = vmatpush.msrb.mxu1 %v611_v32  ;;  %2322 = vmatmul.f32.vlgmr.msra.gmra.mxu2 %v3259_v59 }
 0x313   : > { %v739_v36 = vld [vmem:[%s3128_s8 + $0xf58] sm:$0xff]  ;;  %2392 = vmatpush.msrb.mxu2 %v671_v35  ;;  %2282 = vmatmul.f32.vlgmr.msra.gmra.mxu0 %v3265_v63 }
 0x314   : > { %v539_v38 = vld [vmem:[%s3128_s8 + $0x918] sm:$0xff]  ;;  %2411 = vmatpush.msrb.mxu3 %v739_v36  ;;  %2302 = vmatmul.f32.vlgmr.msra.gmra.mxu1 %v3276_v5 }
 0x315   : > { %v607_v41 = vld [vmem:[%s3128_s8 + $0xb38] sm:$0xff]  ;;  %2353 = vmatpush.msrb.mxu0 %v539_v38  ;;  %2342 = vmatmul.f32.vlgmr.msra.gmra.mxu3 %v3269_v1 }
 0x316   : > { %v667_v42 = vld [vmem:[%s3128_s8 + $0xd18] sm:$0xff]  ;;  %2372 = vmatpush.msrb.mxu1 %v607_v41 }
 0x317   : > { %v735_v43 = vld [vmem:[%s3128_s8 + $0xf38] sm:$0xff]  ;;  %2393 = vmatpush.msrb.mxu2 %v667_v42 }
 0x318   : > { %v535_v44 = vld [vmem:[%s3128_s8 + $0x8f8] sm:$0xff]  ;;  %2412 = vmatpush.msrb.mxu3 %v735_v43 }
 0x319   : > { %v603_v4 = vld [vmem:[%s3128_s8 + $0xb18] sm:$0xff]  ;;  %2354 = vmatpush.msrb.mxu0 %v535_v44 }
 0x31a   : > { %v663_v45 = vld [vmem:[%s3128_s8 + $0xcf8] sm:$0xff]  ;;  %2373 = vmatpush.msrb.mxu1 %v603_v4 }
 0x31b   : > { %v731_v46 = vld [vmem:[%s3128_s8 + $0xf18] sm:$0xff]  ;;  %2394 = vmatpush.msrb.mxu2 %v663_v45 }
 0x31c   : > { %v531_v47 = vld [vmem:[%s3128_s8 + $0x8d8] sm:$0xff]  ;;  %2413 = vmatpush.msrb.mxu3 %v731_v46 }
 0x31d   : > { %v599_v48 = vld [vmem:[%s3128_s8 + $0xaf8] sm:$0xff]  ;;  %2355 = vmatpush.msrb.mxu0 %v531_v47 }
 0x31e   : > { %v659_v49 = vld [vmem:[%s3128_s8 + $0xcd8] sm:$0xff]  ;;  %2374 = vmatpush.msrb.mxu1 %v599_v48 }
 0x31f   : > { %v727_v50 = vld [vmem:[%s3128_s8 + $0xef8] sm:$0xff]  ;;  %2395 = vmatpush.msrb.mxu2 %v659_v49 }
 0x320   : > { %v527_v52 = vld [vmem:[%s3128_s8 + $0x8b8] sm:$0xff]  ;;  %2414 = vmatpush.msrb.mxu3 %v727_v50 }
 0x321   : > { %v595_v53 = vld [vmem:[%s3128_s8 + $0xad8] sm:$0xff]  ;;  %2356 = vmatpush.msrb.mxu0 %v527_v52 }
 0x322   : > { %v655_v54 = vld [vmem:[%s3128_s8 + $0xcb8] sm:$0xff]  ;;  %2375 = vmatpush.msrb.mxu1 %v595_v53 }
 0x323   : > { %v723_v55 = vld [vmem:[%s3128_s8 + $0xed8] sm:$0xff]  ;;  %2396 = vmatpush.msrb.mxu2 %v655_v54 }
 0x324   : > { %v523_v56 = vld [vmem:[%s3128_s8 + $0x898] sm:$0xff]  ;;  %2415 = vmatpush.msrb.mxu3 %v723_v55 }
 0x325   : > { %v591_v57 = vld [vmem:[%s3128_s8 + $0xab8] sm:$0xff]  ;;  %2357 = vmatpush.msrb.mxu0 %v523_v56 }
 0x326   : > { %v651_v37 = vld [vmem:[%s3128_s8 + $0xc98] sm:$0xff]  ;;  %2376 = vmatpush.msrb.mxu1 %v591_v57 }
 0x327   : > { %v719_v58 = vld [vmem:[%s3128_s8 + $0xeb8] sm:$0xff]  ;;  %2397 = vmatpush.msrb.mxu2 %v651_v37 }
 0x328   : > { %v519_v60 = vld [vmem:[%s3128_s8 + $0x878] sm:$0xff]  ;;  %2416 = vmatpush.msrb.mxu3 %v719_v58 }
 0x329   : > { %v587_v61 = vld [vmem:[%s3128_s8 + $0xa98] sm:$0xff]  ;;  %2358 = vmatpush.msrb.mxu0 %v519_v60 }
 0x32a   : > { %v647_v62 = vld [vmem:[%s3128_s8 + $0xc78] sm:$0xff]  ;;  %2377 = vmatpush.msrb.mxu1 %v587_v61 }
 0x32b   : > { %v715_v2 = vld [vmem:[%s3128_s8 + $0xe98] sm:$0xff]  ;;  %2398 = vmatpush.msrb.mxu2 %v647_v62 }
 0x32c   : > { %v515_v3 = vld [vmem:[%s3128_s8 + $0x858] sm:$0xff]  ;;  %2417 = vmatpush.msrb.mxu3 %v715_v2 }
 0x32d   : > { %v583_v6 = vld [vmem:[%s3128_s8 + $0xa78] sm:$0xff]  ;;  %2359 = vmatpush.msrb.mxu0 %v515_v3 }
 0x32e   : > { %v643_v8 = vld [vmem:[%s3128_s8 + $0xc58] sm:$0xff]  ;;  %2378 = vmatpush.msrb.mxu1 %v583_v6 }
 0x32f   : > { %v711_v9 = vld [vmem:[%s3128_s8 + $0xe78] sm:$0xff]  ;;  %2399 = vmatpush.msrb.mxu2 %v643_v8 }
 0x330   : > { %v511_v10 = vld [vmem:[%s3128_s8 + $0x838] sm:$0xff]  ;;  %2418 = vmatpush.msrb.mxu3 %v711_v9 }
 0x331   : > { %v579_v11 = vld [vmem:[%s3128_s8 + $0xa58] sm:$0xff]  ;;  %2360 = vmatpush.msrb.mxu0 %v511_v10 }
 0x332   : > { %v639_v14 = vld [vmem:[%s3128_s8 + $0xc38] sm:$0xff]  ;;  %2379 = vmatpush.msrb.mxu1 %v579_v11 }
 0x333   : > { %v707_v16 = vld [vmem:[%s3128_s8 + $0xe58] sm:$0xff]  ;;  %2400 = vmatpush.msrb.mxu2 %v639_v14 }
 0x334   : > { %v507_v0 = vld [vmem:[%s3128_s8 + $0x818] sm:$0xff]  ;;  %2419 = vmatpush.msrb.mxu3 %v707_v16 }
 0x335   : > { %v575_v17 = vld [vmem:[%s3128_s8 + $0xa38] sm:$0xff]  ;;  %2361 = vmatpush.msrb.mxu0 %v507_v0 }
 0x336   : > { %v635_v18 = vld [vmem:[%s3128_s8 + $0xc18] sm:$0xff]  ;;  %2380 = vmatpush.msrb.mxu1 %v575_v17  ;;  %2362 = vmatmul.f32.vlgmr.msrb.gmra.mxu0 %v3297_v19 }
 0x337   : > { %v703_v23 = vld [vmem:[%s3128_s8 + $0xe38] sm:$0xff]  ;;  %2401 = vmatpush.msrb.mxu2 %v635_v18 }
 0x338   : > { %v823_v24 = vld [vmem:[%s3128_s8 + $0x11f8] sm:$0xff]  ;;  %2420 = vmatpush.msrb.mxu3 %v703_v23  ;;  %2402 = vmatmul.f32.vlgmr.msrb.gmra.mxu2 %v3291_v15 }
 0x339   : > { %v951_v7 = vld [vmem:[%s3128_s8 + $0x15f8] sm:$0xff]  ;;  %2426 = vmatpush.msra.mxu0 %v823_v24 }
 0x33a   : > { %v571_v26 = vld [vmem:[%s3128_s8 + $0xa18] sm:$0xff]  ;;  %2466 = vmatpush.msra.mxu2 %v951_v7 }
 0x33b   : > { %v699_v27 = vld [vmem:[%s3128_s8 + $0xe18] sm:$0xff]  ;;  %2381 = vmatpush.msrb.mxu1 %v571_v26 }
 0x33c   : > { %v819_v59 = vld [vmem:[%s3128_s8 + $0x11d8] sm:$0xff]  ;;  %2421 = vmatpush.msrb.mxu3 %v699_v27  ;;  %2382 = vmatmul.f32.vlgmr.msrb.gmra.mxu1 %v3308_v25 }
 0x33d   : > { %v887_v28 = vld [vmem:[%s3128_s8 + $0x13f8] sm:$0xff]  ;;  %2427 = vmatpush.msra.mxu0 %v819_v59  ;;  %2422 = vmatmul.f32.vlgmr.msrb.gmra.mxu3 %v3301_v21 }
 0x33e   : > { %v947_v29 = vld [vmem:[%s3128_s8 + $0x15d8] sm:$0xff]  ;;  %2446 = vmatpush.msra.mxu1 %v887_v28 }
 0x33f   : > { %v1015_v30 = vld [vmem:[%s3128_s8 + $0x17f8] sm:$0xff]  ;;  %2467 = vmatpush.msra.mxu2 %v947_v29 }
 0x340   : > { %v815_v63 = vld [vmem:[%s3128_s8 + $0x11b8] sm:$0xff]  ;;  %2486 = vmatpush.msra.mxu3 %v1015_v30 }
 0x341   : > { %v883_v31 = vld [vmem:[%s3128_s8 + $0x13d8] sm:$0xff]  ;;  %2428 = vmatpush.msra.mxu0 %v815_v63 }
 0x342   : > { %v943_v1 = vld [vmem:[%s3128_s8 + $0x15b8] sm:$0xff]  ;;  %2447 = vmatpush.msra.mxu1 %v883_v31 }
 0x343   : > { %v1011_v32 = vld [vmem:[%s3128_s8 + $0x17d8] sm:$0xff]  ;;  %2468 = vmatpush.msra.mxu2 %v943_v1 }
 0x344   : > { %v811_v35 = vld [vmem:[%s3128_s8 + $0x1198] sm:$0xff]  ;;  %2487 = vmatpush.msra.mxu3 %v1011_v32 }
 0x345   : > { %v879_v36 = vld [vmem:[%s3128_s8 + $0x13b8] sm:$0xff]  ;;  %2429 = vmatpush.msra.mxu0 %v811_v35 }
 0x346   : > { %v939_v38 = vld [vmem:[%s3128_s8 + $0x1598] sm:$0xff]  ;;  %2448 = vmatpush.msra.mxu1 %v879_v36 }
 0x347   : > { %v1007_v5 = vld [vmem:[%s3128_s8 + $0x17b8] sm:$0xff]  ;;  %2469 = vmatpush.msra.mxu2 %v939_v38 }
 0x348   : > { %v807_v41 = vld [vmem:[%s3128_s8 + $0x1178] sm:$0xff]  ;;  %2488 = vmatpush.msra.mxu3 %v1007_v5 }
 0x349   : > { %v875_v42 = vld [vmem:[%s3128_s8 + $0x1398] sm:$0xff]  ;;  %2430 = vmatpush.msra.mxu0 %v807_v41 }
 0x34a   : > { %v935_v43 = vld [vmem:[%s3128_s8 + $0x1578] sm:$0xff]  ;;  %2449 = vmatpush.msra.mxu1 %v875_v42 }
 0x34b   : > { %v1003_v44 = vld [vmem:[%s3128_s8 + $0x1798] sm:$0xff]  ;;  %2470 = vmatpush.msra.mxu2 %v935_v43 }
 0x34c   : > { %v803_v15 = vld [vmem:[%s3128_s8 + $0x1158] sm:$0xff]  ;;  %2489 = vmatpush.msra.mxu3 %v1003_v44 }
 0x34d   : > { %v871_v4 = vld [vmem:[%s3128_s8 + $0x1378] sm:$0xff]  ;;  %2431 = vmatpush.msra.mxu0 %v803_v15 }
 0x34e   : > { %v931_v45 = vld [vmem:[%s3128_s8 + $0x1558] sm:$0xff]  ;;  %2450 = vmatpush.msra.mxu1 %v871_v4 }
 0x34f   : > { %v999_v46 = vld [vmem:[%s3128_s8 + $0x1778] sm:$0xff]  ;;  %2471 = vmatpush.msra.mxu2 %v931_v45 }
 0x350   : > { %v799_v19 = vld [vmem:[%s3128_s8 + $0x1138] sm:$0xff]  ;;  %2490 = vmatpush.msra.mxu3 %v999_v46 }
 0x351   : > { %v867_v47 = vld [vmem:[%s3128_s8 + $0x1358] sm:$0xff]  ;;  %2432 = vmatpush.msra.mxu0 %v799_v19 }
 0x352   : > { %v927_v21 = vld [vmem:[%s3128_s8 + $0x1538] sm:$0xff]  ;;  %2451 = vmatpush.msra.mxu1 %v867_v47 }
 0x353   : > { %v995_v48 = vld [vmem:[%s3128_s8 + $0x1758] sm:$0xff]  ;;  %2472 = vmatpush.msra.mxu2 %v927_v21 }
 0x354   : > { %v795_v49 = vld [vmem:[%s3128_s8 + $0x1118] sm:$0xff]  ;;  %2491 = vmatpush.msra.mxu3 %v995_v48 }
 0x355   : > { %v863_v50 = vld [vmem:[%s3128_s8 + $0x1338] sm:$0xff]  ;;  %2433 = vmatpush.msra.mxu0 %v795_v49 }
 0x356   : > { %v923_v52 = vld [vmem:[%s3128_s8 + $0x1518] sm:$0xff]  ;;  %2452 = vmatpush.msra.mxu1 %v863_v50 }
 0x357   : > { %v991_v25 = vld [vmem:[%s3128_s8 + $0x1738] sm:$0xff]  ;;  %2473 = vmatpush.msra.mxu2 %v923_v52 }
 0x358   : > { %v791_v53 = vld [vmem:[%s3128_s8 + $0x10f8] sm:$0xff]  ;;  %2492 = vmatpush.msra.mxu3 %v991_v25 }
 0x359   : > { %v859_v54 = vld [vmem:[%s3128_s8 + $0x1318] sm:$0xff]  ;;  %2434 = vmatpush.msra.mxu0 %v791_v53 }
 0x35a   : > { %v919_v55 = vld [vmem:[%s3128_s8 + $0x14f8] sm:$0xff]  ;;  %2453 = vmatpush.msra.mxu1 %v859_v54 }
 0x35b   : > { %v987_v56 = vld [vmem:[%s3128_s8 + $0x1718] sm:$0xff]  ;;  %2474 = vmatpush.msra.mxu2 %v919_v55 }
 0x35c   : > { %v787_v57 = vld [vmem:[%s3128_s8 + $0x10d8] sm:$0xff]  ;;  %2493 = vmatpush.msra.mxu3 %v987_v56 }
 0x35d   : > { %v855_v37 = vld [vmem:[%s3128_s8 + $0x12f8] sm:$0xff]  ;;  %2435 = vmatpush.msra.mxu0 %v787_v57 }
 0x35e   : > { %v915_v58 = vld [vmem:[%s3128_s8 + $0x14d8] sm:$0xff]  ;;  %2454 = vmatpush.msra.mxu1 %v855_v37 }
 0x35f   : > { %v983_v60 = vld [vmem:[%s3128_s8 + $0x16f8] sm:$0xff]  ;;  %2475 = vmatpush.msra.mxu2 %v915_v58 }
 0x360   : > { %v783_v61 = vld [vmem:[%s3128_s8 + $0x10b8] sm:$0xff]  ;;  %2494 = vmatpush.msra.mxu3 %v983_v60 }
 0x361   : > { %v851_v62 = vld [vmem:[%s3128_s8 + $0x12d8] sm:$0xff]  ;;  %2436 = vmatpush.msra.mxu0 %v783_v61 }
 0x362   : > { %v911_v2 = vld [vmem:[%s3128_s8 + $0x14b8] sm:$0xff]  ;;  %2455 = vmatpush.msra.mxu1 %v851_v62 }
 0x363   : > { %v979_v3 = vld [vmem:[%s3128_s8 + $0x16d8] sm:$0xff]  ;;  %2476 = vmatpush.msra.mxu2 %v911_v2 }
 0x364   : > { %v779_v6 = vld [vmem:[%s3128_s8 + $0x1098] sm:$0xff]  ;;  %2495 = vmatpush.msra.mxu3 %v979_v3 }
 0x365   : > { %v847_v8 = vld [vmem:[%s3128_s8 + $0x12b8] sm:$0xff]  ;;  %2437 = vmatpush.msra.mxu0 %v779_v6 }
 0x366   : > { %v907_v9 = vld [vmem:[%s3128_s8 + $0x1498] sm:$0xff]  ;;  %2456 = vmatpush.msra.mxu1 %v847_v8 }
 0x367   : > { %v975_v10 = vld [vmem:[%s3128_s8 + $0x16b8] sm:$0xff]  ;;  %2477 = vmatpush.msra.mxu2 %v907_v9 }
 0x368   : > { %v775_v11 = vld [vmem:[%s3128_s8 + $0x1078] sm:$0xff]  ;;  %2496 = vmatpush.msra.mxu3 %v975_v10 }
 0x369   : > { %v843_v14 = vld [vmem:[%s3128_s8 + $0x1298] sm:$0xff]  ;;  %2438 = vmatpush.msra.mxu0 %v775_v11 }
 0x36a   : > { %v903_v16 = vld [vmem:[%s3128_s8 + $0x1478] sm:$0xff]  ;;  %2457 = vmatpush.msra.mxu1 %v843_v14 }
 0x36b   : > { %v971_v0 = vld [vmem:[%s3128_s8 + $0x1698] sm:$0xff]  ;;  %2478 = vmatpush.msra.mxu2 %v903_v16 }
 0x36c   : > { %v771_v17 = vld [vmem:[%s3128_s8 + $0x1058] sm:$0xff]  ;;  %2497 = vmatpush.msra.mxu3 %v971_v0 }
 0x36d   : > { %v839_v18 = vld [vmem:[%s3128_s8 + $0x1278] sm:$0xff]  ;;  %2439 = vmatpush.msra.mxu0 %v771_v17 }
 0x36e   : > { %v899_v23 = vld [vmem:[%s3128_s8 + $0x1458] sm:$0xff]  ;;  %2458 = vmatpush.msra.mxu1 %v839_v18 }
 0x36f   : > { %v967_v24 = vld [vmem:[%s3128_s8 + $0x1678] sm:$0xff]  ;;  %2479 = vmatpush.msra.mxu2 %v899_v23 }
 0x370   : > { %v767_v7 = vld [vmem:[%s3128_s8 + $0x1038] sm:$0xff]  ;;  %2498 = vmatpush.msra.mxu3 %v967_v24 }
 0x371   : > { %v835_v26 = vld [vmem:[%s3128_s8 + $0x1258] sm:$0xff]  ;;  %2440 = vmatpush.msra.mxu0 %v767_v7 }
 0x372   : > { %v895_v27 = vld [vmem:[%s3128_s8 + $0x1438] sm:$0xff]  ;;  %2459 = vmatpush.msra.mxu1 %v835_v26 }
 0x373   : > { %v963_v59 = vld [vmem:[%s3128_s8 + $0x1658] sm:$0xff]  ;;  %2480 = vmatpush.msra.mxu2 %v895_v27 }
 0x374   : > { %v763_v28 = vld [vmem:[%s3128_s8 + $0x1018] sm:$0xff]  ;;  %2499 = vmatpush.msra.mxu3 %v963_v59 }
 0x375   : > { %v831_v29 = vld [vmem:[%s3128_s8 + $0x1238] sm:$0xff]  ;;  %2441 = vmatpush.msra.mxu0 %v763_v28 }
 0x376   : > { %v891_v30 = vld [vmem:[%s3128_s8 + $0x1418] sm:$0xff]  ;;  %2460 = vmatpush.msra.mxu1 %v831_v29  ;;  %2442 = vmatmul.f32.vlgmr.msra.gmra.mxu0 %v3361_v12 }
 0x377   : > { %v959_v63 = vld [vmem:[%s3128_s8 + $0x1638] sm:$0xff]  ;;  %2481 = vmatpush.msra.mxu2 %v891_v30 }
 0x378   : > { %v1079_v31 = vld [vmem:[%s3128_s8 + $0x19f8] sm:$0xff]  ;;  %2500 = vmatpush.msra.mxu3 %v959_v63  ;;  %2482 = vmatmul.f32.vlgmr.msra.gmra.mxu2 %v3364_v13 }
 0x379   : > { %v1207_v1 = vld [vmem:[%s3128_s8 + $0x1df8] sm:$0xff]  ;;  %2506 = vmatpush.msrb.mxu0 %v1079_v31 }
 0x37a   : > { %v827_v32 = vld [vmem:[%s3128_s8 + $0x1218] sm:$0xff]  ;;  %2546 = vmatpush.msrb.mxu2 %v1207_v1 }
 0x37b   : > { %v955_v35 = vld [vmem:[%s3128_s8 + $0x1618] sm:$0xff]  ;;  %2461 = vmatpush.msra.mxu1 %v827_v32 }
 0x37c   : > { %v1075_v36 = vld [vmem:[%s3128_s8 + $0x19d8] sm:$0xff]  ;;  %2501 = vmatpush.msra.mxu3 %v955_v35  ;;  %2462 = vmatmul.f32.vlgmr.msra.gmra.mxu1 %v3371_v20 }
 0x37d   : > { %v1143_v38 = vld [vmem:[%s3128_s8 + $0x1bf8] sm:$0xff]  ;;  %2502 = vmatmul.f32.vlgmr.msra.gmra.mxu3 %v3374_v22  ;;  %2507 = vmatpush.msrb.mxu0 %v1075_v36 }
 0x37e   : > { %v1203_v5 = vld [vmem:[%s3128_s8 + $0x1dd8] sm:$0xff]  ;;  %2526 = vmatpush.msrb.mxu1 %v1143_v38 }
 0x37f   : > { %v1271_v41 = vld [vmem:[%s3128_s8 + $0x1ff8] sm:$0xff]  ;;  %2547 = vmatpush.msrb.mxu2 %v1203_v5 }
 0x380   : > { %v1071_v12 = vld [vmem:[%s3128_s8 + $0x19b8] sm:$0xff]  ;;  %2566 = vmatpush.msrb.mxu3 %v1271_v41  ;;  %v1983_v41 = vpop.f32.mrf.mxu1 }
 0x381   : > { %v1139_v13 = vld [vmem:[%s3128_s8 + $0x1bd8] sm:$0xff]  ;;  %2508 = vmatpush.msrb.mxu0 %v1071_v12  ;;  %v1963_v12 = vpop.f32.mrf.mxu0 }
 0x382   : > { %v1199_v42 = vld [vmem:[%s3128_s8 + $0x1db8] sm:$0xff]  ;;  %2527 = vmatpush.msrb.mxu1 %v1139_v13  ;;  %v2003_v13 = vpop.f32.mrf.mxu2 }
 0x383   : > { %v1267_v43 = vld [vmem:[%s3128_s8 + $0x1fd8] sm:$0xff]  ;;  %2548 = vmatpush.msrb.mxu2 %v1199_v42  ;;  %v2023_v42 = vpop.f32.mrf.mxu3 }
 0x384   : > { %v1067_v44 = vld [vmem:[%s3128_s8 + $0x1998] sm:$0xff]  ;;  %2567 = vmatpush.msrb.mxu3 %v1267_v43 }
 0x385   : > { %v1135_v15 = vld [vmem:[%s3128_s8 + $0x1bb8] sm:$0xff]  ;;  %2509 = vmatpush.msrb.mxu0 %v1067_v44 }
 0x386   : > { %v1195_v20 = vld [vmem:[%s3128_s8 + $0x1d98] sm:$0xff]  ;;  %2528 = vmatpush.msrb.mxu1 %v1135_v15 }
 0x387   : > { %v1263_v22 = vld [vmem:[%s3128_s8 + $0x1fb8] sm:$0xff]  ;;  %2549 = vmatpush.msrb.mxu2 %v1195_v20 }
 0x388   : > { %v1063_v4 = vld [vmem:[%s3128_s8 + $0x1978] sm:$0xff]  ;;  %2568 = vmatpush.msrb.mxu3 %v1263_v22  ;;  %v2063_v43 = vpop.f32.mrf.mxu1 }
 0x389   : > { %v1131_v45 = vld [vmem:[%s3128_s8 + $0x1b98] sm:$0xff]  ;;  %2510 = vmatpush.msrb.mxu0 %v1063_v4  ;;  %v2043_v44 = vpop.f32.mrf.mxu0 }
 0x38a   : > { %v1191_v46 = vld [vmem:[%s3128_s8 + $0x1d78] sm:$0xff]  ;;  %2529 = vmatpush.msrb.mxu1 %v1131_v45  ;;  %v2083_v15 = vpop.f32.mrf.mxu2 }
 0x38b   : > { %v1259_v19 = vld [vmem:[%s3128_s8 + $0x1f98] sm:$0xff]  ;;  %2550 = vmatpush.msrb.mxu2 %v1191_v46  ;;  %v2103_v20 = vpop.f32.mrf.mxu3 }
 0x38c   : > { %v1059_v47 = vld [vmem:[%s3128_s8 + $0x1958] sm:$0xff]  ;;  %2569 = vmatpush.msrb.mxu3 %v1259_v19 }
 0x38d   : > { %v1127_v21 = vld [vmem:[%s3128_s8 + $0x1b78] sm:$0xff]  ;;  %2511 = vmatpush.msrb.mxu0 %v1059_v47  ;;  %v1984_v47 = vadd.f32 %v1983_v41, %v1963_v12 }
 0x38e   : > { %v1187_v48 = vld [vmem:[%s3128_s8 + $0x1d58] sm:$0xff]  ;;  %2530 = vmatpush.msrb.mxu1 %v1127_v21 }
 0x38f   : > { %v1255_v49 = vld [vmem:[%s3128_s8 + $0x1f78] sm:$0xff]  ;;  %2551 = vmatpush.msrb.mxu2 %v1187_v48 }
 0x390   : > { %v1055_v50 = vld [vmem:[%s3128_s8 + $0x1938] sm:$0xff]  ;;  %2570 = vmatpush.msrb.mxu3 %v1255_v49  ;;  %v2143_v22 = vpop.f32.mrf.mxu1 }
 0x391   : > { %v1123_v52 = vld [vmem:[%s3128_s8 + $0x1b58] sm:$0xff]  ;;  %2512 = vmatpush.msrb.mxu0 %v1055_v50  ;;  %v2123_v4 = vpop.f32.mrf.mxu0 }
 0x392   : > { %v1183_v25 = vld [vmem:[%s3128_s8 + $0x1d38] sm:$0xff]  ;;  %2531 = vmatpush.msrb.mxu1 %v1123_v52  ;;  %v2163_v45 = vpop.f32.mrf.mxu2 }
 0x393   : > { %v1251_v53 = vld [vmem:[%s3128_s8 + $0x1f58] sm:$0xff]  ;;  %2552 = vmatpush.msrb.mxu2 %v1183_v25 }
 0x394   : > { %v1051_v54 = vld [vmem:[%s3128_s8 + $0x1918] sm:$0xff]  ;;  %2571 = vmatpush.msrb.mxu3 %v1251_v53 }
 0x395   : > { %v1119_v55 = vld [vmem:[%s3128_s8 + $0x1b38] sm:$0xff]  ;;  %2513 = vmatpush.msrb.mxu0 %v1051_v54 }
 0x396   : > { %v1179_v56 = vld [vmem:[%s3128_s8 + $0x1d18] sm:$0xff]  ;;  %2532 = vmatpush.msrb.mxu1 %v1119_v55 }
 0x397   : > { %v1247_v57 = vld [vmem:[%s3128_s8 + $0x1f38] sm:$0xff]  ;;  %2553 = vmatpush.msrb.mxu2 %v1179_v56 }
 0x398   : > { %v1047_v37 = vld [vmem:[%s3128_s8 + $0x18f8] sm:$0xff]  ;;  %2572 = vmatpush.msrb.mxu3 %v1247_v57  ;;  %v2223_v46 = vpop.f32.mrf.mxu1 }
 0x399   : > { %v1115_v58 = vld [vmem:[%s3128_s8 + $0x1b18] sm:$0xff]  ;;  %2514 = vmatpush.msrb.mxu0 %v1047_v37 }
 0x39a   : > { %v1175_v60 = vld [vmem:[%s3128_s8 + $0x1cf8] sm:$0xff]  ;;  %2533 = vmatpush.msrb.mxu1 %v1115_v58  ;;  %v2243_v19 = vpop.f32.mrf.mxu2 }
 0x39b   : > { %v1243_v61 = vld [vmem:[%s3128_s8 + $0x1f18] sm:$0xff]  ;;  %2554 = vmatpush.msrb.mxu2 %v1175_v60 }
 0x39c   : > { %v1043_v62 = vld [vmem:[%s3128_s8 + $0x18d8] sm:$0xff]  ;;  %2573 = vmatpush.msrb.mxu3 %v1243_v61 }
 0x39d   : > { %v1111_v2 = vld [vmem:[%s3128_s8 + $0x1af8] sm:$0xff]  ;;  %2515 = vmatpush.msrb.mxu0 %v1043_v62 }
 0x39e   : > { %v1171_v3 = vld [vmem:[%s3128_s8 + $0x1cd8] sm:$0xff]  ;;  %2534 = vmatpush.msrb.mxu1 %v1111_v2 }
 0x39f   : > { %v1239_v6 = vld [vmem:[%s3128_s8 + $0x1ef8] sm:$0xff]  ;;  %2555 = vmatpush.msrb.mxu2 %v1171_v3 }
 0x3a0   : > { %v1039_v8 = vld [vmem:[%s3128_s8 + $0x18b8] sm:$0xff]  ;;  %2574 = vmatpush.msrb.mxu3 %v1239_v6 }
 0x3a1   : > { %v1107_v9 = vld [vmem:[%s3128_s8 + $0x1ad8] sm:$0xff]  ;;  %2516 = vmatpush.msrb.mxu0 %v1039_v8 }
 0x3a2   : > { %v1167_v10 = vld [vmem:[%s3128_s8 + $0x1cb8] sm:$0xff]  ;;  %2535 = vmatpush.msrb.mxu1 %v1107_v9  ;;  %v2323_v50 = vpop.f32.mrf.mxu2 }
 0x3a3   : > { %v1235_v11 = vld [vmem:[%s3128_s8 + $0x1ed8] sm:$0xff]  ;;  %2556 = vmatpush.msrb.mxu2 %v1167_v10 }
 0x3a4   : > { %v1035_v14 = vld [vmem:[%s3128_s8 + $0x1898] sm:$0xff]  ;;  %2575 = vmatpush.msrb.mxu3 %v1235_v11 }
 0x3a5   : > { %v1103_v16 = vld [vmem:[%s3128_s8 + $0x1ab8] sm:$0xff]  ;;  %2517 = vmatpush.msrb.mxu0 %v1035_v14 }
 0x3a6   : > { %v1163_v0 = vld [vmem:[%s3128_s8 + $0x1c98] sm:$0xff]  ;;  %2536 = vmatpush.msrb.mxu1 %v1103_v16 }
 0x3a7   : > { %v1231_v17 = vld [vmem:[%s3128_s8 + $0x1eb8] sm:$0xff]  ;;  %2557 = vmatpush.msrb.mxu2 %v1163_v0 }
 0x3a8   : > { %v1031_v18 = vld [vmem:[%s3128_s8 + $0x1878] sm:$0xff]  ;;  %2576 = vmatpush.msrb.mxu3 %v1231_v17 }
 0x3a9   : > { %v1099_v23 = vld [vmem:[%s3128_s8 + $0x1a98] sm:$0xff]  ;;  %2518 = vmatpush.msrb.mxu0 %v1031_v18 }
 0x3aa   : > { %v1159_v24 = vld [vmem:[%s3128_s8 + $0x1c78] sm:$0xff]  ;;  %2537 = vmatpush.msrb.mxu1 %v1099_v23 }
 0x3ab   : > { %v1227_v7 = vld [vmem:[%s3128_s8 + $0x1e98] sm:$0xff]  ;;  %2558 = vmatpush.msrb.mxu2 %v1159_v24 }
 0x3ac   : > { %v1027_v26 = vld [vmem:[%s3128_s8 + $0x1858] sm:$0xff]  ;;  %2577 = vmatpush.msrb.mxu3 %v1227_v7 }
 0x3ad   : > { %v1095_v27 = vld [vmem:[%s3128_s8 + $0x1a78] sm:$0xff]  ;;  %2519 = vmatpush.msrb.mxu0 %v1027_v26 }
 0x3ae   : > { %v1155_v59 = vld [vmem:[%s3128_s8 + $0x1c58] sm:$0xff]  ;;  %2538 = vmatpush.msrb.mxu1 %v1095_v27 }
 0x3af   : > { %v1223_v28 = vld [vmem:[%s3128_s8 + $0x1e78] sm:$0xff]  ;;  %2559 = vmatpush.msrb.mxu2 %v1155_v59 }
 0x3b0   : > { %v1023_v29 = vld [vmem:[%s3128_s8 + $0x1838] sm:$0xff]  ;;  %2578 = vmatpush.msrb.mxu3 %v1223_v28 }
 0x3b1   : > { %v1091_v30 = vld [vmem:[%s3128_s8 + $0x1a58] sm:$0xff]  ;;  %2520 = vmatpush.msrb.mxu0 %v1023_v29 }
 0x3b2   : > { %v1151_v63 = vld [vmem:[%s3128_s8 + $0x1c38] sm:$0xff]  ;;  %2539 = vmatpush.msrb.mxu1 %v1091_v30 }
 0x3b3   : > { %v1219_v31 = vld [vmem:[%s3128_s8 + $0x1e58] sm:$0xff]  ;;  %2560 = vmatpush.msrb.mxu2 %v1151_v63 }
 0x3b4   : > { %v1019_v1 = vld [vmem:[%s3128_s8 + $0x1818] sm:$0xff]  ;;  %2579 = vmatpush.msrb.mxu3 %v1219_v31 }
 0x3b5   : > { %v1087_v32 = vld [vmem:[%s3128_s8 + $0x1a38] sm:$0xff]  ;;  %2521 = vmatpush.msrb.mxu0 %v1019_v1 }
 0x3b6   : > { %v1147_v35 = vld [vmem:[%s3128_s8 + $0x1c18] sm:$0xff]  ;;  %2540 = vmatpush.msrb.mxu1 %v1087_v32  ;;  %2522 = vmatmul.f32.vlgmr.msrb.gmra.mxu0 %v3441_v33  ;;  %v2183_v33 = vpop.f32.mrf.mxu3 }
 0x3b7   : > { %v1215_v36 = vld [vmem:[%s3128_s8 + $0x1e38] sm:$0xff]  ;;  %2561 = vmatpush.msrb.mxu2 %v1147_v35 }
 0x3b8   : > { %v1083_v38 = vld [vmem:[%s3128_s8 + $0x1a18] sm:$0xff]  ;;  %2580 = vmatpush.msrb.mxu3 %v1215_v36  ;;  %2562 = vmatmul.f32.vlgmr.msrb.gmra.mxu2 %v3444_v34  ;;  %v2203_v34 = vpop.f32.mrf.mxu0 }
 0x3b9   : > { %v1211_v5 = vld [vmem:[%s3128_s8 + $0x1e18] sm:$0xff]  ;;  %2541 = vmatpush.msrb.mxu1 %v1083_v38 }
 0x3ba   : > { %2581 = vmatpush.msrb.mxu3 %v1211_v5  ;;  %2542 = vmatmul.f32.vlgmr.msrb.gmra.mxu1 %v3451_v39  ;;  %v2303_v39 = vpop.f32.mrf.mxu1  ;;  %v2601_v5 = vlaneseq }
 0x3bb   : > { %2582 = vmatmul.f32.vlgmr.msrb.gmra.mxu3 %v3454_v40  ;;  %v2004_v40 = vadd.f32 %v2003_v13, %v1984_v47  ;;  %v2403_v62 = vpop.f32.mrf.mxu2  ;;  %v245_v13 = vld [vmem:[%s213_s18] sm:$0xf] }
 0x3bc   : > { %vm2603_vm3 = vcmp.lt.s32.totalorder %v2601_v5, 512 }
 0x3bd   : > { %v2024_v52 = vadd.f32 %v2023_v42, %v2004_v40 }
 0x3be   : > { %v2263_v21 = vpop.f32.mrf.mxu3 }
 0x3bf   : > { %v2044_v54 = vadd.f32 %v2043_v44, %v2024_v52 }
 0x3c0   : > { %v2283_v48 = vpop.f32.mrf.mxu0 }
 0x3c1   : > { %v2304_v49 = vadd.f32 %v2303_v39, %v2283_v48  ;;  %v2064_v57 = vadd.f32 %v2063_v43, %v2044_v54 }
 0x3c2   : > { %v2383_v58 = vpop.f32.mrf.mxu1 }
 0x3c3   : > { %v2324_v25 = vadd.f32 %v2323_v50, %v2304_v49  ;;  %v2084_v60 = vadd.f32 %v2083_v15, %v2064_v57 }
 0x3c5   : > { %v2104_v2 = vadd.f32 %v2103_v20, %v2084_v60 }
 0x3c6   : > { %v2343_v53 = vpop.f32.mrf.mxu3 }
 0x3c7   : > { %v2344_v55 = vadd.f32 %v2343_v53, %v2324_v25  ;;  %v2124_v8 = vadd.f32 %v2123_v4, %v2104_v2 }
 0x3c8   : > { %v2363_v56 = vpop.f32.mrf.mxu0 }
 0x3c9   : > { %v2364_v37 = vadd.f32 %v2363_v56, %v2344_v55  ;;  %v2144_v11 = vadd.f32 %v2143_v22, %v2124_v8 }
 0x3cb   : > { %v2384_v61 = vadd.f32 %v2383_v58, %v2364_v37  ;;  %v2164_v0 = vadd.f32 %v2163_v45, %v2144_v11 }
 0x3cd   : > { %v2404_v3 = vadd.f32 %v2403_v62, %v2384_v61  ;;  %v2184_v23 = vadd.f32 %v2183_v33, %v2164_v0 }
 0x3ce   : > { %v2423_v6 = vpop.f32.mrf.mxu3 }
 0x3cf   : > { %v2424_v10 = vadd.f32 %v2423_v6, %v2404_v3  ;;  %v2204_v26 = vadd.f32 %v2203_v34, %v2184_v23 }
 0x3d1   : > { %v2224_v28 = vadd.f32 %v2223_v46, %v2204_v26 }
 0x3d3   : > { %v2244_v63 = vadd.f32 %v2243_v19, %v2224_v28 }
 0x3d5   : > { %v2264_v32 = vadd.f32 %v2263_v21, %v2244_v63 }
 0x3d7   : > { %v2591_v41 = vrot.slane %v2264_v32, 6 }
 0x3f3   : > { %v2443_v9 = vpop.f32.mrf.mxu0 }
 0x3f4   : > { %v2444_v14 = vadd.f32 %v2443_v9, %v2424_v10 }
 0x3f9   : > { %v2463_v16 = vpop.f32.mrf.mxu1 }
 0x3fa   : > { %v2464_v18 = vadd.f32 %v2463_v16, %v2444_v14 }
 0x3fb   : > { %v2483_v17 = vpop.f32.mrf.mxu2 }
 0x3fc   : > { %v2484_v24 = vadd.f32 %v2483_v17, %v2464_v18 }
 0x400   : > { %v2503_v7 = vpop.f32.mrf.mxu3 }
 0x401   : > { %v2504_v27 = vadd.f32 %v2503_v7, %v2484_v24 }
 0x433   : > { %v2523_v59 = vpop.f32.mrf.mxu0 }
 0x434   : > { %v2524_v29 = vadd.f32 %v2523_v59, %v2504_v27 }
 0x437   : > { %v2543_v30 = vpop.f32.mrf.mxu1 }
 0x438   : > { %v2544_v31 = vadd.f32 %v2543_v30, %v2524_v29 }
 0x43b   : > { %v2563_v1 = vpop.f32.mrf.mxu2 }
 0x43c   : > { %v2564_v35 = vadd.f32 %v2563_v1, %v2544_v31 }
 0x43e   : > { %v2583_v36 = vpop.f32.mrf.mxu3 }
 0x43f   : > { %v2584_v38 = vadd.f32 %v2583_v36, %v2564_v35 }
 0x441   : > { %v2592_v12 = vrot.slane %v2584_v38, 5 }
 0x443   : > { %v2596_v42 = vsel %vm2595_vm1, %v2591_v41, %v2592_v12 }
 0x444   : > { %v2598_v43 = vsel %vm2597_vm2, %v4025_v51, %v2596_v42 }
 0x445   : > { %v2600_v44 = vadd.f32 %v2598_v43, %v245_v13 }
 0x447   : > { %2605 = vst.msk [vmem:[%s241_s20] sm:$0xf] %vm2603_vm3, %v2600_v44 }
 0x448   : > { %2925 = shalt.err (!%p2922_p5)
}
 0x449   : > { %2751 = dma.vmem_to_hbm [thread:$0]  (%p3079_p11), %s2620_s23, 64, %s2622_s22, %s2607_s21  }
 0x44a PF: > { %s2633_s29 = sand.u32 1, %s2956_s12   ;;  %p4337_p7 = scmp.ge.s32.totalorder %s2968_s15, 2 }
 0x44b   : > { %s2634_s30 = scalar_lea.sflag [#allocation4], %s2633_s29 }
 0x44c   : > { %p2765_p9 = pnand %p4337_p7, %p3083_p12 }
 0x44e   : > { %p2766_p13 = pneg %p2765_p9 }
 0x450   : > { %2951 = dma.done.wait (%p2766_p13), %s2634_s30, 64  }
 0x451   : > { %2953 = vsyncadd (%p2766_p13), %s2634_s30, 4294967232  ;;  %p17_p0 = scmp.ge.s32.totalorder %s3015_s16, 4   ;;  %s4338_s12 = smov %s2960_s13 }
 0x452   : > { %s4339_s13 = smov %s2964_s14  ;;  %s4340_s14 = smov %s3026_s19 }
 0x453   : > { %s4341_s15 = smov %s3015_s16  ;;  %19 = sbr.rel (!%p17_p0) target bundleno = 8 (0x8), region = 93 }
 0x458   :  { %2640 = vsyncpa [#allocation3], 1 }
 0x459   :  { %2642 = vsyncpa [#allocation3 + $0x1], 1 }
 0x45a   :  { %2643 = vsyncpa [#allocation6], 1 }
 0x45b   :  { %2645 = vsyncpa [#allocation6 + $0x1], 1 }
 0x45c   :  { %2646 = vsyncpa [#allocation4], 1 }
 0x45d   :  { %2648 = vsyncpa [#allocation4 + $0x1], 1 }

</bundles_post_ra>
